<compile_context>
chip_gen: v7x
topology: tpu7x:2x2x1
jax: 0.10.0
libtpu: 0.0.40
codegen_flags: <defaults>
</compile_context>

<pallas_src>
import functools

import jax
import jax.numpy as jnp
from jax import lax
from jax.experimental import pallas as pl
from jax.experimental.pallas import tpu as pltpu

BN_EPS = 1e-5   # nn.BatchNorm2d default eps (eval: running_mean=0, running_var=1, gamma=1, beta=0)
LN_EPS = 1e-5   # nn.LayerNorm default eps (gamma=1, beta=0 at init)


# ----------------------------- Pallas kernels ------------------------------

def _mm_kernel(a_ref, b_ref, s_ref, c_ref, o_ref, *, relu):
    """One row-tile of patches @ weight, fused scale/bias(/ReLU). Used for conv1 only."""
    acc = jnp.dot(a_ref[...], b_ref[...], preferred_element_type=jnp.float32)
    acc = acc * s_ref[...] + c_ref[...]
    if relu:
        acc = jnp.maximum(acc, 0.0)
    o_ref[...] = acc.astype(o_ref.dtype)


def _conv_kernel(x_ref, w_ref, s_ref, c_ref, o_ref, *, kh, kw, relu):
    """Fused im2col conv for one image.

    x_ref: (Hp, Wp, C) spatially pre-padded activation (bf16, resident in VMEM)
    w_ref: (kh*kw, C, O) per-tap weight matrices (bf16)
    s_ref, c_ref: (1, O) folded BN/bias scale & shift (f32)
    o_ref: (Ho, Wo, O)
    """
    Ho, Wo, O = o_ref.shape
    scale = s_ref[...]
    shift = c_ref[...]

    def row(ho, carry):
        acc = jnp.zeros((Wo, O), jnp.float32)
        for i in range(kh):
            for j in range(kw):
                a = x_ref[ho + i, pl.ds(j, Wo), :]                    # (Wo, C)
                acc = acc + jnp.dot(a, w_ref[i * kw + j],
                                    preferred_element_type=jnp.float32)
        acc = acc * scale + shift
        if relu:
            acc = jnp.maximum(acc, 0.0)
        o_ref[ho] = acc.astype(o_ref.dtype)
        return carry

    lax.fori_loop(0, Ho, row, 0)


def _tail_kernel(x_ref, w8_ref, w9_ref, wf_ref, bf_ref, o_ref, pad_ref, *, eps):
    """Fused tail for one row: conv8 (1,3) -> conv9 (1,3) -> LayerNorm(C) -> fc8 (1x1).

    x_ref: (W+2, C256) W-padded input row (bf16)
    pad_ref: (W+2, C128) VMEM scratch used as the zero-padded conv8 output.
    """
    Wo, _ = o_ref.shape

    # conv8: (1,3), padding (0,1), no bias (input already W-padded outside)
    h = jnp.zeros((Wo, w8_ref.shape[2]), jnp.float32)
    for j in range(w8_ref.shape[0]):
        h = h + jnp.dot(x_ref[pl.ds(j, Wo), :], w8_ref[j],
                        preferred_element_type=jnp.float32)

    # conv9: (1,3), padding (0,1), no bias — stage the zero-padded conv8 output in VMEM
    pad_ref[...] = jnp.zeros_like(pad_ref)
    pad_ref[pl.ds(1, Wo), :] = h.astype(pad_ref.dtype)
    h2 = jnp.zeros((Wo, w9_ref.shape[2]), jnp.float32)
    for j in range(w9_ref.shape[0]):
        h2 = h2 + jnp.dot(pad_ref[pl.ds(j, Wo), :], w9_ref[j],
                          preferred_element_type=jnp.float32)

    # LayerNorm(128) over channels (gamma=1, beta=0 -> PyTorch default init)
    mean = jnp.mean(h2, axis=-1, keepdims=True)
    hc = h2 - mean
    var = jnp.mean(hc * hc, axis=-1, keepdims=True)
    ln = hc * lax.rsqrt(var + eps)

    # fc8: 1x1 conv + bias (output channels padded to a lane multiple, sliced outside)
    y = jnp.dot(ln.astype(jnp.bfloat16), wf_ref[...],
                preferred_element_type=jnp.float32) + bf_ref[...]
    o_ref[...] = y.astype(o_ref.dtype)


# ------------------------------ kernel wrappers -----------------------------

def _lane_pad(n):
    return ((n + 127) // 128) * 128


def _row_tile(m, cap=1024):
    """Largest multiple-of-8 divisor of m (<= cap); prefer >=2 grid steps (v7x megacore)."""
    if m % 8:
        return m                      # single full-extent block (always legal)
    divs = [d for d in range(8, min(m, cap) + 1, 8) if m % d == 0]
    if not divs:
        return m
    tm = divs[-1]
    if tm == m and (m // 2) in divs:  # give the second TensorCore something to do
        tm = m // 2
    return tm


def conv_im2col(x, w2d, scale, bias, kh, kw, ph, pw, relu, out_dtype=jnp.bfloat16):
    """im2col (JAX) + fused Pallas matmul. Only used for conv1 (Cin=1, K=9 is tiny)."""
    N, H, W, C = x.shape
    xp = jnp.pad(x, ((0, 0), (ph, ph), (pw, pw), (0, 0)))
    Ho = H + 2 * ph - kh + 1
    Wo = W + 2 * pw - kw + 1
    cols = [xp[:, i:i + Ho, j:j + Wo, :] for i in range(kh) for j in range(kw)]
    patches = jnp.concatenate(cols, axis=-1).reshape(N * Ho * Wo, kh * kw * C)
    M, K = patches.shape            # K stays un-padded: full-extent BlockSpec dims are legal
    O = w2d.shape[1]
    tm = _row_tile(M)
    out = pl.pallas_call(
        functools.partial(_mm_kernel, relu=relu),
        out_shape=jax.ShapeDtypeStruct((M, O), out_dtype),
        grid=(M // tm,),
        in_specs=[
            pl.BlockSpec((tm, K), lambda i: (i, 0)),
            pl.BlockSpec((K, O), lambda i: (0, 0)),
            pl.BlockSpec((1, O), lambda i: (0, 0)),
            pl.BlockSpec((1, O), lambda i: (0, 0)),
        ],
        out_specs=pl.BlockSpec((tm, O), lambda i: (i, 0)),
        compiler_params=pltpu.CompilerParams(dimension_semantics=("parallel",)),
    )(patches, w2d, scale.reshape(1, O), bias.reshape(1, O))
    return out.reshape(N, Ho, Wo, O)


def conv_fused(x, w, scale, bias, kh, kw, ph, pw, relu, out_dtype=jnp.bfloat16):
    """Conv2d with in-kernel im2col (+ folded bias/BN, optional ReLU). Grid over batch."""
    N, H, W, C = x.shape
    if ph or pw:
        x = jnp.pad(x, ((0, 0), (ph, ph), (pw, pw), (0, 0)))
    Hp, Wp = H + 2 * ph, W + 2 * pw
    Ho, Wo = Hp - kh + 1, Wp - kw + 1
    O = w.shape[-1]
    return pl.pallas_call(
        functools.partial(_conv_kernel, kh=kh, kw=kw, relu=relu),
        out_shape=jax.ShapeDtypeStruct((N, Ho, Wo, O), out_dtype),
        grid=(N,),
        in_specs=[
            pl.BlockSpec((None, Hp, Wp, C), lambda n: (n, 0, 0, 0)),
            pl.BlockSpec((kh * kw, C, O), lambda n: (0, 0, 0)),
            pl.BlockSpec((1, O), lambda n: (0, 0)),
            pl.BlockSpec((1, O), lambda n: (0, 0)),
        ],
        out_specs=pl.BlockSpec((None, Ho, Wo, O), lambda n: (n, 0, 0, 0)),
        compiler_params=pltpu.CompilerParams(dimension_semantics=("parallel",)),
    )(x, w, scale.reshape(1, O), bias.reshape(1, O))


def tail_block(x, w8, w9, wf, bf, nclass, eps=LN_EPS):
    """conv8 -> conv9 -> LayerNorm(128) -> fc8, one fused pallas_call (grid over N*H rows)."""
    N, H, W, C = x.shape            # H == 1 for the 32-pixel-high CRNN input
    xp = jnp.pad(x, ((0, 0), (0, 0), (1, 1), (0, 0))).reshape(N * H, W + 2, C)
    Opad = wf.shape[-1]
    out = pl.pallas_call(
        functools.partial(_tail_kernel, eps=eps),
        out_shape=jax.ShapeDtypeStruct((N * H, W, Opad), jnp.float32),
        grid=(N * H,),
        in_specs=[
            pl.BlockSpec((None, W + 2, C), lambda r: (r, 0, 0)),
            pl.BlockSpec(w8.shape, lambda r: (0, 0, 0)),
            pl.BlockSpec(w9.shape, lambda r: (0, 0, 0)),
            pl.BlockSpec(wf.shape, lambda r: (0, 0)),
            pl.BlockSpec((1, Opad), lambda r: (0, 0)),
        ],
        out_specs=pl.BlockSpec((None, W, Opad), lambda r: (r, 0, 0)),
        scratch_shapes=[pltpu.VMEM((W + 2, w8.shape[2]), jnp.bfloat16)],
        compiler_params=pltpu.CompilerParams(dimension_semantics=("parallel",)),
    )(xp, w8, w9, wf, bf.reshape(1, Opad))
    out = out.reshape(N, H, W, Opad)[..., :nclass]   # drop the zero lane-padding channels
    # PyTorch: fc8 -> (N, nclass, 1, W); squeeze(2) -> (N, nclass, W)
    return jnp.transpose(out[:, 0], (0, 2, 1))


# -------------------------------- JAX glue ----------------------------------

def maxpool(x, kh, kw):
    N, H, W, C = x.shape
    return x.reshape(N, H // kh, kh, W // kw, kw, C).max(axis=(2, 4))


# ------------------------------- parameters ---------------------------------

def _xavier_taps(key, kh, kw, cin, cout, cin_pad=None, cout_pad=None):
    """Weight as (kh*kw, Cin, Cout) tap matrices, optionally zero-padded to lane-dense sizes."""
    fan_in = kh * kw * cin
    fan_out = kh * kw * cout
    std = (2.0 / (fan_in + fan_out)) ** 0.5
    w = std * jax.random.normal(key, (kh * kw, cin, cout), dtype=jnp.float32)
    if cin_pad is not None and cin_pad > cin:
        w = jnp.pad(w, ((0, 0), (0, cin_pad - cin), (0, 0)))     # dead input channels -> 0 rows
    if cout_pad is not None and cout_pad > cout:
        w = jnp.pad(w, ((0, 0), (0, 0), (0, cout_pad - cout)))   # dead output channels -> 0 cols
    return w.astype(jnp.bfloat16)


def init_params(key, channel=1, nclass=64):
    ks = jax.random.split(key, 11)
    npad = _lane_pad(nclass)
    p = {
        # conv1: channel -> 64, outputs padded to 128 lanes; stored as the 2-D im2col matrix
        "w1": _xavier_taps(ks[0], 3, 3, channel, 64, cout_pad=128).reshape(9 * channel, 128),
        # conv2: 64 -> 64, both input (dead zero channels from conv1) and output padded to 128
        "w2": _xavier_taps(ks[1], 3, 3, 64, 64, cin_pad=128, cout_pad=128),
        # conv3: 64 -> 128, dead input channels -> zero rows
        "w3": _xavier_taps(ks[2], 3, 3, 64, 128, cin_pad=128),
        "w4": _xavier_taps(ks[3], 3, 3, 128, 128),
        "w5": _xavier_taps(ks[4], 3, 3, 128, 128),
        "w6": _xavier_taps(ks[5], 3, 3, 128, 128),
        "w7": _xavier_taps(ks[6], 2, 1, 256, 128),
        "w7_2": _xavier_taps(ks[7], 3, 3, 128, 256),
        "w8": _xavier_taps(ks[8], 1, 3, 256, 128),
        "w9": _xavier_taps(ks[9], 1, 3, 128, 128),
        # fc8: 1x1 conv 128 -> nclass, output padded to a lane multiple (sliced after the kernel)
        "w_fc8": _xavier_taps(ks[10], 1, 1, 128, nclass, cout_pad=npad).reshape(128, npad),
        "b_fc8": jnp.zeros((npad,), jnp.float32),   # per init_params(): conv biases = 0
    }
    return p


# -------------------------------- forward -----------------------------------

def crnn_forward(x_nchw, p, nclass):
    x = jnp.transpose(x_nchw, (0, 2, 3, 1)).astype(jnp.bfloat16)  # NCHW -> NHWC, bf16

    def bns(c):   # eval-mode BN: running_mean=0, running_var=1, gamma=1, beta=0
        return jnp.full((c,), (1.0 + BN_EPS) ** -0.5, jnp.float32)

    def ones(c):
        return jnp.ones((c,), jnp.float32)

    def zeros(c):
        return jnp.zeros((c,), jnp.float32)

    # conv1 + bn1 + relu + pool1   (Cin=1 -> tiny im2col path, O padded 64->128)
    x = conv_im2col(x, p["w1"], bns(128), zeros(128), 3, 3, 1, 1, relu=True)
    x = maxpool(x, 2, 2)
    # conv2 + bn2 + relu + pool2   (fused im2col-in-kernel from here on)
    x = conv_fused(x, p["w2"], bns(128), zeros(128), 3, 3, 1, 1, relu=True)
    x = maxpool(x, 2, 2)
    # conv3 + bn3 + relu
    x = conv_fused(x, p["w3"], bns(128), zeros(128), 3, 3, 1, 1, relu=True)
    # conv4 + bn4 + relu + pool4
    x = conv_fused(x, p["w4"], bns(128), zeros(128), 3, 3, 1, 1, relu=True)
    x = maxpool(x, 2, 2)
    # conv5 + bn5 + relu
    x = conv_fused(x, p["w5"], bns(128), zeros(128), 3, 3, 1, 1, relu=True)

    # left branch: conv6 + relu6 + pool6_l ; right branch: pool6_r(x) ; concat on channels
    left = conv_fused(x, p["w6"], ones(128), zeros(128), 3, 3, 1, 1, relu=True)
    left = maxpool(left, 2, 1)
    right = maxpool(x, 2, 1)
    x = jnp.concatenate([left, right], axis=-1)          # 256 channels

    # conv7 (2,1) no bias ; conv7_2 3x3 no bias + bn7 (no relu)
    x = conv_fused(x, p["w7"], ones(128), zeros(128), 2, 1, 0, 0, relu=False)
    x = conv_fused(x, p["w7_2"], bns(256), zeros(256), 3, 3, 1, 1, relu=False)

    # TODO(synk): the x1 branch (LayerNorm(256) -> fc9 with 8192*3 channels), encode_label()
    # and the CTC/MC losses only feed training; eval forward returns x alone, so they are omitted.

    # fused tail: conv8 (1,3) -> conv9 (1,3) -> LayerNorm(128) -> fc8 (1x1) -> squeeze height
    return tail_block(x, p["w8"], p["w9"], p["w_fc8"], p["b_fc8"], nclass)


# ---------------------------------- main -------------------------------------

if __name__ == "__main__":
    key = jax.random.PRNGKey(0)
    k_in, k_p = jax.random.split(key)

    # Height must be 32 (pools /16 then the (2,1) conv7 -> height 1), width small.
    N, C, H, W = 2, 1, 32, 64
    nclass = 64

    x = jax.random.normal(k_in, (N, C, H, W), dtype=jnp.float32)
    params = init_params(k_p, channel=C, nclass=nclass)

    fwd = jax.jit(functools.partial(crnn_forward, nclass=nclass))
    out = fwd(x, params)
    jax.block_until_ready(out)

    assert out.shape == (N, nclass, W // 8), out.shape
    assert jnp.all(jnp.isfinite(out))
    print("KERNEL_OK")
</pallas_src>

<mosaic_0001>
module attributes {stable_mosaic.version = 11 : i64} {
  func.func @_mm_kernel(%arg0: i32, %arg1: memref<1024x9xbf16, #tpu.memory_space<vmem>>, %arg2: memref<9x128xbf16, #tpu.memory_space<vmem>>, %arg3: memref<1x128xf32, #tpu.memory_space<vmem>>, %arg4: memref<1x128xf32, #tpu.memory_space<vmem>>, %arg5: memref<1024x128xbf16, #tpu.memory_space<vmem>>) attributes {dimension_semantics = [#tpu.dimension_semantics<parallel>], iteration_bounds = array<i64: 4>, scalar_prefetch = 0 : i64, scratch_operands = 0 : i64, tpu.core_type = #tpu.core_type<tc>, window_params = [{transform_indices = @transform_0, window_bounds = array<i64: 1024, 9>}, {pipeline_mode = #tpu.pipeline_mode<synchronous>, transform_indices = @transform_1, window_bounds = array<i64: 9, 128>}, {pipeline_mode = #tpu.pipeline_mode<synchronous>, transform_indices = @transform_2, window_bounds = array<i64: 1, 128>}, {pipeline_mode = #tpu.pipeline_mode<synchronous>, transform_indices = @transform_3, window_bounds = array<i64: 1, 128>}, {transform_indices = @transform_4, window_bounds = array<i64: 1024, 128>}]} {
    %c0 = arith.constant 0 : index
    %c0_0 = arith.constant 0 : index
    %0 = vector.load %arg1[%c0, %c0_0] : memref<1024x9xbf16, #tpu.memory_space<vmem>>, vector<1024x9xbf16>
    %c0_1 = arith.constant 0 : index
    %c0_2 = arith.constant 0 : index
    %1 = vector.load %arg2[%c0_1, %c0_2] : memref<9x128xbf16, #tpu.memory_space<vmem>>, vector<9x128xbf16>
    %cst = arith.constant dense<0.000000e+00> : vector<1024x128xf32>
    %2 = tpu.matmul %0, %1, %cst {dimension_numbers = #tpu.dot_dimension_numbers<[1], [0], [0], [1], [0, 0, 1, 1], [], []>} : vector<1024x9xbf16>, vector<9x128xbf16>, vector<1024x128xf32> -> vector<1024x128xf32>
    %c0_3 = arith.constant 0 : index
    %c0_4 = arith.constant 0 : index
    %3 = vector.load %arg3[%c0_3, %c0_4] : memref<1x128xf32, #tpu.memory_space<vmem>>, vector<1x128xf32>
    %4 = vector.broadcast %3 : vector<1x128xf32> to vector<1024x128xf32>
    %5 = arith.mulf %2, %4 : vector<1024x128xf32>
    %c0_5 = arith.constant 0 : index
    %c0_6 = arith.constant 0 : index
    %6 = vector.load %arg4[%c0_5, %c0_6] : memref<1x128xf32, #tpu.memory_space<vmem>>, vector<1x128xf32>
    %7 = vector.broadcast %6 : vector<1x128xf32> to vector<1024x128xf32>
    %8 = arith.addf %5, %7 : vector<1024x128xf32>
    %cst_7 = arith.constant 0.000000e+00 : f32
    %9 = vector.broadcast %cst_7 : f32 to vector<1024x128xf32>
    %10 = arith.maximumf %8, %9 : vector<1024x128xf32>
    %11 = arith.truncf %10 : vector<1024x128xf32> to vector<1024x128xbf16>
    %c0_8 = arith.constant 0 : index
    %c0_9 = arith.constant 0 : index
    %12 = vector.load %arg5[%c0_8, %c0_9] : memref<1024x128xbf16, #tpu.memory_space<vmem>>, vector<1024x128xbf16>
    tpu.vector_store %arg5[%c0_8, %c0_9], %11 {strides = array<i32>} : memref<1024x128xbf16, #tpu.memory_space<vmem>>, vector<1024x128xbf16>,
    return
  }
  func.func @transform_0(%arg0: i32) -> (i32, i32) {
    %c0_i32 = arith.constant 0 : i32
    %c0_i32_0 = arith.constant 0 : i32
    return %arg0, %c0_i32 : i32, i32
  }
  func.func @transform_1(%arg0: i32) -> (i32, i32) {
    %c0_i32 = arith.constant 0 : i32
    %c0_i32_0 = arith.constant 0 : i32
    %c0_i32_1 = arith.constant 0 : i32
    return %c0_i32, %c0_i32_0 : i32, i32
  }
  func.func @transform_2(%arg0: i32) -> (i32, i32) {
    %c0_i32 = arith.constant 0 : i32
    %c0_i32_0 = arith.constant 0 : i32
    %c0_i32_1 = arith.constant 0 : i32
    return %c0_i32, %c0_i32_0 : i32, i32
  }
  func.func @transform_3(%arg0: i32) -> (i32, i32) {
    %c0_i32 = arith.constant 0 : i32
    %c0_i32_0 = arith.constant 0 : i32
    %c0_i32_1 = arith.constant 0 : i32
    return %c0_i32, %c0_i32_0 : i32, i32
  }
  func.func @transform_4(%arg0: i32) -> (i32, i32) {
    %c0_i32 = arith.constant 0 : i32
    %c0_i32_0 = arith.constant 0 : i32
    return %arg0, %c0_i32 : i32, i32
  }
}

module attributes {stable_mosaic.version = 11 : i64} {
  func.func @_conv_kernel(%arg0: i32, %arg1: memref<1x18x34x128xbf16, #tpu.memory_space<vmem>>, %arg2: memref<9x128x128xbf16, #tpu.memory_space<vmem>>, %arg3: memref<1x128xf32, #tpu.memory_space<vmem>>, %arg4: memref<1x128xf32, #tpu.memory_space<vmem>>, %arg5: memref<1x16x32x128xbf16, #tpu.memory_space<vmem>>) attributes {dimension_semantics = [#tpu.dimension_semantics<parallel>], iteration_bounds = array<i64: 2>, scalar_prefetch = 0 : i64, scratch_operands = 0 : i64, tpu.core_type = #tpu.core_type<tc>, window_params = [{transform_indices = @transform_0, window_bounds = array<i64: 1, 18, 34, 128>}, {pipeline_mode = #tpu.pipeline_mode<synchronous>, transform_indices = @transform_1, window_bounds = array<i64: 9, 128, 128>}, {pipeline_mode = #tpu.pipeline_mode<synchronous>, transform_indices = @transform_2, window_bounds = array<i64: 1, 128>}, {pipeline_mode = #tpu.pipeline_mode<synchronous>, transform_indices = @transform_3, window_bounds = array<i64: 1, 128>}, {transform_indices = @transform_4, window_bounds = array<i64: 1, 16, 32, 128>}]} {
    %c0 = arith.constant 0 : index
    %c0_0 = arith.constant 0 : index
    %0 = vector.load %arg3[%c0, %c0_0] : memref<1x128xf32, #tpu.memory_space<vmem>>, vector<1x128xf32>
    %c0_1 = arith.constant 0 : index
    %c0_2 = arith.constant 0 : index
    %1 = vector.load %arg4[%c0_1, %c0_2] : memref<1x128xf32, #tpu.memory_space<vmem>>, vector<1x128xf32>
    %c0_i32 = arith.constant 0 : i32
    %c16_i32 = arith.constant 16 : i32
    %2 = arith.addi %c0_i32, %c16_i32 : i32
    %c1_i32 = arith.constant 1 : i32
    scf.for %arg6 = %c0_i32 to %2 step %c1_i32  : i32 {
      %cst = arith.constant 0.000000e+00 : f32
      %3 = vector.broadcast %cst : f32 to vector<32x128xf32>
      %c0_i32_4 = arith.constant 0 : i32
      %4 = arith.addi %arg6, %c0_i32_4 : i32
      %c0_5 = arith.constant 0 : index
      %5 = arith.index_cast %4 : i32 to index
      %c0_6 = arith.constant 0 : index
      %c0_7 = arith.constant 0 : index
      %6 = vector.load %arg1[%c0_5, %5, %c0_6, %c0_7] : memref<1x18x34x128xbf16, #tpu.memory_space<vmem>>, vector<1x1x32x128xbf16>
      %7 = vector.shape_cast %6 : vector<1x1x32x128xbf16> to vector<32x128xbf16>
      %c0_8 = arith.constant 0 : index
      %c0_9 = arith.constant 0 : index
      %c0_10 = arith.constant 0 : index
      %8 = vector.load %arg2[%c0_8, %c0_9, %c0_10] : memref<9x128x128xbf16, #tpu.memory_space<vmem>>, vector<1x128x128xbf16>
      %9 = vector.shape_cast %8 : vector<1x128x128xbf16> to vector<128x128xbf16>
      %cst_11 = arith.constant dense<0.000000e+00> : vector<32x128xf32>
      %10 = tpu.matmul %7, %9, %cst_11 {dimension_numbers = #tpu.dot_dimension_numbers<[1], [0], [0], [1], [0, 0, 1, 1], [], []>} : vector<32x128xbf16>, vector<128x128xbf16>, vector<32x128xf32> -> vector<32x128xf32>
      %11 = arith.addf %3, %10 : vector<32x128xf32>
      %c0_i32_12 = arith.constant 0 : i32
      %12 = arith.addi %arg6, %c0_i32_12 : i32
      %c0_13 = arith.constant 0 : index
      %13 = arith.index_cast %12 : i32 to index
      %c1 = arith.constant 1 : index
      %c0_14 = arith.constant 0 : index
      %14 = vector.load %arg1[%c0_13, %13, %c1, %c0_14] : memref<1x18x34x128xbf16, #tpu.memory_space<vmem>>, vector<1x1x32x128xbf16>
      %15 = vector.shape_cast %14 : vector<1x1x32x128xbf16> to vector<32x128xbf16>
      %c1_15 = arith.constant 1 : index
      %c0_16 = arith.constant 0 : index
      %c0_17 = arith.constant 0 : index
      %16 = vector.load %arg2[%c1_15, %c0_16, %c0_17] : memref<9x128x128xbf16, #tpu.memory_space<vmem>>, vector<1x128x128xbf16>
      %17 = vector.shape_cast %16 : vector<1x128x128xbf16> to vector<128x128xbf16>
      %cst_18 = arith.constant dense<0.000000e+00> : vector<32x128xf32>
      %18 = tpu.matmul %15, %17, %cst_18 {dimension_numbers = #tpu.dot_dimension_numbers<[1], [0], [0], [1], [0, 0, 1, 1], [], []>} : vector<32x128xbf16>, vector<128x128xbf16>, vector<32x128xf32> -> vector<32x128xf32>
      %19 = arith.addf %11, %18 : vector<32x128xf32>
      %c0_i32_19 = arith.constant 0 : i32
      %20 = arith.addi %arg6, %c0_i32_19 : i32
      %c0_20 = arith.constant 0 : index
      %21 = arith.index_cast %20 : i32 to index
      %c2 = arith.constant 2 : index
      %c0_21 = arith.constant 0 : index
      %22 = vector.load %arg1[%c0_20, %21, %c2, %c0_21] : memref<1x18x34x128xbf16, #tpu.memory_space<vmem>>, vector<1x1x32x128xbf16>
      %23 = vector.shape_cast %22 : vector<1x1x32x128xbf16> to vector<32x128xbf16>
      %c2_22 = arith.constant 2 : index
      %c0_23 = arith.constant 0 : index
      %c0_24 = arith.constant 0 : index
      %24 = vector.load %arg2[%c2_22, %c0_23, %c0_24] : memref<9x128x128xbf16, #tpu.memory_space<vmem>>, vector<1x128x128xbf16>
      %25 = vector.shape_cast %24 : vector<1x128x128xbf16> to vector<128x128xbf16>
      %cst_25 = arith.constant dense<0.000000e+00> : vector<32x128xf32>
      %26 = tpu.matmul %23, %25, %cst_25 {dimension_numbers = #tpu.dot_dimension_numbers<[1], [0], [0], [1], [0, 0, 1, 1], [], []>} : vector<32x128xbf16>, vector<128x128xbf16>, vector<32x128xf32> -> vector<32x128xf32>
      %27 = arith.addf %19, %26 : vector<32x128xf32>
      %c1_i32_26 = arith.constant 1 : i32
      %28 = arith.addi %arg6, %c1_i32_26 : i32
      %c0_27 = arith.constant 0 : index
      %29 = arith.index_cast %28 : i32 to index
      %c0_28 = arith.constant 0 : index
      %c0_29 = arith.constant 0 : index
      %30 = vector.load %arg1[%c0_27, %29, %c0_28, %c0_29] : memref<1x18x34x128xbf16, #tpu.memory_space<vmem>>, vector<1x1x32x128xbf16>
      %31 = vector.shape_cast %30 : vector<1x1x32x128xbf16> to vector<32x128xbf16>
      %c3 = arith.constant 3 : index
      %c0_30 = arith.constant 0 : index
      %c0_31 = arith.constant 0 : index
      %32 = vector.load %arg2[%c3, %c0_30, %c0_31] : memref<9x128x128xbf16, #tpu.memory_space<vmem>>, vector<1x128x128xbf16>
      %33 = vector.shape_cast %32 : vector<1x128x128xbf16> to vector<128x128xbf16>
      %cst_32 = arith.constant dense<0.000000e+00> : vector<32x128xf32>
      %34 = tpu.matmul %31, %33, %cst_32 {dimension_numbers = #tpu.dot_dimension_numbers<[1], [0], [0], [1], [0, 0, 1, 1], [], []>} : vector<32x128xbf16>, vector<128x128xbf16>, vector<32x128xf32> -> vector<32x128xf32>
      %35 = arith.addf %27, %34 : vector<32x128xf32>
      %c1_i32_33 = arith.constant 1 : i32
      %36 = arith.addi %arg6, %c1_i32_33 : i32
      %c0_34 = arith.constant 0 : index
      %37 = arith.index_cast %36 : i32 to index
      %c1_35 = arith.constant 1 : index
      %c0_36 = arith.constant 0 : index
      %38 = vector.load %arg1[%c0_34, %37, %c1_35, %c0_36] : memref<1x18x34x128xbf16, #tpu.memory_space<vmem>>, vector<1x1x32x128xbf16>
      %39 = vector.shape_cast %38 : vector<1x1x32x128xbf16> to vector<32x128xbf16>
      %c4 = arith.constant 4 : index
      %c0_37 = arith.constant 0 : index
      %c0_38 = arith.constant 0 : index
      %40 = vector.load %arg2[%c4, %c0_37, %c0_38] : memref<9x128x128xbf16, #tpu.memory_space<vmem>>, vector<1x128x128xbf16>
      %41 = vector.shape_cast %40 : vector<1x128x128xbf16> to vector<128x128xbf16>
      %cst_39 = arith.constant dense<0.000000e+00> : vector<32x128xf32>
      %42 = tpu.matmul %39, %41, %cst_39 {dimension_numbers = #tpu.dot_dimension_numbers<[1], [0], [0], [1], [0, 0, 1, 1], [], []>} : vector<32x128xbf16>, vector<128x128xbf16>, vector<32x128xf32> -> vector<32x128xf32>
      %43 = arith.addf %35, %42 : vector<32x128xf32>
      %c1_i32_40 = arith.constant 1 : i32
      %44 = arith.addi %arg6, %c1_i32_40 : i32
      %c0_41 = arith.constant 0 : index
      %45 = arith.index_cast %44 : i32 to index
      %c2_42 = arith.constant 2 : index
      %c0_43 = arith.constant 0 : index
      %46 = vector.load %arg1[%c0_41, %45, %c2_42, %c0_43] : memref<1x18x34x128xbf16, #tpu.memory_space<vmem>>, vector<1x1x32x128xbf16>
      %47 = vector.shape_cast %46 : vector<1x1x32x128xbf16> to vector<32x128xbf16>
      %c5 = arith.constant 5 : index
      %c0_44 = arith.constant 0 : index
      %c0_45 = arith.constant 0 : index
      %48 = vector.load %arg2[%c5, %c0_44, %c0_45] : memref<9x128x128xbf16, #tpu.memory_space<vmem>>, vector<1x128x128xbf16>
      %49 = vector.shape_cast %48 : vector<1x128x128xbf16> to vector<128x128xbf16>
      %cst_46 = arith.constant dense<0.000000e+00> : vector<32x128xf32>
      %50 = tpu.matmul %47, %49, %cst_46 {dimension_numbers = #tpu.dot_dimension_numbers<[1], [0], [0], [1], [0, 0, 1, 1], [], []>} : vector<32x128xbf16>, vector<128x128xbf16>, vector<32x128xf32> -> vector<32x128xf32>
      %51 = arith.addf %43, %50 : vector<32x128xf32>
      %c2_i32 = arith.constant 2 : i32
      %52 = arith.addi %arg6, %c2_i32 : i32
      %c0_47 = arith.constant 0 : index
      %53 = arith.index_cast %52 : i32 to index
      %c0_48 = arith.constant 0 : index
      %c0_49 = arith.constant 0 : index
      %54 = vector.load %arg1[%c0_47, %53, %c0_48, %c0_49] : memref<1x18x34x128xbf16, #tpu.memory_space<vmem>>, vector<1x1x32x128xbf16>
      %55 = vector.shape_cast %54 : vector<1x1x32x128xbf16> to vector<32x128xbf16>
      %c6 = arith.constant 6 : index
      %c0_50 = arith.constant 0 : index
      %c0_51 = arith.constant 0 : index
      %56 = vector.load %arg2[%c6, %c0_50, %c0_51] : memref<9x128x128xbf16, #tpu.memory_space<vmem>>, vector<1x128x128xbf16>
      %57 = vector.shape_cast %56 : vector<1x128x128xbf16> to vector<128x128xbf16>
      %cst_52 = arith.constant dense<0.000000e+00> : vector<32x128xf32>
      %58 = tpu.matmul %55, %57, %cst_52 {dimension_numbers = #tpu.dot_dimension_numbers<[1], [0], [0], [1], [0, 0, 1, 1], [], []>} : vector<32x128xbf16>, vector<128x128xbf16>, vector<32x128xf32> -> vector<32x128xf32>
      %59 = arith.addf %51, %58 : vector<32x128xf32>
      %c2_i32_53 = arith.constant 2 : i32
      %60 = arith.addi %arg6, %c2_i32_53 : i32
      %c0_54 = arith.constant 0 : index
      %61 = arith.index_cast %60 : i32 to index
      %c1_55 = arith.constant 1 : index
      %c0_56 = arith.constant 0 : index
      %62 = vector.load %arg1[%c0_54, %61, %c1_55, %c0_56] : memref<1x18x34x128xbf16, #tpu.memory_space<vmem>>, vector<1x1x32x128xbf16>
      %63 = vector.shape_cast %62 : vector<1x1x32x128xbf16> to vector<32x128xbf16>
      %c7 = arith.constant 7 : index
      %c0_57 = arith.constant 0 : index
      %c0_58 = arith.constant 0 : index
      %64 = vector.load %arg2[%c7, %c0_57, %c0_58] : memref<9x128x128xbf16, #tpu.memory_space<vmem>>, vector<1x128x128xbf16>
      %65 = vector.shape_cast %64 : vector<1x128x128xbf16> to vector<128x128xbf16>
      %cst_59 = arith.constant dense<0.000000e+00> : vector<32x128xf32>
      %66 = tpu.matmul %63, %65, %cst_59 {dimension_numbers = #tpu.dot_dimension_numbers<[1], [0], [0], [1], [0, 0, 1, 1], [], []>} : vector<32x128xbf16>, vector<128x128xbf16>, vector<32x128xf32> -> vector<32x128xf32>
      %67 = arith.addf %59, %66 : vector<32x128xf32>
      %c2_i32_60 = arith.constant 2 : i32
      %68 = arith.addi %arg6, %c2_i32_60 : i32
      %c0_61 = arith.constant 0 : index
      %69 = arith.index_cast %68 : i32 to index
      %c2_62 = arith.constant 2 : index
      %c0_63 = arith.constant 0 : index
      %70 = vector.load %arg1[%c0_61, %69, %c2_62, %c0_63] : memref<1x18x34x128xbf16, #tpu.memory_space<vmem>>, vector<1x1x32x128xbf16>
      %71 = vector.shape_cast %70 : vector<1x1x32x128xbf16> to vector<32x128xbf16>
      %c8 = arith.constant 8 : index
      %c0_64 = arith.constant 0 : index
      %c0_65 = arith.constant 0 : index
      %72 = vector.load %arg2[%c8, %c0_64, %c0_65] : memref<9x128x128xbf16, #tpu.memory_space<vmem>>, vector<1x128x128xbf16>
      %73 = vector.shape_cast %72 : vector<1x128x128xbf16> to vector<128x128xbf16>
      %cst_66 = arith.constant dense<0.000000e+00> : vector<32x128xf32>
      %74 = tpu.matmul %71, %73, %cst_66 {dimension_numbers = #tpu.dot_dimension_numbers<[1], [0], [0], [1], [0, 0, 1, 1], [], []>} : vector<32x128xbf16>, vector<128x128xbf16>, vector<32x128xf32> -> vector<32x128xf32>
      %75 = arith.addf %67, %74 : vector<32x128xf32>
      %76 = vector.broadcast %0 : vector<1x128xf32> to vector<32x128xf32>
      %77 = arith.mulf %75, %76 : vector<32x128xf32>
      %78 = vector.broadcast %1 : vector<1x128xf32> to vector<32x128xf32>
      %79 = arith.addf %77, %78 : vector<32x128xf32>
      %cst_67 = arith.constant 0.000000e+00 : f32
      %80 = vector.broadcast %cst_67 : f32 to vector<32x128xf32>
      %81 = arith.maximumf %79, %80 : vector<32x128xf32>
      %82 = arith.truncf %81 : vector<32x128xf32> to vector<32x128xbf16>
      %c0_68 = arith.constant 0 : index
      %83 = arith.index_cast %arg6 : i32 to index
      %c0_69 = arith.constant 0 : index
      %c0_70 = arith.constant 0 : index
      %84 = vector.load %arg5[%c0_68, %83, %c0_69, %c0_70] : memref<1x16x32x128xbf16, #tpu.memory_space<vmem>>, vector<1x1x32x128xbf16>
      %85 = vector.shape_cast %84 : vector<1x1x32x128xbf16> to vector<32x128xbf16>
      %86 = vector.shape_cast %82 : vector<32x128xbf16> to vector<1x1x32x128xbf16>
      tpu.vector_store %arg5[%c0_68, %83, %c0_69, %c0_70], %86 {strides = array<i32>} : memref<1x16x32x128xbf16, #tpu.memory_space<vmem>>, vector<1x1x32x128xbf16>,
    }
    %c16_i32_3 = arith.constant 16 : i32
    return
  }
  func.func @transform_0(%arg0: i32) -> (i32, i32, i32, i32) {
    %c0_i32 = arith.constant 0 : i32
    %c0_i32_0 = arith.constant 0 : i32
    %c0_i32_1 = arith.constant 0 : i32
    %c0_i32_2 = arith.constant 0 : i32
    return %arg0, %c0_i32, %c0_i32_0, %c0_i32_1 : i32, i32, i32, i32
  }
  func.func @transform_1(%arg0: i32) -> (i32, i32, i32) {
    %c0_i32 = arith.constant 0 : i32
    %c0_i32_0 = arith.constant 0 : i32
    %c0_i32_1 = arith.constant 0 : i32
    %c0_i32_2 = arith.constant 0 : i32
    return %c0_i32, %c0_i32_0, %c0_i32_1 : i32, i32, i32
  }
  func.func @transform_2(%arg0: i32) -> (i32, i32) {
    %c0_i32 = arith.constant 0 : i32
    %c0_i32_0 = arith.constant 0 : i32
    %c0_i32_1 = arith.constant 0 : i32
    return %c0_i32, %c0_i32_0 : i32, i32
  }
  func.func @transform_3(%arg0: i32) -> (i32, i32) {
    %c0_i32 = arith.constant 0 : i32
    %c0_i32_0 = arith.constant 0 : i32
    %c0_i32_1 = arith.constant 0 : i32
    return %c0_i32, %c0_i32_0 : i32, i32
  }
  func.func @transform_4(%arg0: i32) -> (i32, i32, i32, i32) {
    %c0_i32 = arith.constant 0 : i32
    %c0_i32_0 = arith.constant 0 : i32
    %c0_i32_1 = arith.constant 0 : i32
    %c0_i32_2 = arith.constant 0 : i32
    return %arg0, %c0_i32, %c0_i32_0, %c0_i32_1 : i32, i32, i32, i32
  }
}

module attributes {stable_mosaic.version = 11 : i64} {
  func.func @_conv_kernel(%arg0: i32, %arg1: memref<1x10x18x128xbf16, #tpu.memory_space<vmem>>, %arg2: memref<9x128x128xbf16, #tpu.memory_space<vmem>>, %arg3: memref<1x128xf32, #tpu.memory_space<vmem>>, %arg4: memref<1x128xf32, #tpu.memory_space<vmem>>, %arg5: memref<1x8x16x128xbf16, #tpu.memory_space<vmem>>) attributes {dimension_semantics = [#tpu.dimension_semantics<parallel>], iteration_bounds = array<i64: 2>, scalar_prefetch = 0 : i64, scratch_operands = 0 : i64, tpu.core_type = #tpu.core_type<tc>, window_params = [{transform_indices = @transform_0, window_bounds = array<i64: 1, 10, 18, 128>}, {pipeline_mode = #tpu.pipeline_mode<synchronous>, transform_indices = @transform_1, window_bounds = array<i64: 9, 128, 128>}, {pipeline_mode = #tpu.pipeline_mode<synchronous>, transform_indices = @transform_2, window_bounds = array<i64: 1, 128>}, {pipeline_mode = #tpu.pipeline_mode<synchronous>, transform_indices = @transform_3, window_bounds = array<i64: 1, 128>}, {transform_indices = @transform_4, window_bounds = array<i64: 1, 8, 16, 128>}]} {
    %c0 = arith.constant 0 : index
    %c0_0 = arith.constant 0 : index
    %0 = vector.load %arg3[%c0, %c0_0] : memref<1x128xf32, #tpu.memory_space<vmem>>, vector<1x128xf32>
    %c0_1 = arith.constant 0 : index
    %c0_2 = arith.constant 0 : index
    %1 = vector.load %arg4[%c0_1, %c0_2] : memref<1x128xf32, #tpu.memory_space<vmem>>, vector<1x128xf32>
    %c0_i32 = arith.constant 0 : i32
    %c8_i32 = arith.constant 8 : i32
    %2 = arith.addi %c0_i32, %c8_i32 : i32
    %c1_i32 = arith.constant 1 : i32
    scf.for %arg6 = %c0_i32 to %2 step %c1_i32  : i32 {
      %cst = arith.constant 0.000000e+00 : f32
      %3 = vector.broadcast %cst : f32 to vector<16x128xf32>
      %c0_i32_4 = arith.constant 0 : i32
      %4 = arith.addi %arg6, %c0_i32_4 : i32
      %c0_5 = arith.constant 0 : index
      %5 = arith.index_cast %4 : i32 to index
      %c0_6 = arith.constant 0 : index
      %c0_7 = arith.constant 0 : index
      %6 = vector.load %arg1[%c0_5, %5, %c0_6, %c0_7] : memref<1x10x18x128xbf16, #tpu.memory_space<vmem>>, vector<1x1x16x128xbf16>
      %7 = vector.shape_cast %6 : vector<1x1x16x128xbf16> to vector<16x128xbf16>
      %c0_8 = arith.constant 0 : index
      %c0_9 = arith.constant 0 : index
      %c0_10 = arith.constant 0 : index
      %8 = vector.load %arg2[%c0_8, %c0_9, %c0_10] : memref<9x128x128xbf16, #tpu.memory_space<vmem>>, vector<1x128x128xbf16>
      %9 = vector.shape_cast %8 : vector<1x128x128xbf16> to vector<128x128xbf16>
      %cst_11 = arith.constant dense<0.000000e+00> : vector<16x128xf32>
      %10 = tpu.matmul %7, %9, %cst_11 {dimension_numbers = #tpu.dot_dimension_numbers<[1], [0], [0], [1], [0, 0, 1, 1], [], []>} : vector<16x128xbf16>, vector<128x128xbf16>, vector<16x128xf32> -> vector<16x128xf32>
      %11 = arith.addf %3, %10 : vector<16x128xf32>
      %c0_i32_12 = arith.constant 0 : i32
      %12 = arith.addi %arg6, %c0_i32_12 : i32
      %c0_13 = arith.constant 0 : index
      %13 = arith.index_cast %12 : i32 to index
      %c1 = arith.constant 1 : index
      %c0_14 = arith.constant 0 : index
      %14 = vector.load %arg1[%c0_13, %13, %c1, %c0_14] : memref<1x10x18x128xbf16, #tpu.memory_space<vmem>>, vector<1x1x16x128xbf16>
      %15 = vector.shape_cast %14 : vector<1x1x16x128xbf16> to vector<16x128xbf16>
      %c1_15 = arith.constant 1 : index
      %c0_16 = arith.constant 0 : index
      %c0_17 = arith.constant 0 : index
      %16 = vector.load %arg2[%c1_15, %c0_16, %c0_17] : memref<9x128x128xbf16, #tpu.memory_space<vmem>>, vector<1x128x128xbf16>
      %17 = vector.shape_cast %16 : vector<1x128x128xbf16> to vector<128x128xbf16>
      %cst_18 = arith.constant dense<0.000000e+00> : vector<16x128xf32>
      %18 = tpu.matmul %15, %17, %cst_18 {dimension_numbers = #tpu.dot_dimension_numbers<[1], [0], [0], [1], [0, 0, 1, 1], [], []>} : vector<16x128xbf16>, vector<128x128xbf16>, vector<16x128xf32> -> vector<16x128xf32>
      %19 = arith.addf %11, %18 : vector<16x128xf32>
      %c0_i32_19 = arith.constant 0 : i32
      %20 = arith.addi %arg6, %c0_i32_19 : i32
      %c0_20 = arith.constant 0 : index
      %21 = arith.index_cast %20 : i32 to index
      %c2 = arith.constant 2 : index
      %c0_21 = arith.constant 0 : index
      %22 = vector.load %arg1[%c0_20, %21, %c2, %c0_21] : memref<1x10x18x128xbf16, #tpu.memory_space<vmem>>, vector<1x1x16x128xbf16>
      %23 = vector.shape_cast %22 : vector<1x1x16x128xbf16> to vector<16x128xbf16>
      %c2_22 = arith.constant 2 : index
      %c0_23 = arith.constant 0 : index
      %c0_24 = arith.constant 0 : index
      %24 = vector.load %arg2[%c2_22, %c0_23, %c0_24] : memref<9x128x128xbf16, #tpu.memory_space<vmem>>, vector<1x128x128xbf16>
      %25 = vector.shape_cast %24 : vector<1x128x128xbf16> to vector<128x128xbf16>
      %cst_25 = arith.constant dense<0.000000e+00> : vector<16x128xf32>
      %26 = tpu.matmul %23, %25, %cst_25 {dimension_numbers = #tpu.dot_dimension_numbers<[1], [0], [0], [1], [0, 0, 1, 1], [], []>} : vector<16x128xbf16>, vector<128x128xbf16>, vector<16x128xf32> -> vector<16x128xf32>
      %27 = arith.addf %19, %26 : vector<16x128xf32>
      %c1_i32_26 = arith.constant 1 : i32
      %28 = arith.addi %arg6, %c1_i32_26 : i32
      %c0_27 = arith.constant 0 : index
      %29 = arith.index_cast %28 : i32 to index
      %c0_28 = arith.constant 0 : index
      %c0_29 = arith.constant 0 : index
      %30 = vector.load %arg1[%c0_27, %29, %c0_28, %c0_29] : memref<1x10x18x128xbf16, #tpu.memory_space<vmem>>, vector<1x1x16x128xbf16>
      %31 = vector.shape_cast %30 : vector<1x1x16x128xbf16> to vector<16x128xbf16>
      %c3 = arith.constant 3 : index
      %c0_30 = arith.constant 0 : index
      %c0_31 = arith.constant 0 : index
      %32 = vector.load %arg2[%c3, %c0_30, %c0_31] : memref<9x128x128xbf16, #tpu.memory_space<vmem>>, vector<1x128x128xbf16>
      %33 = vector.shape_cast %32 : vector<1x128x128xbf16> to vector<128x128xbf16>
      %cst_32 = arith.constant dense<0.000000e+00> : vector<16x128xf32>
      %34 = tpu.matmul %31, %33, %cst_32 {dimension_numbers = #tpu.dot_dimension_numbers<[1], [0], [0], [1], [0, 0, 1, 1], [], []>} : vector<16x128xbf16>, vector<128x128xbf16>, vector<16x128xf32> -> vector<16x128xf32>
      %35 = arith.addf %27, %34 : vector<16x128xf32>
      %c1_i32_33 = arith.constant 1 : i32
      %36 = arith.addi %arg6, %c1_i32_33 : i32
      %c0_34 = arith.constant 0 : index
      %37 = arith.index_cast %36 : i32 to index
      %c1_35 = arith.constant 1 : index
      %c0_36 = arith.constant 0 : index
      %38 = vector.load %arg1[%c0_34, %37, %c1_35, %c0_36] : memref<1x10x18x128xbf16, #tpu.memory_space<vmem>>, vector<1x1x16x128xbf16>
      %39 = vector.shape_cast %38 : vector<1x1x16x128xbf16> to vector<16x128xbf16>
      %c4 = arith.constant 4 : index
      %c0_37 = arith.constant 0 : index
      %c0_38 = arith.constant 0 : index
      %40 = vector.load %arg2[%c4, %c0_37, %c0_38] : memref<9x128x128xbf16, #tpu.memory_space<vmem>>, vector<1x128x128xbf16>
      %41 = vector.shape_cast %40 : vector<1x128x128xbf16> to vector<128x128xbf16>
      %cst_39 = arith.constant dense<0.000000e+00> : vector<16x128xf32>
      %42 = tpu.matmul %39, %41, %cst_39 {dimension_numbers = #tpu.dot_dimension_numbers<[1], [0], [0], [1], [0, 0, 1, 1], [], []>} : vector<16x128xbf16>, vector<128x128xbf16>, vector<16x128xf32> -> vector<16x128xf32>
      %43 = arith.addf %35, %42 : vector<16x128xf32>
      %c1_i32_40 = arith.constant 1 : i32
      %44 = arith.addi %arg6, %c1_i32_40 : i32
      %c0_41 = arith.constant 0 : index
      %45 = arith.index_cast %44 : i32 to index
      %c2_42 = arith.constant 2 : index
      %c0_43 = arith.constant 0 : index
      %46 = vector.load %arg1[%c0_41, %45, %c2_42, %c0_43] : memref<1x10x18x128xbf16, #tpu.memory_space<vmem>>, vector<1x1x16x128xbf16>
      %47 = vector.shape_cast %46 : vector<1x1x16x128xbf16> to vector<16x128xbf16>
      %c5 = arith.constant 5 : index
      %c0_44 = arith.constant 0 : index
      %c0_45 = arith.constant 0 : index
      %48 = vector.load %arg2[%c5, %c0_44, %c0_45] : memref<9x128x128xbf16, #tpu.memory_space<vmem>>, vector<1x128x128xbf16>
      %49 = vector.shape_cast %48 : vector<1x128x128xbf16> to vector<128x128xbf16>
      %cst_46 = arith.constant dense<0.000000e+00> : vector<16x128xf32>
      %50 = tpu.matmul %47, %49, %cst_46 {dimension_numbers = #tpu.dot_dimension_numbers<[1], [0], [0], [1], [0, 0, 1, 1], [], []>} : vector<16x128xbf16>, vector<128x128xbf16>, vector<16x128xf32> -> vector<16x128xf32>
      %51 = arith.addf %43, %50 : vector<16x128xf32>
      %c2_i32 = arith.constant 2 : i32
      %52 = arith.addi %arg6, %c2_i32 : i32
      %c0_47 = arith.constant 0 : index
      %53 = arith.index_cast %52 : i32 to index
      %c0_48 = arith.constant 0 : index
      %c0_49 = arith.constant 0 : index
      %54 = vector.load %arg1[%c0_47, %53, %c0_48, %c0_49] : memref<1x10x18x128xbf16, #tpu.memory_space<vmem>>, vector<1x1x16x128xbf16>
      %55 = vector.shape_cast %54 : vector<1x1x16x128xbf16> to vector<16x128xbf16>
      %c6 = arith.constant 6 : index
      %c0_50 = arith.constant 0 : index
      %c0_51 = arith.constant 0 : index
      %56 = vector.load %arg2[%c6, %c0_50, %c0_51] : memref<9x128x128xbf16, #tpu.memory_space<vmem>>, vector<1x128x128xbf16>
      %57 = vector.shape_cast %56 : vector<1x128x128xbf16> to vector<128x128xbf16>
      %cst_52 = arith.constant dense<0.000000e+00> : vector<16x128xf32>
      %58 = tpu.matmul %55, %57, %cst_52 {dimension_numbers = #tpu.dot_dimension_numbers<[1], [0], [0], [1], [0, 0, 1, 1], [], []>} : vector<16x128xbf16>, vector<128x128xbf16>, vector<16x128xf32> -> vector<16x128xf32>
      %59 = arith.addf %51, %58 : vector<16x128xf32>
      %c2_i32_53 = arith.constant 2 : i32
      %60 = arith.addi %arg6, %c2_i32_53 : i32
      %c0_54 = arith.constant 0 : index
      %61 = arith.index_cast %60 : i32 to index
      %c1_55 = arith.constant 1 : index
      %c0_56 = arith.constant 0 : index
      %62 = vector.load %arg1[%c0_54, %61, %c1_55, %c0_56] : memref<1x10x18x128xbf16, #tpu.memory_space<vmem>>, vector<1x1x16x128xbf16>
      %63 = vector.shape_cast %62 : vector<1x1x16x128xbf16> to vector<16x128xbf16>
      %c7 = arith.constant 7 : index
      %c0_57 = arith.constant 0 : index
      %c0_58 = arith.constant 0 : index
      %64 = vector.load %arg2[%c7, %c0_57, %c0_58] : memref<9x128x128xbf16, #tpu.memory_space<vmem>>, vector<1x128x128xbf16>
      %65 = vector.shape_cast %64 : vector<1x128x128xbf16> to vector<128x128xbf16>
      %cst_59 = arith.constant dense<0.000000e+00> : vector<16x128xf32>
      %66 = tpu.matmul %63, %65, %cst_59 {dimension_numbers = #tpu.dot_dimension_numbers<[1], [0], [0], [1], [0, 0, 1, 1], [], []>} : vector<16x128xbf16>, vector<128x128xbf16>, vector<16x128xf32> -> vector<16x128xf32>
      %67 = arith.addf %59, %66 : vector<16x128xf32>
      %c2_i32_60 = arith.constant 2 : i32
      %68 = arith.addi %arg6, %c2_i32_60 : i32
      %c0_61 = arith.constant 0 : index
      %69 = arith.index_cast %68 : i32 to index
      %c2_62 = arith.constant 2 : index
      %c0_63 = arith.constant 0 : index
      %70 = vector.load %arg1[%c0_61, %69, %c2_62, %c0_63] : memref<1x10x18x128xbf16, #tpu.memory_space<vmem>>, vector<1x1x16x128xbf16>
      %71 = vector.shape_cast %70 : vector<1x1x16x128xbf16> to vector<16x128xbf16>
      %c8 = arith.constant 8 : index
      %c0_64 = arith.constant 0 : index
      %c0_65 = arith.constant 0 : index
      %72 = vector.load %arg2[%c8, %c0_64, %c0_65] : memref<9x128x128xbf16, #tpu.memory_space<vmem>>, vector<1x128x128xbf16>
      %73 = vector.shape_cast %72 : vector<1x128x128xbf16> to vector<128x128xbf16>
      %cst_66 = arith.constant dense<0.000000e+00> : vector<16x128xf32>
      %74 = tpu.matmul %71, %73, %cst_66 {dimension_numbers = #tpu.dot_dimension_numbers<[1], [0], [0], [1], [0, 0, 1, 1], [], []>} : vector<16x128xbf16>, vector<128x128xbf16>, vector<16x128xf32> -> vector<16x128xf32>
      %75 = arith.addf %67, %74 : vector<16x128xf32>
      %76 = vector.broadcast %0 : vector<1x128xf32> to vector<16x128xf32>
      %77 = arith.mulf %75, %76 : vector<16x128xf32>
      %78 = vector.broadcast %1 : vector<1x128xf32> to vector<16x128xf32>
      %79 = arith.addf %77, %78 : vector<16x128xf32>
      %cst_67 = arith.constant 0.000000e+00 : f32
      %80 = vector.broadcast %cst_67 : f32 to vector<16x128xf32>
      %81 = arith.maximumf %79, %80 : vector<16x128xf32>
      %82 = arith.truncf %81 : vector<16x128xf32> to vector<16x128xbf16>
      %c0_68 = arith.constant 0 : index
      %83 = arith.index_cast %arg6 : i32 to index
      %c0_69 = arith.constant 0 : index
      %c0_70 = arith.constant 0 : index
      %84 = vector.load %arg5[%c0_68, %83, %c0_69, %c0_70] : memref<1x8x16x128xbf16, #tpu.memory_space<vmem>>, vector<1x1x16x128xbf16>
      %85 = vector.shape_cast %84 : vector<1x1x16x128xbf16> to vector<16x128xbf16>
      %86 = vector.shape_cast %82 : vector<16x128xbf16> to vector<1x1x16x128xbf16>
      tpu.vector_store %arg5[%c0_68, %83, %c0_69, %c0_70], %86 {strides = array<i32>} : memref<1x8x16x128xbf16, #tpu.memory_space<vmem>>, vector<1x1x16x128xbf16>,
    }
    %c8_i32_3 = arith.constant 8 : i32
    return
  }
  func.func @transform_0(%arg0: i32) -> (i32, i32, i32, i32) {
    %c0_i32 = arith.constant 0 : i32
    %c0_i32_0 = arith.constant 0 : i32
    %c0_i32_1 = arith.constant 0 : i32
    %c0_i32_2 = arith.constant 0 : i32
    return %arg0, %c0_i32, %c0_i32_0, %c0_i32_1 : i32, i32, i32, i32
  }
  func.func @transform_1(%arg0: i32) -> (i32, i32, i32) {
    %c0_i32 = arith.constant 0 : i32
    %c0_i32_0 = arith.constant 0 : i32
    %c0_i32_1 = arith.constant 0 : i32
    %c0_i32_2 = arith.constant 0 : i32
    return %c0_i32, %c0_i32_0, %c0_i32_1 : i32, i32, i32
  }
  func.func @transform_2(%arg0: i32) -> (i32, i32) {
    %c0_i32 = arith.constant 0 : i32
    %c0_i32_0 = arith.constant 0 : i32
    %c0_i32_1 = arith.constant 0 : i32
    return %c0_i32, %c0_i32_0 : i32, i32
  }
  func.func @transform_3(%arg0: i32) -> (i32, i32) {
    %c0_i32 = arith.constant 0 : i32
    %c0_i32_0 = arith.constant 0 : i32
    %c0_i32_1 = arith.constant 0 : i32
    return %c0_i32, %c0_i32_0 : i32, i32
  }
  func.func @transform_4(%arg0: i32) -> (i32, i32, i32, i32) {
    %c0_i32 = arith.constant 0 : i32
    %c0_i32_0 = arith.constant 0 : i32
    %c0_i32_1 = arith.constant 0 : i32
    %c0_i32_2 = arith.constant 0 : i32
    return %arg0, %c0_i32, %c0_i32_0, %c0_i32_1 : i32, i32, i32, i32
  }
}

module attributes {stable_mosaic.version = 11 : i64} {
  func.func @_conv_kernel(%arg0: i32, %arg1: memref<1x6x10x128xbf16, #tpu.memory_space<vmem>>, %arg2: memref<9x128x128xbf16, #tpu.memory_space<vmem>>, %arg3: memref<1x128xf32, #tpu.memory_space<vmem>>, %arg4: memref<1x128xf32, #tpu.memory_space<vmem>>, %arg5: memref<1x4x8x128xbf16, #tpu.memory_space<vmem>>) attributes {dimension_semantics = [#tpu.dimension_semantics<parallel>], iteration_bounds = array<i64: 2>, scalar_prefetch = 0 : i64, scratch_operands = 0 : i64, tpu.core_type = #tpu.core_type<tc>, window_params = [{transform_indices = @transform_0, window_bounds = array<i64: 1, 6, 10, 128>}, {pipeline_mode = #tpu.pipeline_mode<synchronous>, transform_indices = @transform_1, window_bounds = array<i64: 9, 128, 128>}, {pipeline_mode = #tpu.pipeline_mode<synchronous>, transform_indices = @transform_2, window_bounds = array<i64: 1, 128>}, {pipeline_mode = #tpu.pipeline_mode<synchronous>, transform_indices = @transform_3, window_bounds = array<i64: 1, 128>}, {transform_indices = @transform_4, window_bounds = array<i64: 1, 4, 8, 128>}]} {
    %c0 = arith.constant 0 : index
    %c0_0 = arith.constant 0 : index
    %0 = vector.load %arg3[%c0, %c0_0] : memref<1x128xf32, #tpu.memory_space<vmem>>, vector<1x128xf32>
    %c0_1 = arith.constant 0 : index
    %c0_2 = arith.constant 0 : index
    %1 = vector.load %arg4[%c0_1, %c0_2] : memref<1x128xf32, #tpu.memory_space<vmem>>, vector<1x128xf32>
    %c0_i32 = arith.constant 0 : i32
    %c4_i32 = arith.constant 4 : i32
    %2 = arith.addi %c0_i32, %c4_i32 : i32
    %c1_i32 = arith.constant 1 : i32
    scf.for %arg6 = %c0_i32 to %2 step %c1_i32  : i32 {
      %cst = arith.constant 0.000000e+00 : f32
      %3 = vector.broadcast %cst : f32 to vector<8x128xf32>
      %c0_i32_4 = arith.constant 0 : i32
      %4 = arith.addi %arg6, %c0_i32_4 : i32
      %c0_5 = arith.constant 0 : index
      %5 = arith.index_cast %4 : i32 to index
      %c0_6 = arith.constant 0 : index
      %c0_7 = arith.constant 0 : index
      %6 = vector.load %arg1[%c0_5, %5, %c0_6, %c0_7] : memref<1x6x10x128xbf16, #tpu.memory_space<vmem>>, vector<1x1x8x128xbf16>
      %7 = vector.shape_cast %6 : vector<1x1x8x128xbf16> to vector<8x128xbf16>
      %c0_8 = arith.constant 0 : index
      %c0_9 = arith.constant 0 : index
      %c0_10 = arith.constant 0 : index
      %8 = vector.load %arg2[%c0_8, %c0_9, %c0_10] : memref<9x128x128xbf16, #tpu.memory_space<vmem>>, vector<1x128x128xbf16>
      %9 = vector.shape_cast %8 : vector<1x128x128xbf16> to vector<128x128xbf16>
      %cst_11 = arith.constant dense<0.000000e+00> : vector<8x128xf32>
      %10 = tpu.matmul %7, %9, %cst_11 {dimension_numbers = #tpu.dot_dimension_numbers<[1], [0], [0], [1], [0, 0, 1, 1], [], []>} : vector<8x128xbf16>, vector<128x128xbf16>, vector<8x128xf32> -> vector<8x128xf32>
      %11 = arith.addf %3, %10 : vector<8x128xf32>
      %c0_i32_12 = arith.constant 0 : i32
      %12 = arith.addi %arg6, %c0_i32_12 : i32
      %c0_13 = arith.constant 0 : index
      %13 = arith.index_cast %12 : i32 to index
      %c1 = arith.constant 1 : index
      %c0_14 = arith.constant 0 : index
      %14 = vector.load %arg1[%c0_13, %13, %c1, %c0_14] : memref<1x6x10x128xbf16, #tpu.memory_space<vmem>>, vector<1x1x8x128xbf16>
      %15 = vector.shape_cast %14 : vector<1x1x8x128xbf16> to vector<8x128xbf16>
      %c1_15 = arith.constant 1 : index
      %c0_16 = arith.constant 0 : index
      %c0_17 = arith.constant 0 : index
      %16 = vector.load %arg2[%c1_15, %c0_16, %c0_17] : memref<9x128x128xbf16, #tpu.memory_space<vmem>>, vector<1x128x128xbf16>
      %17 = vector.shape_cast %16 : vector<1x128x128xbf16> to vector<128x128xbf16>
      %cst_18 = arith.constant dense<0.000000e+00> : vector<8x128xf32>
      %18 = tpu.matmul %15, %17, %cst_18 {dimension_numbers = #tpu.dot_dimension_numbers<[1], [0], [0], [1], [0, 0, 1, 1], [], []>} : vector<8x128xbf16>, vector<128x128xbf16>, vector<8x128xf32> -> vector<8x128xf32>
      %19 = arith.addf %11, %18 : vector<8x128xf32>
      %c0_i32_19 = arith.constant 0 : i32
      %20 = arith.addi %arg6, %c0_i32_19 : i32
      %c0_20 = arith.constant 0 : index
      %21 = arith.index_cast %20 : i32 to index
      %c2 = arith.constant 2 : index
      %c0_21 = arith.constant 0 : index
      %22 = vector.load %arg1[%c0_20, %21, %c2, %c0_21] : memref<1x6x10x128xbf16, #tpu.memory_space<vmem>>, vector<1x1x8x128xbf16>
      %23 = vector.shape_cast %22 : vector<1x1x8x128xbf16> to vector<8x128xbf16>
      %c2_22 = arith.constant 2 : index
      %c0_23 = arith.constant 0 : index
      %c0_24 = arith.constant 0 : index
      %24 = vector.load %arg2[%c2_22, %c0_23, %c0_24] : memref<9x128x128xbf16, #tpu.memory_space<vmem>>, vector<1x128x128xbf16>
      %25 = vector.shape_cast %24 : vector<1x128x128xbf16> to vector<128x128xbf16>
      %cst_25 = arith.constant dense<0.000000e+00> : vector<8x128xf32>
      %26 = tpu.matmul %23, %25, %cst_25 {dimension_numbers = #tpu.dot_dimension_numbers<[1], [0], [0], [1], [0, 0, 1, 1], [], []>} : vector<8x128xbf16>, vector<128x128xbf16>, vector<8x128xf32> -> vector<8x128xf32>
      %27 = arith.addf %19, %26 : vector<8x128xf32>
      %c1_i32_26 = arith.constant 1 : i32
      %28 = arith.addi %arg6, %c1_i32_26 : i32
      %c0_27 = arith.constant 0 : index
      %29 = arith.index_cast %28 : i32 to index
      %c0_28 = arith.constant 0 : index
      %c0_29 = arith.constant 0 : index
      %30 = vector.load %arg1[%c0_27, %29, %c0_28, %c0_29] : memref<1x6x10x128xbf16, #tpu.memory_space<vmem>>, vector<1x1x8x128xbf16>
      %31 = vector.shape_cast %30 : vector<1x1x8x128xbf16> to vector<8x128xbf16>
      %c3 = arith.constant 3 : index
      %c0_30 = arith.constant 0 : index
      %c0_31 = arith.constant 0 : index
      %32 = vector.load %arg2[%c3, %c0_30, %c0_31] : memref<9x128x128xbf16, #tpu.memory_space<vmem>>, vector<1x128x128xbf16>
      %33 = vector.shape_cast %32 : vector<1x128x128xbf16> to vector<128x128xbf16>
      %cst_32 = arith.constant dense<0.000000e+00> : vector<8x128xf32>
      %34 = tpu.matmul %31, %33, %cst_32 {dimension_numbers = #tpu.dot_dimension_numbers<[1], [0], [0], [1], [0, 0, 1, 1], [], []>} : vector<8x128xbf16>, vector<128x128xbf16>, vector<8x128xf32> -> vector<8x128xf32>
      %35 = arith.addf %27, %34 : vector<8x128xf32>
      %c1_i32_33 = arith.constant 1 : i32
      %36 = arith.addi %arg6, %c1_i32_33 : i32
      %c0_34 = arith.constant 0 : index
      %37 = arith.index_cast %36 : i32 to index
      %c1_35 = arith.constant 1 : index
      %c0_36 = arith.constant 0 : index
      %38 = vector.load %arg1[%c0_34, %37, %c1_35, %c0_36] : memref<1x6x10x128xbf16, #tpu.memory_space<vmem>>, vector<1x1x8x128xbf16>
      %39 = vector.shape_cast %38 : vector<1x1x8x128xbf16> to vector<8x128xbf16>
      %c4 = arith.constant 4 : index
      %c0_37 = arith.constant 0 : index
      %c0_38 = arith.constant 0 : index
      %40 = vector.load %arg2[%c4, %c0_37, %c0_38] : memref<9x128x128xbf16, #tpu.memory_space<vmem>>, vector<1x128x128xbf16>
      %41 = vector.shape_cast %40 : vector<1x128x128xbf16> to vector<128x128xbf16>
      %cst_39 = arith.constant dense<0.000000e+00> : vector<8x128xf32>
      %42 = tpu.matmul %39, %41, %cst_39 {dimension_numbers = #tpu.dot_dimension_numbers<[1], [0], [0], [1], [0, 0, 1, 1], [], []>} : vector<8x128xbf16>, vector<128x128xbf16>, vector<8x128xf32> -> vector<8x128xf32>
      %43 = arith.addf %35, %42 : vector<8x128xf32>
      %c1_i32_40 = arith.constant 1 : i32
      %44 = arith.addi %arg6, %c1_i32_40 : i32
      %c0_41 = arith.constant 0 : index
      %45 = arith.index_cast %44 : i32 to index
      %c2_42 = arith.constant 2 : index
      %c0_43 = arith.constant 0 : index
      %46 = vector.load %arg1[%c0_41, %45, %c2_42, %c0_43] : memref<1x6x10x128xbf16, #tpu.memory_space<vmem>>, vector<1x1x8x128xbf16>
      %47 = vector.shape_cast %46 : vector<1x1x8x128xbf16> to vector<8x128xbf16>
      %c5 = arith.constant 5 : index
      %c0_44 = arith.constant 0 : index
      %c0_45 = arith.constant 0 : index
      %48 = vector.load %arg2[%c5, %c0_44, %c0_45] : memref<9x128x128xbf16, #tpu.memory_space<vmem>>, vector<1x128x128xbf16>
      %49 = vector.shape_cast %48 : vector<1x128x128xbf16> to vector<128x128xbf16>
      %cst_46 = arith.constant dense<0.000000e+00> : vector<8x128xf32>
      %50 = tpu.matmul %47, %49, %cst_46 {dimension_numbers = #tpu.dot_dimension_numbers<[1], [0], [0], [1], [0, 0, 1, 1], [], []>} : vector<8x128xbf16>, vector<128x128xbf16>, vector<8x128xf32> -> vector<8x128xf32>
      %51 = arith.addf %43, %50 : vector<8x128xf32>
      %c2_i32 = arith.constant 2 : i32
      %52 = arith.addi %arg6, %c2_i32 : i32
      %c0_47 = arith.constant 0 : index
      %53 = arith.index_cast %52 : i32 to index
      %c0_48 = arith.constant 0 : index
      %c0_49 = arith.constant 0 : index
      %54 = vector.load %arg1[%c0_47, %53, %c0_48, %c0_49] : memref<1x6x10x128xbf16, #tpu.memory_space<vmem>>, vector<1x1x8x128xbf16>
      %55 = vector.shape_cast %54 : vector<1x1x8x128xbf16> to vector<8x128xbf16>
      %c6 = arith.constant 6 : index
      %c0_50 = arith.constant 0 : index
      %c0_51 = arith.constant 0 : index
      %56 = vector.load %arg2[%c6, %c0_50, %c0_51] : memref<9x128x128xbf16, #tpu.memory_space<vmem>>, vector<1x128x128xbf16>
      %57 = vector.shape_cast %56 : vector<1x128x128xbf16> to vector<128x128xbf16>
      %cst_52 = arith.constant dense<0.000000e+00> : vector<8x128xf32>
      %58 = tpu.matmul %55, %57, %cst_52 {dimension_numbers = #tpu.dot_dimension_numbers<[1], [0], [0], [1], [0, 0, 1, 1], [], []>} : vector<8x128xbf16>, vector<128x128xbf16>, vector<8x128xf32> -> vector<8x128xf32>
      %59 = arith.addf %51, %58 : vector<8x128xf32>
      %c2_i32_53 = arith.constant 2 : i32
      %60 = arith.addi %arg6, %c2_i32_53 : i32
      %c0_54 = arith.constant 0 : index
      %61 = arith.index_cast %60 : i32 to index
      %c1_55 = arith.constant 1 : index
      %c0_56 = arith.constant 0 : index
      %62 = vector.load %arg1[%c0_54, %61, %c1_55, %c0_56] : memref<1x6x10x128xbf16, #tpu.memory_space<vmem>>, vector<1x1x8x128xbf16>
      %63 = vector.shape_cast %62 : vector<1x1x8x128xbf16> to vector<8x128xbf16>
      %c7 = arith.constant 7 : index
      %c0_57 = arith.constant 0 : index
      %c0_58 = arith.constant 0 : index
      %64 = vector.load %arg2[%c7, %c0_57, %c0_58] : memref<9x128x128xbf16, #tpu.memory_space<vmem>>, vector<1x128x128xbf16>
      %65 = vector.shape_cast %64 : vector<1x128x128xbf16> to vector<128x128xbf16>
      %cst_59 = arith.constant dense<0.000000e+00> : vector<8x128xf32>
      %66 = tpu.matmul %63, %65, %cst_59 {dimension_numbers = #tpu.dot_dimension_numbers<[1], [0], [0], [1], [0, 0, 1, 1], [], []>} : vector<8x128xbf16>, vector<128x128xbf16>, vector<8x128xf32> -> vector<8x128xf32>
      %67 = arith.addf %59, %66 : vector<8x128xf32>
      %c2_i32_60 = arith.constant 2 : i32
      %68 = arith.addi %arg6, %c2_i32_60 : i32
      %c0_61 = arith.constant 0 : index
      %69 = arith.index_cast %68 : i32 to index
      %c2_62 = arith.constant 2 : index
      %c0_63 = arith.constant 0 : index
      %70 = vector.load %arg1[%c0_61, %69, %c2_62, %c0_63] : memref<1x6x10x128xbf16, #tpu.memory_space<vmem>>, vector<1x1x8x128xbf16>
      %71 = vector.shape_cast %70 : vector<1x1x8x128xbf16> to vector<8x128xbf16>
      %c8 = arith.constant 8 : index
      %c0_64 = arith.constant 0 : index
      %c0_65 = arith.constant 0 : index
      %72 = vector.load %arg2[%c8, %c0_64, %c0_65] : memref<9x128x128xbf16, #tpu.memory_space<vmem>>, vector<1x128x128xbf16>
      %73 = vector.shape_cast %72 : vector<1x128x128xbf16> to vector<128x128xbf16>
      %cst_66 = arith.constant dense<0.000000e+00> : vector<8x128xf32>
      %74 = tpu.matmul %71, %73, %cst_66 {dimension_numbers = #tpu.dot_dimension_numbers<[1], [0], [0], [1], [0, 0, 1, 1], [], []>} : vector<8x128xbf16>, vector<128x128xbf16>, vector<8x128xf32> -> vector<8x128xf32>
      %75 = arith.addf %67, %74 : vector<8x128xf32>
      %76 = vector.broadcast %0 : vector<1x128xf32> to vector<8x128xf32>
      %77 = arith.mulf %75, %76 : vector<8x128xf32>
      %78 = vector.broadcast %1 : vector<1x128xf32> to vector<8x128xf32>
      %79 = arith.addf %77, %78 : vector<8x128xf32>
      %cst_67 = arith.constant 0.000000e+00 : f32
      %80 = vector.broadcast %cst_67 : f32 to vector<8x128xf32>
      %81 = arith.maximumf %79, %80 : vector<8x128xf32>
      %82 = arith.truncf %81 : vector<8x128xf32> to vector<8x128xbf16>
      %c0_68 = arith.constant 0 : index
      %83 = arith.index_cast %arg6 : i32 to index
      %c0_69 = arith.constant 0 : index
      %c0_70 = arith.constant 0 : index
      %84 = vector.load %arg5[%c0_68, %83, %c0_69, %c0_70] : memref<1x4x8x128xbf16, #tpu.memory_space<vmem>>, vector<1x1x8x128xbf16>
      %85 = vector.shape_cast %84 : vector<1x1x8x128xbf16> to vector<8x128xbf16>
      %86 = vector.shape_cast %82 : vector<8x128xbf16> to vector<1x1x8x128xbf16>
      tpu.vector_store %arg5[%c0_68, %83, %c0_69, %c0_70], %86 {strides = array<i32>} : memref<1x4x8x128xbf16, #tpu.memory_space<vmem>>, vector<1x1x8x128xbf16>,
    }
    %c4_i32_3 = arith.constant 4 : i32
    return
  }
  func.func @transform_0(%arg0: i32) -> (i32, i32, i32, i32) {
    %c0_i32 = arith.constant 0 : i32
    %c0_i32_0 = arith.constant 0 : i32
    %c0_i32_1 = arith.constant 0 : i32
    %c0_i32_2 = arith.constant 0 : i32
    return %arg0, %c0_i32, %c0_i32_0, %c0_i32_1 : i32, i32, i32, i32
  }
  func.func @transform_1(%arg0: i32) -> (i32, i32, i32) {
    %c0_i32 = arith.constant 0 : i32
    %c0_i32_0 = arith.constant 0 : i32
    %c0_i32_1 = arith.constant 0 : i32
    %c0_i32_2 = arith.constant 0 : i32
    return %c0_i32, %c0_i32_0, %c0_i32_1 : i32, i32, i32
  }
  func.func @transform_2(%arg0: i32) -> (i32, i32) {
    %c0_i32 = arith.constant 0 : i32
    %c0_i32_0 = arith.constant 0 : i32
    %c0_i32_1 = arith.constant 0 : i32
    return %c0_i32, %c0_i32_0 : i32, i32
  }
  func.func @transform_3(%arg0: i32) -> (i32, i32) {
    %c0_i32 = arith.constant 0 : i32
    %c0_i32_0 = arith.constant 0 : i32
    %c0_i32_1 = arith.constant 0 : i32
    return %c0_i32, %c0_i32_0 : i32, i32
  }
  func.func @transform_4(%arg0: i32) -> (i32, i32, i32, i32) {
    %c0_i32 = arith.constant 0 : i32
    %c0_i32_0 = arith.constant 0 : i32
    %c0_i32_1 = arith.constant 0 : i32
    %c0_i32_2 = arith.constant 0 : i32
    return %arg0, %c0_i32, %c0_i32_0, %c0_i32_1 : i32, i32, i32, i32
  }
}

module attributes {stable_mosaic.version = 11 : i64} {
  func.func @_conv_kernel(%arg0: i32, %arg1: memref<1x2x8x256xbf16, #tpu.memory_space<vmem>>, %arg2: memref<2x256x128xbf16, #tpu.memory_space<vmem>>, %arg3: memref<1x128xf32, #tpu.memory_space<vmem>>, %arg4: memref<1x128xf32, #tpu.memory_space<vmem>>, %arg5: memref<1x1x8x128xbf16, #tpu.memory_space<vmem>>) attributes {dimension_semantics = [#tpu.dimension_semantics<parallel>], iteration_bounds = array<i64: 2>, scalar_prefetch = 0 : i64, scratch_operands = 0 : i64, tpu.core_type = #tpu.core_type<tc>, window_params = [{transform_indices = @transform_0, window_bounds = array<i64: 1, 2, 8, 256>}, {pipeline_mode = #tpu.pipeline_mode<synchronous>, transform_indices = @transform_1, window_bounds = array<i64: 2, 256, 128>}, {pipeline_mode = #tpu.pipeline_mode<synchronous>, transform_indices = @transform_2, window_bounds = array<i64: 1, 128>}, {pipeline_mode = #tpu.pipeline_mode<synchronous>, transform_indices = @transform_3, window_bounds = array<i64: 1, 128>}, {transform_indices = @transform_4, window_bounds = array<i64: 1, 1, 8, 128>}]} {
    %c0 = arith.constant 0 : index
    %c0_0 = arith.constant 0 : index
    %0 = vector.load %arg3[%c0, %c0_0] : memref<1x128xf32, #tpu.memory_space<vmem>>, vector<1x128xf32>
    %c0_1 = arith.constant 0 : index
    %c0_2 = arith.constant 0 : index
    %1 = vector.load %arg4[%c0_1, %c0_2] : memref<1x128xf32, #tpu.memory_space<vmem>>, vector<1x128xf32>
    %c0_i32 = arith.constant 0 : i32
    %cst = arith.constant 0.000000e+00 : f32
    %2 = vector.broadcast %cst : f32 to vector<8x128xf32>
    %c0_i32_3 = arith.constant 0 : i32
    %3 = arith.addi %c0_i32, %c0_i32_3 : i32
    %c0_4 = arith.constant 0 : index
    %4 = arith.index_cast %3 : i32 to index
    %c0_5 = arith.constant 0 : index
    %c0_6 = arith.constant 0 : index
    %5 = vector.load %arg1[%c0_4, %4, %c0_5, %c0_6] : memref<1x2x8x256xbf16, #tpu.memory_space<vmem>>, vector<1x1x8x256xbf16>
    %6 = vector.shape_cast %5 : vector<1x1x8x256xbf16> to vector<8x256xbf16>
    %c0_7 = arith.constant 0 : index
    %c0_8 = arith.constant 0 : index
    %c0_9 = arith.constant 0 : index
    %7 = vector.load %arg2[%c0_7, %c0_8, %c0_9] : memref<2x256x128xbf16, #tpu.memory_space<vmem>>, vector<1x256x128xbf16>
    %8 = vector.shape_cast %7 : vector<1x256x128xbf16> to vector<256x128xbf16>
    %cst_10 = arith.constant dense<0.000000e+00> : vector<8x128xf32>
    %9 = tpu.matmul %6, %8, %cst_10 {dimension_numbers = #tpu.dot_dimension_numbers<[1], [0], [0], [1], [0, 0, 1, 1], [], []>} : vector<8x256xbf16>, vector<256x128xbf16>, vector<8x128xf32> -> vector<8x128xf32>
    %10 = arith.addf %2, %9 : vector<8x128xf32>
    %c1_i32 = arith.constant 1 : i32
    %11 = arith.addi %c0_i32, %c1_i32 : i32
    %c0_11 = arith.constant 0 : index
    %12 = arith.index_cast %11 : i32 to index
    %c0_12 = arith.constant 0 : index
    %c0_13 = arith.constant 0 : index
    %13 = vector.load %arg1[%c0_11, %12, %c0_12, %c0_13] : memref<1x2x8x256xbf16, #tpu.memory_space<vmem>>, vector<1x1x8x256xbf16>
    %14 = vector.shape_cast %13 : vector<1x1x8x256xbf16> to vector<8x256xbf16>
    %c1 = arith.constant 1 : index
    %c0_14 = arith.constant 0 : index
    %c0_15 = arith.constant 0 : index
    %15 = vector.load %arg2[%c1, %c0_14, %c0_15] : memref<2x256x128xbf16, #tpu.memory_space<vmem>>, vector<1x256x128xbf16>
    %16 = vector.shape_cast %15 : vector<1x256x128xbf16> to vector<256x128xbf16>
    %cst_16 = arith.constant dense<0.000000e+00> : vector<8x128xf32>
    %17 = tpu.matmul %14, %16, %cst_16 {dimension_numbers = #tpu.dot_dimension_numbers<[1], [0], [0], [1], [0, 0, 1, 1], [], []>} : vector<8x256xbf16>, vector<256x128xbf16>, vector<8x128xf32> -> vector<8x128xf32>
    %18 = arith.addf %10, %17 : vector<8x128xf32>
    %19 = vector.broadcast %0 : vector<1x128xf32> to vector<8x128xf32>
    %20 = arith.mulf %18, %19 : vector<8x128xf32>
    %21 = vector.broadcast %1 : vector<1x128xf32> to vector<8x128xf32>
    %22 = arith.addf %20, %21 : vector<8x128xf32>
    %23 = arith.truncf %22 : vector<8x128xf32> to vector<8x128xbf16>
    %c0_17 = arith.constant 0 : index
    %24 = arith.index_cast %c0_i32 : i32 to index
    %c0_18 = arith.constant 0 : index
    %c0_19 = arith.constant 0 : index
    %25 = vector.load %arg5[%c0_17, %24, %c0_18, %c0_19] : memref<1x1x8x128xbf16, #tpu.memory_space<vmem>>, vector<1x1x8x128xbf16>
    %26 = vector.shape_cast %25 : vector<1x1x8x128xbf16> to vector<8x128xbf16>
    %27 = vector.shape_cast %23 : vector<8x128xbf16> to vector<1x1x8x128xbf16>
    tpu.vector_store %arg5[%c0_17, %24, %c0_18, %c0_19], %27 {strides = array<i32>} : memref<1x1x8x128xbf16, #tpu.memory_space<vmem>>, vector<1x1x8x128xbf16>,
    %c1_i32_20 = arith.constant 1 : i32
    return
  }
  func.func @transform_0(%arg0: i32) -> (i32, i32, i32, i32) {
    %c0_i32 = arith.constant 0 : i32
    %c0_i32_0 = arith.constant 0 : i32
    %c0_i32_1 = arith.constant 0 : i32
    %c0_i32_2 = arith.constant 0 : i32
    return %arg0, %c0_i32, %c0_i32_0, %c0_i32_1 : i32, i32, i32, i32
  }
  func.func @transform_1(%arg0: i32) -> (i32, i32, i32) {
    %c0_i32 = arith.constant 0 : i32
    %c0_i32_0 = arith.constant 0 : i32
    %c0_i32_1 = arith.constant 0 : i32
    %c0_i32_2 = arith.constant 0 : i32
    return %c0_i32, %c0_i32_0, %c0_i32_1 : i32, i32, i32
  }
  func.func @transform_2(%arg0: i32) -> (i32, i32) {
    %c0_i32 = arith.constant 0 : i32
    %c0_i32_0 = arith.constant 0 : i32
    %c0_i32_1 = arith.constant 0 : i32
    return %c0_i32, %c0_i32_0 : i32, i32
  }
  func.func @transform_3(%arg0: i32) -> (i32, i32) {
    %c0_i32 = arith.constant 0 : i32
    %c0_i32_0 = arith.constant 0 : i32
    %c0_i32_1 = arith.constant 0 : i32
    return %c0_i32, %c0_i32_0 : i32, i32
  }
  func.func @transform_4(%arg0: i32) -> (i32, i32, i32, i32) {
    %c0_i32 = arith.constant 0 : i32
    %c0_i32_0 = arith.constant 0 : i32
    %c0_i32_1 = arith.constant 0 : i32
    %c0_i32_2 = arith.constant 0 : i32
    return %arg0, %c0_i32, %c0_i32_0, %c0_i32_1 : i32, i32, i32, i32
  }
}

module attributes {stable_mosaic.version = 11 : i64} {
  func.func @_conv_kernel(%arg0: i32, %arg1: memref<1x3x10x128xbf16, #tpu.memory_space<vmem>>, %arg2: memref<9x128x256xbf16, #tpu.memory_space<vmem>>, %arg3: memref<1x256xf32, #tpu.memory_space<vmem>>, %arg4: memref<1x256xf32, #tpu.memory_space<vmem>>, %arg5: memref<1x1x8x256xbf16, #tpu.memory_space<vmem>>) attributes {dimension_semantics = [#tpu.dimension_semantics<parallel>], iteration_bounds = array<i64: 2>, scalar_prefetch = 0 : i64, scratch_operands = 0 : i64, tpu.core_type = #tpu.core_type<tc>, window_params = [{transform_indices = @transform_0, window_bounds = array<i64: 1, 3, 10, 128>}, {pipeline_mode = #tpu.pipeline_mode<synchronous>, transform_indices = @transform_1, window_bounds = array<i64: 9, 128, 256>}, {pipeline_mode = #tpu.pipeline_mode<synchronous>, transform_indices = @transform_2, window_bounds = array<i64: 1, 256>}, {pipeline_mode = #tpu.pipeline_mode<synchronous>, transform_indices = @transform_3, window_bounds = array<i64: 1, 256>}, {transform_indices = @transform_4, window_bounds = array<i64: 1, 1, 8, 256>}]} {
    %c0 = arith.constant 0 : index
    %c0_0 = arith.constant 0 : index
    %0 = vector.load %arg3[%c0, %c0_0] : memref<1x256xf32, #tpu.memory_space<vmem>>, vector<1x256xf32>
    %c0_1 = arith.constant 0 : index
    %c0_2 = arith.constant 0 : index
    %1 = vector.load %arg4[%c0_1, %c0_2] : memref<1x256xf32, #tpu.memory_space<vmem>>, vector<1x256xf32>
    %c0_i32 = arith.constant 0 : i32
    %cst = arith.constant 0.000000e+00 : f32
    %2 = vector.broadcast %cst : f32 to vector<8x256xf32>
    %c0_i32_3 = arith.constant 0 : i32
    %3 = arith.addi %c0_i32, %c0_i32_3 : i32
    %c0_4 = arith.constant 0 : index
    %4 = arith.index_cast %3 : i32 to index
    %c0_5 = arith.constant 0 : index
    %c0_6 = arith.constant 0 : index
    %5 = vector.load %arg1[%c0_4, %4, %c0_5, %c0_6] : memref<1x3x10x128xbf16, #tpu.memory_space<vmem>>, vector<1x1x8x128xbf16>
    %6 = vector.shape_cast %5 : vector<1x1x8x128xbf16> to vector<8x128xbf16>
    %c0_7 = arith.constant 0 : index
    %c0_8 = arith.constant 0 : index
    %c0_9 = arith.constant 0 : index
    %7 = vector.load %arg2[%c0_7, %c0_8, %c0_9] : memref<9x128x256xbf16, #tpu.memory_space<vmem>>, vector<1x128x256xbf16>
    %8 = vector.shape_cast %7 : vector<1x128x256xbf16> to vector<128x256xbf16>
    %cst_10 = arith.constant dense<0.000000e+00> : vector<8x256xf32>
    %9 = tpu.matmul %6, %8, %cst_10 {dimension_numbers = #tpu.dot_dimension_numbers<[1], [0], [0], [1], [0, 0, 1, 1], [], []>} : vector<8x128xbf16>, vector<128x256xbf16>, vector<8x256xf32> -> vector<8x256xf32>
    %10 = arith.addf %2, %9 : vector<8x256xf32>
    %c0_i32_11 = arith.constant 0 : i32
    %11 = arith.addi %c0_i32, %c0_i32_11 : i32
    %c0_12 = arith.constant 0 : index
    %12 = arith.index_cast %11 : i32 to index
    %c1 = arith.constant 1 : index
    %c0_13 = arith.constant 0 : index
    %13 = vector.load %arg1[%c0_12, %12, %c1, %c0_13] : memref<1x3x10x128xbf16, #tpu.memory_space<vmem>>, vector<1x1x8x128xbf16>
    %14 = vector.shape_cast %13 : vector<1x1x8x128xbf16> to vector<8x128xbf16>
    %c1_14 = arith.constant 1 : index
    %c0_15 = arith.constant 0 : index
    %c0_16 = arith.constant 0 : index
    %15 = vector.load %arg2[%c1_14, %c0_15, %c0_16] : memref<9x128x256xbf16, #tpu.memory_space<vmem>>, vector<1x128x256xbf16>
    %16 = vector.shape_cast %15 : vector<1x128x256xbf16> to vector<128x256xbf16>
    %cst_17 = arith.constant dense<0.000000e+00> : vector<8x256xf32>
    %17 = tpu.matmul %14, %16, %cst_17 {dimension_numbers = #tpu.dot_dimension_numbers<[1], [0], [0], [1], [0, 0, 1, 1], [], []>} : vector<8x128xbf16>, vector<128x256xbf16>, vector<8x256xf32> -> vector<8x256xf32>
    %18 = arith.addf %10, %17 : vector<8x256xf32>
    %c0_i32_18 = arith.constant 0 : i32
    %19 = arith.addi %c0_i32, %c0_i32_18 : i32
    %c0_19 = arith.constant 0 : index
    %20 = arith.index_cast %19 : i32 to index
    %c2 = arith.constant 2 : index
    %c0_20 = arith.constant 0 : index
    %21 = vector.load %arg1[%c0_19, %20, %c2, %c0_20] : memref<1x3x10x128xbf16, #tpu.memory_space<vmem>>, vector<1x1x8x128xbf16>
    %22 = vector.shape_cast %21 : vector<1x1x8x128xbf16> to vector<8x128xbf16>
    %c2_21 = arith.constant 2 : index
    %c0_22 = arith.constant 0 : index
    %c0_23 = arith.constant 0 : index
    %23 = vector.load %arg2[%c2_21, %c0_22, %c0_23] : memref<9x128x256xbf16, #tpu.memory_space<vmem>>, vector<1x128x256xbf16>
    %24 = vector.shape_cast %23 : vector<1x128x256xbf16> to vector<128x256xbf16>
    %cst_24 = arith.constant dense<0.000000e+00> : vector<8x256xf32>
    %25 = tpu.matmul %22, %24, %cst_24 {dimension_numbers = #tpu.dot_dimension_numbers<[1], [0], [0], [1], [0, 0, 1, 1], [], []>} : vector<8x128xbf16>, vector<128x256xbf16>, vector<8x256xf32> -> vector<8x256xf32>
    %26 = arith.addf %18, %25 : vector<8x256xf32>
    %c1_i32 = arith.constant 1 : i32
    %27 = arith.addi %c0_i32, %c1_i32 : i32
    %c0_25 = arith.constant 0 : index
    %28 = arith.index_cast %27 : i32 to index
    %c0_26 = arith.constant 0 : index
    %c0_27 = arith.constant 0 : index
    %29 = vector.load %arg1[%c0_25, %28, %c0_26, %c0_27] : memref<1x3x10x128xbf16, #tpu.memory_space<vmem>>, vector<1x1x8x128xbf16>
    %30 = vector.shape_cast %29 : vector<1x1x8x128xbf16> to vector<8x128xbf16>
    %c3 = arith.constant 3 : index
    %c0_28 = arith.constant 0 : index
    %c0_29 = arith.constant 0 : index
    %31 = vector.load %arg2[%c3, %c0_28, %c0_29] : memref<9x128x256xbf16, #tpu.memory_space<vmem>>, vector<1x128x256xbf16>
    %32 = vector.shape_cast %31 : vector<1x128x256xbf16> to vector<128x256xbf16>
    %cst_30 = arith.constant dense<0.000000e+00> : vector<8x256xf32>
    %33 = tpu.matmul %30, %32, %cst_30 {dimension_numbers = #tpu.dot_dimension_numbers<[1], [0], [0], [1], [0, 0, 1, 1], [], []>} : vector<8x128xbf16>, vector<128x256xbf16>, vector<8x256xf32> -> vector<8x256xf32>
    %34 = arith.addf %26, %33 : vector<8x256xf32>
    %c1_i32_31 = arith.constant 1 : i32
    %35 = arith.addi %c0_i32, %c1_i32_31 : i32
    %c0_32 = arith.constant 0 : index
    %36 = arith.index_cast %35 : i32 to index
    %c1_33 = arith.constant 1 : index
    %c0_34 = arith.constant 0 : index
    %37 = vector.load %arg1[%c0_32, %36, %c1_33, %c0_34] : memref<1x3x10x128xbf16, #tpu.memory_space<vmem>>, vector<1x1x8x128xbf16>
    %38 = vector.shape_cast %37 : vector<1x1x8x128xbf16> to vector<8x128xbf16>
    %c4 = arith.constant 4 : index
    %c0_35 = arith.constant 0 : index
    %c0_36 = arith.constant 0 : index
    %39 = vector.load %arg2[%c4, %c0_35, %c0_36] : memref<9x128x256xbf16, #tpu.memory_space<vmem>>, vector<1x128x256xbf16>
    %40 = vector.shape_cast %39 : vector<1x128x256xbf16> to vector<128x256xbf16>
    %cst_37 = arith.constant dense<0.000000e+00> : vector<8x256xf32>
    %41 = tpu.matmul %38, %40, %cst_37 {dimension_numbers = #tpu.dot_dimension_numbers<[1], [0], [0], [1], [0, 0, 1, 1], [], []>} : vector<8x128xbf16>, vector<128x256xbf16>, vector<8x256xf32> -> vector<8x256xf32>
    %42 = arith.addf %34, %41 : vector<8x256xf32>
    %c1_i32_38 = arith.constant 1 : i32
    %43 = arith.addi %c0_i32, %c1_i32_38 : i32
    %c0_39 = arith.constant 0 : index
    %44 = arith.index_cast %43 : i32 to index
    %c2_40 = arith.constant 2 : index
    %c0_41 = arith.constant 0 : index
    %45 = vector.load %arg1[%c0_39, %44, %c2_40, %c0_41] : memref<1x3x10x128xbf16, #tpu.memory_space<vmem>>, vector<1x1x8x128xbf16>
    %46 = vector.shape_cast %45 : vector<1x1x8x128xbf16> to vector<8x128xbf16>
    %c5 = arith.constant 5 : index
    %c0_42 = arith.constant 0 : index
    %c0_43 = arith.constant 0 : index
    %47 = vector.load %arg2[%c5, %c0_42, %c0_43] : memref<9x128x256xbf16, #tpu.memory_space<vmem>>, vector<1x128x256xbf16>
    %48 = vector.shape_cast %47 : vector<1x128x256xbf16> to vector<128x256xbf16>
    %cst_44 = arith.constant dense<0.000000e+00> : vector<8x256xf32>
    %49 = tpu.matmul %46, %48, %cst_44 {dimension_numbers = #tpu.dot_dimension_numbers<[1], [0], [0], [1], [0, 0, 1, 1], [], []>} : vector<8x128xbf16>, vector<128x256xbf16>, vector<8x256xf32> -> vector<8x256xf32>
    %50 = arith.addf %42, %49 : vector<8x256xf32>
    %c2_i32 = arith.constant 2 : i32
    %51 = arith.addi %c0_i32, %c2_i32 : i32
    %c0_45 = arith.constant 0 : index
    %52 = arith.index_cast %51 : i32 to index
    %c0_46 = arith.constant 0 : index
    %c0_47 = arith.constant 0 : index
    %53 = vector.load %arg1[%c0_45, %52, %c0_46, %c0_47] : memref<1x3x10x128xbf16, #tpu.memory_space<vmem>>, vector<1x1x8x128xbf16>
    %54 = vector.shape_cast %53 : vector<1x1x8x128xbf16> to vector<8x128xbf16>
    %c6 = arith.constant 6 : index
    %c0_48 = arith.constant 0 : index
    %c0_49 = arith.constant 0 : index
    %55 = vector.load %arg2[%c6, %c0_48, %c0_49] : memref<9x128x256xbf16, #tpu.memory_space<vmem>>, vector<1x128x256xbf16>
    %56 = vector.shape_cast %55 : vector<1x128x256xbf16> to vector<128x256xbf16>
    %cst_50 = arith.constant dense<0.000000e+00> : vector<8x256xf32>
    %57 = tpu.matmul %54, %56, %cst_50 {dimension_numbers = #tpu.dot_dimension_numbers<[1], [0], [0], [1], [0, 0, 1, 1], [], []>} : vector<8x128xbf16>, vector<128x256xbf16>, vector<8x256xf32> -> vector<8x256xf32>
    %58 = arith.addf %50, %57 : vector<8x256xf32>
    %c2_i32_51 = arith.constant 2 : i32
    %59 = arith.addi %c0_i32, %c2_i32_51 : i32
    %c0_52 = arith.constant 0 : index
    %60 = arith.index_cast %59 : i32 to index
    %c1_53 = arith.constant 1 : index
    %c0_54 = arith.constant 0 : index
    %61 = vector.load %arg1[%c0_52, %60, %c1_53, %c0_54] : memref<1x3x10x128xbf16, #tpu.memory_space<vmem>>, vector<1x1x8x128xbf16>
    %62 = vector.shape_cast %61 : vector<1x1x8x128xbf16> to vector<8x128xbf16>
    %c7 = arith.constant 7 : index
    %c0_55 = arith.constant 0 : index
    %c0_56 = arith.constant 0 : index
    %63 = vector.load %arg2[%c7, %c0_55, %c0_56] : memref<9x128x256xbf16, #tpu.memory_space<vmem>>, vector<1x128x256xbf16>
    %64 = vector.shape_cast %63 : vector<1x128x256xbf16> to vector<128x256xbf16>
    %cst_57 = arith.constant dense<0.000000e+00> : vector<8x256xf32>
    %65 = tpu.matmul %62, %64, %cst_57 {dimension_numbers = #tpu.dot_dimension_numbers<[1], [0], [0], [1], [0, 0, 1, 1], [], []>} : vector<8x128xbf16>, vector<128x256xbf16>, vector<8x256xf32> -> vector<8x256xf32>
    %66 = arith.addf %58, %65 : vector<8x256xf32>
    %c2_i32_58 = arith.constant 2 : i32
    %67 = arith.addi %c0_i32, %c2_i32_58 : i32
    %c0_59 = arith.constant 0 : index
    %68 = arith.index_cast %67 : i32 to index
    %c2_60 = arith.constant 2 : index
    %c0_61 = arith.constant 0 : index
    %69 = vector.load %arg1[%c0_59, %68, %c2_60, %c0_61] : memref<1x3x10x128xbf16, #tpu.memory_space<vmem>>, vector<1x1x8x128xbf16>
    %70 = vector.shape_cast %69 : vector<1x1x8x128xbf16> to vector<8x128xbf16>
    %c8 = arith.constant 8 : index
    %c0_62 = arith.constant 0 : index
    %c0_63 = arith.constant 0 : index
    %71 = vector.load %arg2[%c8, %c0_62, %c0_63] : memref<9x128x256xbf16, #tpu.memory_space<vmem>>, vector<1x128x256xbf16>
    %72 = vector.shape_cast %71 : vector<1x128x256xbf16> to vector<128x256xbf16>
    %cst_64 = arith.constant dense<0.000000e+00> : vector<8x256xf32>
    %73 = tpu.matmul %70, %72, %cst_64 {dimension_numbers = #tpu.dot_dimension_numbers<[1], [0], [0], [1], [0, 0, 1, 1], [], []>} : vector<8x128xbf16>, vector<128x256xbf16>, vector<8x256xf32> -> vector<8x256xf32>
    %74 = arith.addf %66, %73 : vector<8x256xf32>
    %75 = vector.broadcast %0 : vector<1x256xf32> to vector<8x256xf32>
    %76 = arith.mulf %74, %75 : vector<8x256xf32>
    %77 = vector.broadcast %1 : vector<1x256xf32> to vector<8x256xf32>
    %78 = arith.addf %76, %77 : vector<8x256xf32>
    %79 = arith.truncf %78 : vector<8x256xf32> to vector<8x256xbf16>
    %c0_65 = arith.constant 0 : index
    %80 = arith.index_cast %c0_i32 : i32 to index
    %c0_66 = arith.constant 0 : index
    %c0_67 = arith.constant 0 : index
    %81 = vector.load %arg5[%c0_65, %80, %c0_66, %c0_67] : memref<1x1x8x256xbf16, #tpu.memory_space<vmem>>, vector<1x1x8x256xbf16>
    %82 = vector.shape_cast %81 : vector<1x1x8x256xbf16> to vector<8x256xbf16>
    %83 = vector.shape_cast %79 : vector<8x256xbf16> to vector<1x1x8x256xbf16>
    tpu.vector_store %arg5[%c0_65, %80, %c0_66, %c0_67], %83 {strides = array<i32>} : memref<1x1x8x256xbf16, #tpu.memory_space<vmem>>, vector<1x1x8x256xbf16>,
    %c1_i32_68 = arith.constant 1 : i32
    return
  }
  func.func @transform_0(%arg0: i32) -> (i32, i32, i32, i32) {
    %c0_i32 = arith.constant 0 : i32
    %c0_i32_0 = arith.constant 0 : i32
    %c0_i32_1 = arith.constant 0 : i32
    %c0_i32_2 = arith.constant 0 : i32
    return %arg0, %c0_i32, %c0_i32_0, %c0_i32_1 : i32, i32, i32, i32
  }
  func.func @transform_1(%arg0: i32) -> (i32, i32, i32) {
    %c0_i32 = arith.constant 0 : i32
    %c0_i32_0 = arith.constant 0 : i32
    %c0_i32_1 = arith.constant 0 : i32
    %c0_i32_2 = arith.constant 0 : i32
    return %c0_i32, %c0_i32_0, %c0_i32_1 : i32, i32, i32
  }
  func.func @transform_2(%arg0: i32) -> (i32, i32) {
    %c0_i32 = arith.constant 0 : i32
    %c0_i32_0 = arith.constant 0 : i32
    %c0_i32_1 = arith.constant 0 : i32
    return %c0_i32, %c0_i32_0 : i32, i32
  }
  func.func @transform_3(%arg0: i32) -> (i32, i32) {
    %c0_i32 = arith.constant 0 : i32
    %c0_i32_0 = arith.constant 0 : i32
    %c0_i32_1 = arith.constant 0 : i32
    return %c0_i32, %c0_i32_0 : i32, i32
  }
  func.func @transform_4(%arg0: i32) -> (i32, i32, i32, i32) {
    %c0_i32 = arith.constant 0 : i32
    %c0_i32_0 = arith.constant 0 : i32
    %c0_i32_1 = arith.constant 0 : i32
    %c0_i32_2 = arith.constant 0 : i32
    return %arg0, %c0_i32, %c0_i32_0, %c0_i32_1 : i32, i32, i32, i32
  }
}

module attributes {stable_mosaic.version = 11 : i64} {
  func.func @_tail_kernel(%arg0: i32, %arg1: memref<1x10x256xbf16, #tpu.memory_space<vmem>>, %arg2: memref<3x256x128xbf16, #tpu.memory_space<vmem>>, %arg3: memref<3x128x128xbf16, #tpu.memory_space<vmem>>, %arg4: memref<128x128xbf16, #tpu.memory_space<vmem>>, %arg5: memref<1x128xf32, #tpu.memory_space<vmem>>, %arg6: memref<1x8x128xf32, #tpu.memory_space<vmem>>, %arg7: memref<10x128xbf16, #tpu.memory_space<vmem>>) attributes {dimension_semantics = [#tpu.dimension_semantics<parallel>], iteration_bounds = array<i64: 2>, scalar_prefetch = 0 : i64, scratch_operands = 1 : i64, tpu.core_type = #tpu.core_type<tc>, window_params = [{transform_indices = @transform_0, window_bounds = array<i64: 1, 10, 256>}, {pipeline_mode = #tpu.pipeline_mode<synchronous>, transform_indices = @transform_1, window_bounds = array<i64: 3, 256, 128>}, {pipeline_mode = #tpu.pipeline_mode<synchronous>, transform_indices = @transform_2, window_bounds = array<i64: 3, 128, 128>}, {pipeline_mode = #tpu.pipeline_mode<synchronous>, transform_indices = @transform_3, window_bounds = array<i64: 128, 128>}, {pipeline_mode = #tpu.pipeline_mode<synchronous>, transform_indices = @transform_4, window_bounds = array<i64: 1, 128>}, {transform_indices = @transform_5, window_bounds = array<i64: 1, 8, 128>}]} {
    %cst = arith.constant 0.000000e+00 : f32
    %0 = vector.broadcast %cst : f32 to vector<8x128xf32>
    %c0 = arith.constant 0 : index
    %c0_0 = arith.constant 0 : index
    %c0_1 = arith.constant 0 : index
    %1 = vector.load %arg1[%c0, %c0_0, %c0_1] : memref<1x10x256xbf16, #tpu.memory_space<vmem>>, vector<1x8x256xbf16>
    %2 = vector.shape_cast %1 : vector<1x8x256xbf16> to vector<8x256xbf16>
    %c0_2 = arith.constant 0 : index
    %c0_3 = arith.constant 0 : index
    %c0_4 = arith.constant 0 : index
    %3 = vector.load %arg2[%c0_2, %c0_3, %c0_4] : memref<3x256x128xbf16, #tpu.memory_space<vmem>>, vector<1x256x128xbf16>
    %4 = vector.shape_cast %3 : vector<1x256x128xbf16> to vector<256x128xbf16>
    %cst_5 = arith.constant dense<0.000000e+00> : vector<8x128xf32>
    %5 = tpu.matmul %2, %4, %cst_5 {dimension_numbers = #tpu.dot_dimension_numbers<[1], [0], [0], [1], [0, 0, 1, 1], [], []>} : vector<8x256xbf16>, vector<256x128xbf16>, vector<8x128xf32> -> vector<8x128xf32>
    %6 = arith.addf %0, %5 : vector<8x128xf32>
    %c0_6 = arith.constant 0 : index
    %c1 = arith.constant 1 : index
    %c0_7 = arith.constant 0 : index
    %7 = vector.load %arg1[%c0_6, %c1, %c0_7] : memref<1x10x256xbf16, #tpu.memory_space<vmem>>, vector<1x8x256xbf16>
    %8 = vector.shape_cast %7 : vector<1x8x256xbf16> to vector<8x256xbf16>
    %c1_8 = arith.constant 1 : index
    %c0_9 = arith.constant 0 : index
    %c0_10 = arith.constant 0 : index
    %9 = vector.load %arg2[%c1_8, %c0_9, %c0_10] : memref<3x256x128xbf16, #tpu.memory_space<vmem>>, vector<1x256x128xbf16>
    %10 = vector.shape_cast %9 : vector<1x256x128xbf16> to vector<256x128xbf16>
    %cst_11 = arith.constant dense<0.000000e+00> : vector<8x128xf32>
    %11 = tpu.matmul %8, %10, %cst_11 {dimension_numbers = #tpu.dot_dimension_numbers<[1], [0], [0], [1], [0, 0, 1, 1], [], []>} : vector<8x256xbf16>, vector<256x128xbf16>, vector<8x128xf32> -> vector<8x128xf32>
    %12 = arith.addf %6, %11 : vector<8x128xf32>
    %c0_12 = arith.constant 0 : index
    %c2 = arith.constant 2 : index
    %c0_13 = arith.constant 0 : index
    %13 = vector.load %arg1[%c0_12, %c2, %c0_13] : memref<1x10x256xbf16, #tpu.memory_space<vmem>>, vector<1x8x256xbf16>
    %14 = vector.shape_cast %13 : vector<1x8x256xbf16> to vector<8x256xbf16>
    %c2_14 = arith.constant 2 : index
    %c0_15 = arith.constant 0 : index
    %c0_16 = arith.constant 0 : index
    %15 = vector.load %arg2[%c2_14, %c0_15, %c0_16] : memref<3x256x128xbf16, #tpu.memory_space<vmem>>, vector<1x256x128xbf16>
    %16 = vector.shape_cast %15 : vector<1x256x128xbf16> to vector<256x128xbf16>
    %cst_17 = arith.constant dense<0.000000e+00> : vector<8x128xf32>
    %17 = tpu.matmul %14, %16, %cst_17 {dimension_numbers = #tpu.dot_dimension_numbers<[1], [0], [0], [1], [0, 0, 1, 1], [], []>} : vector<8x256xbf16>, vector<256x128xbf16>, vector<8x128xf32> -> vector<8x128xf32>
    %18 = arith.addf %12, %17 : vector<8x128xf32>
    %cst_18 = arith.constant 0.000000e+00 : bf16
    %19 = vector.broadcast %cst_18 : bf16 to vector<10x128xbf16>
    %c0_19 = arith.constant 0 : index
    %c0_20 = arith.constant 0 : index
    %20 = vector.load %arg7[%c0_19, %c0_20] : memref<10x128xbf16, #tpu.memory_space<vmem>>, vector<10x128xbf16>
    tpu.vector_store %arg7[%c0_19, %c0_20], %19 {strides = array<i32>} : memref<10x128xbf16, #tpu.memory_space<vmem>>, vector<10x128xbf16>,
    %21 = arith.truncf %18 : vector<8x128xf32> to vector<8x128xbf16>
    %c1_21 = arith.constant 1 : index
    %c0_22 = arith.constant 0 : index
    %22 = vector.load %arg7[%c1_21, %c0_22] : memref<10x128xbf16, #tpu.memory_space<vmem>>, vector<8x128xbf16>
    tpu.vector_store %arg7[%c1_21, %c0_22], %21 {strides = array<i32>} : memref<10x128xbf16, #tpu.memory_space<vmem>>, vector<8x128xbf16>,
    %cst_23 = arith.constant 0.000000e+00 : f32
    %23 = vector.broadcast %cst_23 : f32 to vector<8x128xf32>
    %c0_24 = arith.constant 0 : index
    %c0_25 = arith.constant 0 : index
    %24 = vector.load %arg7[%c0_24, %c0_25] : memref<10x128xbf16, #tpu.memory_space<vmem>>, vector<8x128xbf16>
    %c0_26 = arith.constant 0 : index
    %c0_27 = arith.constant 0 : index
    %c0_28 = arith.constant 0 : index
    %25 = vector.load %arg3[%c0_26, %c0_27, %c0_28] : memref<3x128x128xbf16, #tpu.memory_space<vmem>>, vector<1x128x128xbf16>
    %26 = vector.shape_cast %25 : vector<1x128x128xbf16> to vector<128x128xbf16>
    %cst_29 = arith.constant dense<0.000000e+00> : vector<8x128xf32>
    %27 = tpu.matmul %24, %26, %cst_29 {dimension_numbers = #tpu.dot_dimension_numbers<[1], [0], [0], [1], [0, 0, 1, 1], [], []>} : vector<8x128xbf16>, vector<128x128xbf16>, vector<8x128xf32> -> vector<8x128xf32>
    %28 = arith.addf %23, %27 : vector<8x128xf32>
    %c1_30 = arith.constant 1 : index
    %c0_31 = arith.constant 0 : index
    %29 = vector.load %arg7[%c1_30, %c0_31] : memref<10x128xbf16, #tpu.memory_space<vmem>>, vector<8x128xbf16>
    %c1_32 = arith.constant 1 : index
    %c0_33 = arith.constant 0 : index
    %c0_34 = arith.constant 0 : index
    %30 = vector.load %arg3[%c1_32, %c0_33, %c0_34] : memref<3x128x128xbf16, #tpu.memory_space<vmem>>, vector<1x128x128xbf16>
    %31 = vector.shape_cast %30 : vector<1x128x128xbf16> to vector<128x128xbf16>
    %cst_35 = arith.constant dense<0.000000e+00> : vector<8x128xf32>
    %32 = tpu.matmul %29, %31, %cst_35 {dimension_numbers = #tpu.dot_dimension_numbers<[1], [0], [0], [1], [0, 0, 1, 1], [], []>} : vector<8x128xbf16>, vector<128x128xbf16>, vector<8x128xf32> -> vector<8x128xf32>
    %33 = arith.addf %28, %32 : vector<8x128xf32>
    %c2_36 = arith.constant 2 : index
    %c0_37 = arith.constant 0 : index
    %34 = vector.load %arg7[%c2_36, %c0_37] : memref<10x128xbf16, #tpu.memory_space<vmem>>, vector<8x128xbf16>
    %c2_38 = arith.constant 2 : index
    %c0_39 = arith.constant 0 : index
    %c0_40 = arith.constant 0 : index
    %35 = vector.load %arg3[%c2_38, %c0_39, %c0_40] : memref<3x128x128xbf16, #tpu.memory_space<vmem>>, vector<1x128x128xbf16>
    %36 = vector.shape_cast %35 : vector<1x128x128xbf16> to vector<128x128xbf16>
    %cst_41 = arith.constant dense<0.000000e+00> : vector<8x128xf32>
    %37 = tpu.matmul %34, %36, %cst_41 {dimension_numbers = #tpu.dot_dimension_numbers<[1], [0], [0], [1], [0, 0, 1, 1], [], []>} : vector<8x128xbf16>, vector<128x128xbf16>, vector<8x128xf32> -> vector<8x128xf32>
    %38 = arith.addf %33, %37 : vector<8x128xf32>
    %cst_42 = arith.constant dense<0.000000e+00> : vector<8xf32>
    %39 = vector.multi_reduction <add>, %38, %cst_42 [1] : vector<8x128xf32> to vector<8xf32>
    %40 = vector.shape_cast %39 : vector<8xf32> to vector<8x1xf32>
    %cst_43 = arith.constant 1.280000e+02 : f32
    %41 = vector.broadcast %cst_43 : f32 to vector<8x1xf32>
    %42 = arith.divf %40, %41 : vector<8x1xf32>
    %43 = vector.broadcast %42 : vector<8x1xf32> to vector<8x128xf32>
    %44 = arith.subf %38, %43 : vector<8x128xf32>
    %45 = arith.mulf %44, %44 : vector<8x128xf32>
    %cst_44 = arith.constant dense<0.000000e+00> : vector<8xf32>
    %46 = vector.multi_reduction <add>, %45, %cst_44 [1] : vector<8x128xf32> to vector<8xf32>
    %47 = vector.shape_cast %46 : vector<8xf32> to vector<8x1xf32>
    %cst_45 = arith.constant 1.280000e+02 : f32
    %48 = vector.broadcast %cst_45 : f32 to vector<8x1xf32>
    %49 = arith.divf %47, %48 : vector<8x1xf32>
    %cst_46 = arith.constant 9.99999974E-6 : f32
    %50 = vector.broadcast %cst_46 : f32 to vector<8x1xf32>
    %51 = arith.addf %49, %50 : vector<8x1xf32>
    %52 = math.rsqrt %51 : vector<8x1xf32>
    %53 = vector.broadcast %52 : vector<8x1xf32> to vector<8x128xf32>
    %54 = arith.mulf %44, %53 : vector<8x128xf32>
    %55 = arith.truncf %54 : vector<8x128xf32> to vector<8x128xbf16>
    %c0_47 = arith.constant 0 : index
    %c0_48 = arith.constant 0 : index
    %56 = vector.load %arg4[%c0_47, %c0_48] : memref<128x128xbf16, #tpu.memory_space<vmem>>, vector<128x128xbf16>
    %cst_49 = arith.constant dense<0.000000e+00> : vector<8x128xf32>
    %57 = tpu.matmul %55, %56, %cst_49 {dimension_numbers = #tpu.dot_dimension_numbers<[1], [0], [0], [1], [0, 0, 1, 1], [], []>} : vector<8x128xbf16>, vector<128x128xbf16>, vector<8x128xf32> -> vector<8x128xf32>
    %c0_50 = arith.constant 0 : index
    %c0_51 = arith.constant 0 : index
    %58 = vector.load %arg5[%c0_50, %c0_51] : memref<1x128xf32, #tpu.memory_space<vmem>>, vector<1x128xf32>
    %59 = vector.broadcast %58 : vector<1x128xf32> to vector<8x128xf32>
    %60 = arith.addf %57, %59 : vector<8x128xf32>
    %c0_52 = arith.constant 0 : index
    %c0_53 = arith.constant 0 : index
    %c0_54 = arith.constant 0 : index
    %61 = vector.load %arg6[%c0_52, %c0_53, %c0_54] : memref<1x8x128xf32, #tpu.memory_space<vmem>>, vector<1x8x128xf32>
    %62 = vector.shape_cast %61 : vector<1x8x128xf32> to vector<8x128xf32>
    %63 = vector.shape_cast %60 : vector<8x128xf32> to vector<1x8x128xf32>
    tpu.vector_store %arg6[%c0_52, %c0_53, %c0_54], %63 {strides = array<i32>} : memref<1x8x128xf32, #tpu.memory_space<vmem>>, vector<1x8x128xf32>,
    return
  }
  func.func @transform_0(%arg0: i32) -> (i32, i32, i32) {
    %c0_i32 = arith.constant 0 : i32
    %c0_i32_0 = arith.constant 0 : i32
    %c0_i32_1 = arith.constant 0 : i32
    return %arg0, %c0_i32, %c0_i32_0 : i32, i32, i32
  }
  func.func @transform_1(%arg0: i32) -> (i32, i32, i32) {
    %c0_i32 = arith.constant 0 : i32
    %c0_i32_0 = arith.constant 0 : i32
    %c0_i32_1 = arith.constant 0 : i32
    %c0_i32_2 = arith.constant 0 : i32
    return %c0_i32, %c0_i32_0, %c0_i32_1 : i32, i32, i32
  }
  func.func @transform_2(%arg0: i32) -> (i32, i32, i32) {
    %c0_i32 = arith.constant 0 : i32
    %c0_i32_0 = arith.constant 0 : i32
    %c0_i32_1 = arith.constant 0 : i32
    %c0_i32_2 = arith.constant 0 : i32
    return %c0_i32, %c0_i32_0, %c0_i32_1 : i32, i32, i32
  }
  func.func @transform_3(%arg0: i32) -> (i32, i32) {
    %c0_i32 = arith.constant 0 : i32
    %c0_i32_0 = arith.constant 0 : i32
    %c0_i32_1 = arith.constant 0 : i32
    return %c0_i32, %c0_i32_0 : i32, i32
  }
  func.func @transform_4(%arg0: i32) -> (i32, i32) {
    %c0_i32 = arith.constant 0 : i32
    %c0_i32_0 = arith.constant 0 : i32
    %c0_i32_1 = arith.constant 0 : i32
    return %c0_i32, %c0_i32_0 : i32, i32
  }
  func.func @transform_5(%arg0: i32) -> (i32, i32, i32) {
    %c0_i32 = arith.constant 0 : i32
    %c0_i32_0 = arith.constant 0 : i32
    %c0_i32_1 = arith.constant 0 : i32
    return %arg0, %c0_i32, %c0_i32_0 : i32, i32, i32
  }
}

</mosaic_0001>

<bundles_post_ra>
// kernel: crnn_forward.9
= control target key start
LH: loop header
LB: loop body
LE: loop exit
PB: predicated region body
PF: predicated region fallthrough
CT: control target
= control target key end

     0   :  { %s3584_s15 = smov 0   ;;  %s4083_s0 = inlined_call_operand.vmem [shape: bf16[4096,9], index: 0, kind: input, shape index: {}]   ;;  %s4084_s1 = inlined_call_operand.vmem [shape: bf16[9,128], index: 1, kind: input, shape index: {}]   ;;  %s4085_s2 = inlined_call_operand.vmem [shape: f32[1,128], index: 2, kind: input, shape index: {}]   ;;  %s4086_s3 = inlined_call_operand.vmem [shape: f32[1,128], index: 3, kind: input, shape index: {}]   ;;  %s4087_s4 = inlined_call_operand.vmem [shape: bf16[4096,128], index: 4, kind: output, shape index: {}]  }
   0x1 LB: > { %s2496_s16 = sadd.s32 4294967295, %s3556_s15   ;;  %p2500_p0 = scmp.ge.s32.totalorder %s3556_s15, 1  ;;  %s3556_s15 = sphi %s3584_s15, %s14_s15  }
   0x2   : > { %p163_p1 = scmp.lt.s32.totalorder %s3556_s15, 5 }
   0x4   : > { %p164_p2 = pnand %p2500_p0, %p163_p1 }
   0x5   : > { %v3483_v0 = vld [vmem:[%s4084_s1] sm:$0x1f] (!%p164_p2)   ;;  %vm850_vm0 = vcmask (!%p164_p2), 1043456   ;;  %vm851_vm1 = vcmask (!%p164_p2), 1044480   ;;  %s2501_s19 = sshll.u32 (!%p164_p2), %s2496_s16, 7  ;;  %v3558_v1 = vmov (!%p164_p2), 65535  }
   0x6   : > { %167 = sbr.rel (%p164_p2) target bundleno = 364 (0x16c), region = 36  ;;  %v852_v2 = vsel (!%p164_p2), %vm850_vm0, 4294967295, %v3558_v1  ;;  %p190_p3 = scmp.lt.s32.totalorder (!%p164_p2), %s2501_s19, 511  ;;  %vm657_vm2 = vcmask (!%p164_p2), 72704  }
   0x7   : > { %v853_v3 = vsel (!%p164_p2), %vm851_vm1, %v852_v2, 0 }
   0x8   : > { %v855_v4 = vand.u32 (!%p164_p2), %v3483_v0, %v853_v3 }
   0xa   : > { %3342 = vmatprep.subr.bf16.mxu0 (!%p164_p2), %v855_v4  ;;  %3472 = vmatprep.subr.bf16.mxu1 (!%p164_p2), %v855_v4 }
   0xb   : > { %3343 = vmatpush3.bf16.msra.mxu0 (!%p164_p2), %v855_v4  ;;  %3473 = vmatpush3.bf16.msra.mxu1 (!%p164_p2), %v855_v4 }
   0xd   : > { %s4089_s19 = smov (!%p190_p3, %s2501_s19), 511 }
   0xe   : > { %s2502_s20 = sshll.u32 %s4089_s19, 2 }
   0xf   : > { %s3603_s23 = scalar_lea.vmem %s4083_s0, %s2502_s20  ;;  %s3764_s30 = scalar_lea.vmem %s4087_s4, %s2502_s20 }
  0x10   : > { %v3484_v5 = vld [vmem:[%s3603_s23] sm:$0xff]   ;;  %v3486_v7 = vld [vmem:[%s3603_s23 + $0x8] sm:$0xff]   ;;  %v3488_v9 = vld [vmem:[%s3603_s23 + $0x10] sm:$0xff]  }
  0x11   : > { %v3485_v6 = vld [vmem:[%s3603_s23 + $0x100] sm:$0xff]   ;;  %3344 = vmatprep.mubr.msk.bf16.mxu0 %vm657_vm2, %v3484_v5  ;;  %v3487_v8 = vld [vmem:[%s3603_s23 + $0x108] sm:$0xff]   ;;  %v3489_v10 = vld [vmem:[%s3603_s23 + $0x110] sm:$0xff]  }
  0x12   : > { %3408 = vmatprep.mubr.msk.bf16.mxu1 %vm657_vm2, %v3485_v6  ;;  %3345 = vmatmul.mubr.msk.bf16.vlgmr.msra.gmra.mrb[0].mxu0 %vm657_vm2, %v3486_v7  ;;  %v3490_v11 = vld [vmem:[%s3603_s23 + $0x18] sm:$0xff]   ;;  %v3492_v13 = vld [vmem:[%s3603_s23 + $0x20] sm:$0xff]   ;;  %v3494_v15 = vld [vmem:[%s3603_s23 + $0x28] sm:$0xff]  }
  0x13   : > { %3409 = vmatmul.mubr.msk.bf16.vlgmr.msra.gmra.mrb[0].mxu1 %vm657_vm2, %v3487_v8  ;;  %3348 = vmatprep.mubr.msk.bf16.mxu0 %vm657_vm2, %v3488_v9  ;;  %v3491_v12 = vld [vmem:[%s3603_s23 + $0x118] sm:$0xff]   ;;  %v3493_v14 = vld [vmem:[%s3603_s23 + $0x120] sm:$0xff]   ;;  %v3495_v16 = vld [vmem:[%s3603_s23 + $0x128] sm:$0xff]  }
  0x14   : > { %3412 = vmatprep.mubr.msk.bf16.mxu1 %vm657_vm2, %v3489_v10  ;;  %v3496_v17 = vld [vmem:[%s3603_s23 + $0x30] sm:$0xff]   ;;  %v3498_v19 = vld [vmem:[%s3603_s23 + $0x38] sm:$0xff]   ;;  %v3500_v21 = vld [vmem:[%s3603_s23 + $0x40] sm:$0xff]  }
  0x15   : > { %v3497_v18 = vld [vmem:[%s3603_s23 + $0x130] sm:$0xff]   ;;  %v3499_v20 = vld [vmem:[%s3603_s23 + $0x138] sm:$0xff]   ;;  %v3501_v22 = vld [vmem:[%s3603_s23 + $0x140] sm:$0xff]  }
  0x16   : > { %v3502_v23 = vld [vmem:[%s3603_s23 + $0x48] sm:$0xff]   ;;  %v3504_v25 = vld [vmem:[%s3603_s23 + $0x50] sm:$0xff]   ;;  %v3506_v27 = vld [vmem:[%s3603_s23 + $0x58] sm:$0xff]  }
  0x17   : > { %v3503_v24 = vld [vmem:[%s3603_s23 + $0x148] sm:$0xff]   ;;  %v3505_v26 = vld [vmem:[%s3603_s23 + $0x150] sm:$0xff]   ;;  %v3507_v28 = vld [vmem:[%s3603_s23 + $0x158] sm:$0xff]  }
  0x18   : > { %v3508_v29 = vld [vmem:[%s3603_s23 + $0x60] sm:$0xff]   ;;  %v3510_v31 = vld [vmem:[%s3603_s23 + $0x68] sm:$0xff]   ;;  %v3512_v33 = vld [vmem:[%s3603_s23 + $0x70] sm:$0xff]  }
  0x19   : > { %v3509_v30 = vld [vmem:[%s3603_s23 + $0x160] sm:$0xff]   ;;  %v3511_v32 = vld [vmem:[%s3603_s23 + $0x168] sm:$0xff]   ;;  %v3513_v34 = vld [vmem:[%s3603_s23 + $0x170] sm:$0xff]  }
  0x1a   : > { %3349 = vmatmul.mubr.msk.bf16.gmra.mrb[4].mxu0 %vm657_vm2, %v3490_v11  ;;  %v3514_v35 = vld [vmem:[%s3603_s23 + $0x78] sm:$0xff]   ;;  %v3516_v37 = vld [vmem:[%s3603_s23 + $0x80] sm:$0xff]   ;;  %v3518_v39 = vld [vmem:[%s3603_s23 + $0x88] sm:$0xff]  }
  0x1b   : > { %3413 = vmatmul.mubr.msk.bf16.gmra.mrb[4].mxu1 %vm657_vm2, %v3491_v12  ;;  %3352 = vmatprep.mubr.msk.bf16.mxu0 %vm657_vm2, %v3492_v13  ;;  %v3515_v36 = vld [vmem:[%s3603_s23 + $0x178] sm:$0xff]   ;;  %v3517_v38 = vld [vmem:[%s3603_s23 + $0x180] sm:$0xff]   ;;  %v3519_v40 = vld [vmem:[%s3603_s23 + $0x188] sm:$0xff]  }
  0x1c   : > { %3416 = vmatprep.mubr.msk.bf16.mxu1 %vm657_vm2, %v3493_v14  ;;  %v3520_v41 = vld [vmem:[%s3603_s23 + $0x90] sm:$0xff]   ;;  %v3522_v43 = vld [vmem:[%s3603_s23 + $0x98] sm:$0xff]   ;;  %v3524_v45 = vld [vmem:[%s3603_s23 + $0xa0] sm:$0xff]  }
  0x1d   : > { %v3521_v42 = vld [vmem:[%s3603_s23 + $0x190] sm:$0xff]   ;;  %v3523_v44 = vld [vmem:[%s3603_s23 + $0x198] sm:$0xff]   ;;  %v3525_v46 = vld [vmem:[%s3603_s23 + $0x1a0] sm:$0xff]  }
  0x1e   : > { %v3526_v47 = vld [vmem:[%s3603_s23 + $0xa8] sm:$0xff]   ;;  %v3528_v49 = vld [vmem:[%s3603_s23 + $0xb0] sm:$0xff]   ;;  %v3530_v51 = vld [vmem:[%s3603_s23 + $0xb8] sm:$0xff]  }
  0x1f   : > { %v3527_v48 = vld [vmem:[%s3603_s23 + $0x1a8] sm:$0xff]   ;;  %v3529_v50 = vld [vmem:[%s3603_s23 + $0x1b0] sm:$0xff]   ;;  %v3531_v52 = vld [vmem:[%s3603_s23 + $0x1b8] sm:$0xff]  }
  0x20   : > { %v3532_v53 = vld [vmem:[%s3603_s23 + $0xc0] sm:$0xff]   ;;  %v3534_v55 = vld [vmem:[%s3603_s23 + $0xc8] sm:$0xff]   ;;  %v3536_v57 = vld [vmem:[%s3603_s23 + $0xd0] sm:$0xff]  }
  0x21   : > { %v3533_v54 = vld [vmem:[%s3603_s23 + $0x1c0] sm:$0xff]   ;;  %v3535_v56 = vld [vmem:[%s3603_s23 + $0x1c8] sm:$0xff]   ;;  %v3537_v58 = vld [vmem:[%s3603_s23 + $0x1d0] sm:$0xff]  }
  0x22   : > { %3353 = vmatmul.mubr.msk.bf16.gmra.mrb[8].mxu0 %vm657_vm2, %v3494_v15  ;;  %v3538_v59 = vld [vmem:[%s3603_s23 + $0xd8] sm:$0xff]   ;;  %v3540_v61 = vld [vmem:[%s3603_s23 + $0xe0] sm:$0xff]   ;;  %v3542_v63 = vld [vmem:[%s3603_s23 + $0xe8] sm:$0xff]  }
  0x23   : > { %3417 = vmatmul.mubr.msk.bf16.gmra.mrb[8].mxu1 %vm657_vm2, %v3495_v16  ;;  %3356 = vmatprep.mubr.msk.bf16.mxu0 %vm657_vm2, %v3496_v17  ;;  %v3539_v60 = vld [vmem:[%s3603_s23 + $0x1d8] sm:$0xff]   ;;  %v3541_v62 = vld [vmem:[%s3603_s23 + $0x1e0] sm:$0xff]   ;;  %v3543_v0 = vld [vmem:[%s3603_s23 + $0x1e8] sm:$0xff]  }
  0x24   : > { %3420 = vmatprep.mubr.msk.bf16.mxu1 %vm657_vm2, %v3497_v18  ;;  %v3544_v1 = vld [vmem:[%s3603_s23 + $0xf0] sm:$0xff]   ;;  %v3546_v3 = vld [vmem:[%s3603_s23 + $0xf8] sm:$0xff]   ;;  %v3736_v5 = vld [vmem:[%s4085_s2] ss:$0 sm:$0xff] }
  0x25   : > { %v3545_v2 = vld [vmem:[%s3603_s23 + $0x1f0] sm:$0xff]   ;;  %v3547_v4 = vld [vmem:[%s3603_s23 + $0x1f8] sm:$0xff]   ;;  %v3741_v7 = vld [vmem:[%s4086_s3] ss:$0 sm:$0xff] }
  0x2a   : > { %3357 = vmatmul.mubr.msk.bf16.gmra.mrb[12].mxu0 %vm657_vm2, %v3498_v19 }
  0x2b   : > { %3421 = vmatmul.mubr.msk.bf16.gmra.mrb[12].mxu1 %vm657_vm2, %v3499_v20  ;;  %3360 = vmatprep.mubr.msk.bf16.mxu0 %vm657_vm2, %v3500_v21 }
  0x2c   : > { %3424 = vmatprep.mubr.msk.bf16.mxu1 %vm657_vm2, %v3501_v22 }
  0x32   : > { %3361 = vmatmul.mubr.msk.bf16.gmra.mrb[16].mxu0 %vm657_vm2, %v3502_v23 }
  0x33   : > { %3425 = vmatmul.mubr.msk.bf16.gmra.mrb[16].mxu1 %vm657_vm2, %v3503_v24  ;;  %3364 = vmatprep.mubr.msk.bf16.mxu0 %vm657_vm2, %v3504_v25 }
  0x34   : > { %3428 = vmatprep.mubr.msk.bf16.mxu1 %vm657_vm2, %v3505_v26 }
  0x3a   : > { %3365 = vmatmul.mubr.msk.bf16.gmra.mrb[20].mxu0 %vm657_vm2, %v3506_v27 }
  0x3b   : > { %3429 = vmatmul.mubr.msk.bf16.gmra.mrb[20].mxu1 %vm657_vm2, %v3507_v28  ;;  %3368 = vmatprep.mubr.msk.bf16.mxu0 %vm657_vm2, %v3508_v29 }
  0x3c   : > { %3432 = vmatprep.mubr.msk.bf16.mxu1 %vm657_vm2, %v3509_v30 }
  0x42   : > { %3369 = vmatmul.mubr.msk.bf16.gmra.mrb[24].mxu0 %vm657_vm2, %v3510_v31 }
  0x43   : > { %3433 = vmatmul.mubr.msk.bf16.gmra.mrb[24].mxu1 %vm657_vm2, %v3511_v32  ;;  %3372 = vmatprep.mubr.msk.bf16.mxu0 %vm657_vm2, %v3512_v33 }
  0x44   : > { %3436 = vmatprep.mubr.msk.bf16.mxu1 %vm657_vm2, %v3513_v34 }
  0x4a   : > { %3373 = vmatmul.mubr.msk.bf16.gmra.mrb[28].mxu0 %vm657_vm2, %v3514_v35 }
  0x4b   : > { %3437 = vmatmul.mubr.msk.bf16.gmra.mrb[28].mxu1 %vm657_vm2, %v3515_v36  ;;  %3376 = vmatprep.mubr.msk.bf16.mxu0 %vm657_vm2, %v3516_v37 }
  0x4c   : > { %3440 = vmatprep.mubr.msk.bf16.mxu1 %vm657_vm2, %v3517_v38 }
  0x52   : > { %3377 = vmatmul.mubr.msk.bf16.gmra.mrb[32].mxu0 %vm657_vm2, %v3518_v39 }
  0x53   : > { %3441 = vmatmul.mubr.msk.bf16.gmra.mrb[32].mxu1 %vm657_vm2, %v3519_v40  ;;  %3380 = vmatprep.mubr.msk.bf16.mxu0 %vm657_vm2, %v3520_v41 }
  0x54   : > { %3444 = vmatprep.mubr.msk.bf16.mxu1 %vm657_vm2, %v3521_v42 }
  0x5a   : > { %3381 = vmatmul.mubr.msk.bf16.gmra.mrb[36].mxu0 %vm657_vm2, %v3522_v43 }
  0x5b   : > { %3445 = vmatmul.mubr.msk.bf16.gmra.mrb[36].mxu1 %vm657_vm2, %v3523_v44  ;;  %3384 = vmatprep.mubr.msk.bf16.mxu0 %vm657_vm2, %v3524_v45 }
  0x5c   : > { %3448 = vmatprep.mubr.msk.bf16.mxu1 %vm657_vm2, %v3525_v46 }
  0x62   : > { %3385 = vmatmul.mubr.msk.bf16.gmra.mrb[40].mxu0 %vm657_vm2, %v3526_v47 }
  0x63   : > { %3449 = vmatmul.mubr.msk.bf16.gmra.mrb[40].mxu1 %vm657_vm2, %v3527_v48  ;;  %3388 = vmatprep.mubr.msk.bf16.mxu0 %vm657_vm2, %v3528_v49 }
  0x64   : > { %3452 = vmatprep.mubr.msk.bf16.mxu1 %vm657_vm2, %v3529_v50 }
  0x6a   : > { %3389 = vmatmul.mubr.msk.bf16.gmra.mrb[44].mxu0 %vm657_vm2, %v3530_v51 }
  0x6b   : > { %3453 = vmatmul.mubr.msk.bf16.gmra.mrb[44].mxu1 %vm657_vm2, %v3531_v52  ;;  %3392 = vmatprep.mubr.msk.bf16.mxu0 %vm657_vm2, %v3532_v53 }
  0x6c   : > { %3456 = vmatprep.mubr.msk.bf16.mxu1 %vm657_vm2, %v3533_v54 }
  0x72   : > { %3393 = vmatmul.mubr.msk.bf16.gmra.mrb[48].mxu0 %vm657_vm2, %v3534_v55 }
  0x73   : > { %3457 = vmatmul.mubr.msk.bf16.gmra.mrb[48].mxu1 %vm657_vm2, %v3535_v56  ;;  %3396 = vmatprep.mubr.msk.bf16.mxu0 %vm657_vm2, %v3536_v57 }
  0x74   : > { %3460 = vmatprep.mubr.msk.bf16.mxu1 %vm657_vm2, %v3537_v58 }
  0x7a   : > { %3397 = vmatmul.mubr.msk.bf16.gmra.mrb[52].mxu0 %vm657_vm2, %v3538_v59 }
  0x7b   : > { %3461 = vmatmul.mubr.msk.bf16.gmra.mrb[52].mxu1 %vm657_vm2, %v3539_v60  ;;  %3400 = vmatprep.mubr.msk.bf16.mxu0 %vm657_vm2, %v3540_v61 }
  0x7c   : > { %3464 = vmatprep.mubr.msk.bf16.mxu1 %vm657_vm2, %v3541_v62 }
  0x82   : > { %3401 = vmatmul.mubr.msk.bf16.gmra.mrb[56].mxu0 %vm657_vm2, %v3542_v63 }
  0x83   : > { %3465 = vmatmul.mubr.msk.bf16.gmra.mrb[56].mxu1 %vm657_vm2, %v3543_v0  ;;  %3404 = vmatprep.mubr.msk.bf16.mxu0 %vm657_vm2, %v3544_v1 }
  0x84   : > { %3468 = vmatprep.mubr.msk.bf16.mxu1 %vm657_vm2, %v3545_v2 }
  0x8a   : > { %3405 = vmatmul.mubr.msk.bf16.gmra.mrb[60].mxu0 %vm657_vm2, %v3546_v3 }
  0x8b   : > { %3469 = vmatmul.mubr.msk.bf16.gmra.mrb[60].mxu1 %vm657_vm2, %v3547_v4 }
  0xe5   : > { %v3346_v6 = vpop.f32.mrb[0].mxu0 }
  0xe6   : > { %v1411_v8 = vmul.f32 %v3346_v6, %v3736_v5  ;;  %v3410_v9 = vpop.f32.mrb[0].mxu1  ;;  %v891_v10 = vpop.f32.mrb[1].mxu0 }
  0xe7   : > { %v1475_v11 = vmul.f32 %v3410_v9, %v3736_v5  ;;  %v1409_v12 = vmul.f32 %v3736_v5, %v891_v10  ;;  %v1147_v13 = vpop.f32.mrb[1].mxu1  ;;  %v3347_v14 = vpop.f32.mrb[2].mxu0 }
  0xe8   : > { %v1546_v15 = vadd.f32 %v3741_v7, %v1411_v8  ;;  %v1473_v16 = vmul.f32 %v3736_v5, %v1147_v13  ;;  %v1412_v17 = vmul.f32 %v3347_v14, %v3736_v5  ;;  %v3411_v18 = vpop.f32.mrb[2].mxu1  ;;  %v894_v19 = vpop.f32.mrb[3].mxu0 }
  0xe9   : > { %v1610_v20 = vadd.f32 %v3741_v7, %v1475_v11  ;;  %v1544_v21 = vadd.f32 %v3741_v7, %v1409_v12  ;;  %v1476_v22 = vmul.f32 %v3411_v18, %v3736_v5  ;;  %v1410_v23 = vmul.f32 %v3736_v5, %v894_v19  ;;  %v1150_v24 = vpop.f32.mrb[3].mxu1 }
  0xea   : > { %v1608_v25 = vadd.f32 %v3741_v7, %v1473_v16  ;;  %v1547_v26 = vadd.f32 %v3741_v7, %v1412_v17  ;;  %v1474_v27 = vmul.f32 %v3736_v5, %v1150_v24  ;;  %v1674_v30 = vmax.f32 %v1546_v15, 0.0 }
  0xeb   : > { %v1611_v28 = vadd.f32 %v3741_v7, %v1476_v22  ;;  %v1545_v29 = vadd.f32 %v3741_v7, %v1410_v23  ;;  %v1738_v33 = vmax.f32 %v1610_v20, 0.0  ;;  %v1672_v34 = vmax.f32 %v1544_v21, 0.0 }
  0xec   : > { %v1675_v31 = vmax.f32 %v1547_v26, 0.0  ;;  %v1609_v32 = vadd.f32 %v3741_v7, %v1474_v27  ;;  %v1736_v38 = vmax.f32 %v1608_v25, 0.0 }
  0xed   : > { %v1739_v35 = vmax.f32 %v1611_v28, 0.0  ;;  %v1673_v36 = vmax.f32 %v1545_v29, 0.0  ;;  %v3350_v37 = vpop.f32.mrb[4].mxu0 }
  0xee   : > { %v2902_v39 = vpack.c.bf16 %v1675_v31, %v1674_v30  ;;  %v1737_v40 = vmax.f32 %v1609_v32, 0.0  ;;  %v1415_v41 = vmul.f32 %v3350_v37, %v3736_v5  ;;  %v3414_v42 = vpop.f32.mrb[4].mxu1  ;;  %v907_v43 = vpop.f32.mrb[5].mxu0 }
  0xef   : > { %v3062_v44 = vpack.c.bf16 %v1739_v35, %v1738_v33  ;;  %v2897_v45 = vpack.c.bf16 %v1673_v36, %v1672_v34  ;;  %v1479_v46 = vmul.f32 %v3414_v42, %v3736_v5  ;;  %v1413_v47 = vmul.f32 %v3736_v5, %v907_v43  ;;  %v1163_v48 = vpop.f32.mrb[5].mxu1  ;;  %v3351_v49 = vpop.f32.mrb[6].mxu0 }
  0xf0   : > { %3214 = vst [vmem:[%s3764_s30 + $0x8] sm:$0xff] %v2902_v39   ;;  %v3057_v50 = vpack.c.bf16 %v1737_v40, %v1736_v38  ;;  %v1550_v51 = vadd.f32 %v3741_v7, %v1415_v41  ;;  %v1477_v52 = vmul.f32 %v3736_v5, %v1163_v48  ;;  %v1416_v53 = vmul.f32 %v3351_v49, %v3736_v5  ;;  %v3415_v54 = vpop.f32.mrb[6].mxu1  ;;  %v910_v55 = vpop.f32.mrb[7].mxu0 }
  0xf1   : > { %3246 = vst [vmem:[%s3764_s30 + $0x108] sm:$0xff] %v3062_v44   ;;  %2898 = vst [vmem:[%s3764_s30] sm:$0xff] %v2897_v45   ;;  %v1614_v56 = vadd.f32 %v3741_v7, %v1479_v46  ;;  %v1548_v57 = vadd.f32 %v3741_v7, %v1413_v47  ;;  %v1480_v58 = vmul.f32 %v3415_v54, %v3736_v5  ;;  %v1166_v60 = vpop.f32.mrb[7].mxu1 }
  0xf2   : > { %v1414_v59 = vmul.f32 %v3736_v5, %v910_v55  ;;  %3245 = vst [vmem:[%s3764_s30 + $0x100] sm:$0xff] %v3057_v50   ;;  %v1612_v61 = vadd.f32 %v3741_v7, %v1477_v52  ;;  %v1551_v62 = vadd.f32 %v3741_v7, %v1416_v53  ;;  %v1478_v63 = vmul.f32 %v3736_v5, %v1166_v60 }
  0xf3   : > { %v1615_v0 = vadd.f32 %v3741_v7, %v1480_v58  ;;  %v1678_v2 = vmax.f32 %v1550_v51, 0.0  ;;  %v1742_v6 = vmax.f32 %v1614_v56, 0.0  ;;  %v1676_v8 = vmax.f32 %v1548_v57, 0.0 }
  0xf4   : > { %v1549_v1 = vadd.f32 %v3741_v7, %v1414_v59  ;;  %v1679_v3 = vmax.f32 %v1551_v62, 0.0  ;;  %v1613_v4 = vadd.f32 %v3741_v7, %v1478_v63  ;;  %v1740_v12 = vmax.f32 %v1612_v61, 0.0 }
  0xf5   : > { %v1743_v9 = vmax.f32 %v1615_v0, 0.0  ;;  %v3354_v11 = vpop.f32.mrb[8].mxu0 }
  0xf6   : > { %v1677_v10 = vmax.f32 %v1549_v1, 0.0  ;;  %v2912_v13 = vpack.c.bf16 %v1679_v3, %v1678_v2  ;;  %v1741_v14 = vmax.f32 %v1613_v4, 0.0  ;;  %v1419_v15 = vmul.f32 %v3354_v11, %v3736_v5  ;;  %v3418_v16 = vpop.f32.mrb[8].mxu1  ;;  %v923_v17 = vpop.f32.mrb[9].mxu0 }
  0xf7   : > { %v3072_v18 = vpack.c.bf16 %v1743_v9, %v1742_v6  ;;  %v1483_v20 = vmul.f32 %v3418_v16, %v3736_v5  ;;  %v1417_v21 = vmul.f32 %v3736_v5, %v923_v17  ;;  %v1179_v22 = vpop.f32.mrb[9].mxu1  ;;  %v3355_v23 = vpop.f32.mrb[10].mxu0 }
  0xf8   : > { %v2907_v19 = vpack.c.bf16 %v1677_v10, %v1676_v8  ;;  %3216 = vst [vmem:[%s3764_s30 + $0x18] sm:$0xff] %v2912_v13   ;;  %v3067_v24 = vpack.c.bf16 %v1741_v14, %v1740_v12  ;;  %v1554_v25 = vadd.f32 %v3741_v7, %v1419_v15  ;;  %v1481_v26 = vmul.f32 %v3736_v5, %v1179_v22  ;;  %v3419_v28 = vpop.f32.mrb[10].mxu1  ;;  %v926_v29 = vpop.f32.mrb[11].mxu0 }
  0xf9   : > { %v1420_v27 = vmul.f32 %v3355_v23, %v3736_v5  ;;  %3248 = vst [vmem:[%s3764_s30 + $0x118] sm:$0xff] %v3072_v18   ;;  %v1618_v30 = vadd.f32 %v3741_v7, %v1483_v20  ;;  %v1552_v31 = vadd.f32 %v3741_v7, %v1417_v21  ;;  %v1484_v32 = vmul.f32 %v3419_v28, %v3736_v5  ;;  %v1182_v34 = vpop.f32.mrb[11].mxu1 }
  0xfa   : > { %3215 = vst [vmem:[%s3764_s30 + $0x10] sm:$0xff] %v2907_v19   ;;  %v1418_v33 = vmul.f32 %v3736_v5, %v926_v29  ;;  %3247 = vst [vmem:[%s3764_s30 + $0x110] sm:$0xff] %v3067_v24   ;;  %v1616_v35 = vadd.f32 %v3741_v7, %v1481_v26  ;;  %v1482_v37 = vmul.f32 %v3736_v5, %v1182_v34  ;;  %v1682_v40 = vmax.f32 %v1554_v25, 0.0 }
  0xfb   : > { %v1555_v36 = vadd.f32 %v3741_v7, %v1420_v27  ;;  %v1619_v38 = vadd.f32 %v3741_v7, %v1484_v32  ;;  %v1746_v43 = vmax.f32 %v1618_v30, 0.0  ;;  %v1680_v44 = vmax.f32 %v1552_v31, 0.0 }
  0xfc   : > { %v1553_v39 = vadd.f32 %v3741_v7, %v1418_v33  ;;  %v1617_v42 = vadd.f32 %v3741_v7, %v1482_v37  ;;  %v1744_v48 = vmax.f32 %v1616_v35, 0.0 }
  0xfd   : > { %v1683_v41 = vmax.f32 %v1555_v36, 0.0  ;;  %v1747_v45 = vmax.f32 %v1619_v38, 0.0  ;;  %v3358_v47 = vpop.f32.mrb[12].mxu0 }
  0xfe   : > { %v1681_v46 = vmax.f32 %v1553_v39, 0.0  ;;  %v1745_v50 = vmax.f32 %v1617_v42, 0.0  ;;  %v1423_v51 = vmul.f32 %v3358_v47, %v3736_v5  ;;  %v3422_v52 = vpop.f32.mrb[12].mxu1  ;;  %v939_v53 = vpop.f32.mrb[13].mxu0 }
  0xff   : > { %v2922_v49 = vpack.c.bf16 %v1683_v41, %v1682_v40  ;;  %v3082_v54 = vpack.c.bf16 %v1747_v45, %v1746_v43  ;;  %v1487_v56 = vmul.f32 %v3422_v52, %v3736_v5  ;;  %v1421_v57 = vmul.f32 %v3736_v5, %v939_v53  ;;  %v1195_v58 = vpop.f32.mrb[13].mxu1  ;;  %v3359_v59 = vpop.f32.mrb[14].mxu0 }
 0x100   : > { %v2917_v55 = vpack.c.bf16 %v1681_v46, %v1680_v44  ;;  %v3077_v60 = vpack.c.bf16 %v1745_v50, %v1744_v48  ;;  %v1558_v61 = vadd.f32 %v3741_v7, %v1423_v51  ;;  %v1485_v62 = vmul.f32 %v3736_v5, %v1195_v58  ;;  %v3423_v0 = vpop.f32.mrb[14].mxu1  ;;  %v942_v1 = vpop.f32.mrb[15].mxu0 }
 0x101   : > { %3218 = vst [vmem:[%s3764_s30 + $0x28] sm:$0xff] %v2922_v49   ;;  %v1424_v63 = vmul.f32 %v3359_v59, %v3736_v5  ;;  %3250 = vst [vmem:[%s3764_s30 + $0x128] sm:$0xff] %v3082_v54   ;;  %v1622_v2 = vadd.f32 %v3741_v7, %v1487_v56  ;;  %v1556_v3 = vadd.f32 %v3741_v7, %v1421_v57  ;;  %v1198_v8 = vpop.f32.mrb[15].mxu1 }
 0x102   : > { %3217 = vst [vmem:[%s3764_s30 + $0x20] sm:$0xff] %v2917_v55   ;;  %v1488_v4 = vmul.f32 %v3423_v0, %v3736_v5  ;;  %v1422_v6 = vmul.f32 %v3736_v5, %v942_v1  ;;  %3249 = vst [vmem:[%s3764_s30 + $0x120] sm:$0xff] %v3077_v60   ;;  %v1620_v9 = vadd.f32 %v3741_v7, %v1485_v62  ;;  %v1686_v14 = vmax.f32 %v1558_v61, 0.0 }
 0x103   : > { %v1559_v10 = vadd.f32 %v3741_v7, %v1424_v63  ;;  %v1486_v11 = vmul.f32 %v3736_v5, %v1198_v8  ;;  %v1750_v17 = vmax.f32 %v1622_v2, 0.0  ;;  %v1684_v18 = vmax.f32 %v1556_v3, 0.0 }
 0x104   : > { %v1623_v12 = vadd.f32 %v3741_v7, %v1488_v4  ;;  %v1557_v13 = vadd.f32 %v3741_v7, %v1422_v6  ;;  %v1748_v22 = vmax.f32 %v1620_v9, 0.0 }
 0x105   : > { %v1687_v15 = vmax.f32 %v1559_v10, 0.0  ;;  %v1621_v16 = vadd.f32 %v3741_v7, %v1486_v11  ;;  %v3362_v21 = vpop.f32.mrb[16].mxu0 }
 0x106   : > { %v1751_v19 = vmax.f32 %v1623_v12, 0.0  ;;  %v1685_v20 = vmax.f32 %v1557_v13, 0.0  ;;  %v1427_v25 = vmul.f32 %v3362_v21, %v3736_v5  ;;  %v3426_v26 = vpop.f32.mrb[16].mxu1  ;;  %v955_v27 = vpop.f32.mrb[17].mxu0 }
 0x107   : > { %v2932_v23 = vpack.c.bf16 %v1687_v15, %v1686_v14  ;;  %v1749_v24 = vmax.f32 %v1621_v16, 0.0  ;;  %v1491_v30 = vmul.f32 %v3426_v26, %v3736_v5  ;;  %v1425_v31 = vmul.f32 %v3736_v5, %v955_v27  ;;  %v1211_v32 = vpop.f32.mrb[17].mxu1  ;;  %v3363_v33 = vpop.f32.mrb[18].mxu0 }
 0x108   : > { %v3092_v28 = vpack.c.bf16 %v1751_v19, %v1750_v17  ;;  %v2927_v29 = vpack.c.bf16 %v1685_v20, %v1684_v18  ;;  %v1562_v35 = vadd.f32 %v3741_v7, %v1427_v25  ;;  %v1489_v36 = vmul.f32 %v3736_v5, %v1211_v32  ;;  %v3427_v38 = vpop.f32.mrb[18].mxu1  ;;  %v958_v39 = vpop.f32.mrb[19].mxu0 }
 0x109   : > { %3220 = vst [vmem:[%s3764_s30 + $0x38] sm:$0xff] %v2932_v23   ;;  %v3087_v34 = vpack.c.bf16 %v1749_v24, %v1748_v22  ;;  %v1428_v37 = vmul.f32 %v3363_v33, %v3736_v5  ;;  %v1626_v40 = vadd.f32 %v3741_v7, %v1491_v30  ;;  %v1560_v41 = vadd.f32 %v3741_v7, %v1425_v31  ;;  %v1214_v44 = vpop.f32.mrb[19].mxu1 }
 0x10a   : > { %3252 = vst [vmem:[%s3764_s30 + $0x138] sm:$0xff] %v3092_v28   ;;  %3219 = vst [vmem:[%s3764_s30 + $0x30] sm:$0xff] %v2927_v29   ;;  %v1492_v42 = vmul.f32 %v3427_v38, %v3736_v5  ;;  %v1426_v43 = vmul.f32 %v3736_v5, %v958_v39  ;;  %v1624_v45 = vadd.f32 %v3741_v7, %v1489_v36  ;;  %v1690_v50 = vmax.f32 %v1562_v35, 0.0 }
 0x10b   : > { %3251 = vst [vmem:[%s3764_s30 + $0x130] sm:$0xff] %v3087_v34   ;;  %v1563_v46 = vadd.f32 %v3741_v7, %v1428_v37  ;;  %v1490_v47 = vmul.f32 %v3736_v5, %v1214_v44  ;;  %v1754_v53 = vmax.f32 %v1626_v40, 0.0  ;;  %v1688_v54 = vmax.f32 %v1560_v41, 0.0 }
 0x10c   : > { %v1627_v48 = vadd.f32 %v3741_v7, %v1492_v42  ;;  %v1561_v49 = vadd.f32 %v3741_v7, %v1426_v43  ;;  %v1752_v58 = vmax.f32 %v1624_v45, 0.0 }
 0x10d   : > { %v1691_v51 = vmax.f32 %v1563_v46, 0.0  ;;  %v1625_v52 = vadd.f32 %v3741_v7, %v1490_v47  ;;  %v3366_v57 = vpop.f32.mrb[20].mxu0 }
 0x10e   : > { %v1755_v55 = vmax.f32 %v1627_v48, 0.0  ;;  %v1689_v56 = vmax.f32 %v1561_v49, 0.0  ;;  %v1431_v61 = vmul.f32 %v3366_v57, %v3736_v5  ;;  %v3430_v62 = vpop.f32.mrb[20].mxu1  ;;  %v971_v63 = vpop.f32.mrb[21].mxu0 }
 0x10f   : > { %v2942_v59 = vpack.c.bf16 %v1691_v51, %v1690_v50  ;;  %v1753_v60 = vmax.f32 %v1625_v52, 0.0  ;;  %v1495_v2 = vmul.f32 %v3430_v62, %v3736_v5  ;;  %v1429_v3 = vmul.f32 %v3736_v5, %v971_v63  ;;  %v1227_v4 = vpop.f32.mrb[21].mxu1  ;;  %v3367_v6 = vpop.f32.mrb[22].mxu0 }
 0x110   : > { %v3102_v0 = vpack.c.bf16 %v1755_v55, %v1754_v53  ;;  %v2937_v1 = vpack.c.bf16 %v1689_v56, %v1688_v54  ;;  %v1566_v9 = vadd.f32 %v3741_v7, %v1431_v61  ;;  %v1493_v10 = vmul.f32 %v3736_v5, %v1227_v4  ;;  %v3431_v12 = vpop.f32.mrb[22].mxu1  ;;  %v974_v13 = vpop.f32.mrb[23].mxu0 }
 0x111   : > { %3222 = vst [vmem:[%s3764_s30 + $0x48] sm:$0xff] %v2942_v59   ;;  %v3097_v8 = vpack.c.bf16 %v1753_v60, %v1752_v58  ;;  %v1432_v11 = vmul.f32 %v3367_v6, %v3736_v5  ;;  %v1630_v14 = vadd.f32 %v3741_v7, %v1495_v2  ;;  %v1564_v15 = vadd.f32 %v3741_v7, %v1429_v3  ;;  %v1230_v18 = vpop.f32.mrb[23].mxu1 }
 0x112   : > { %3254 = vst [vmem:[%s3764_s30 + $0x148] sm:$0xff] %v3102_v0   ;;  %3221 = vst [vmem:[%s3764_s30 + $0x40] sm:$0xff] %v2937_v1   ;;  %v1496_v16 = vmul.f32 %v3431_v12, %v3736_v5  ;;  %v1430_v17 = vmul.f32 %v3736_v5, %v974_v13  ;;  %v1628_v19 = vadd.f32 %v3741_v7, %v1493_v10  ;;  %v1694_v24 = vmax.f32 %v1566_v9, 0.0 }
 0x113   : > { %3253 = vst [vmem:[%s3764_s30 + $0x140] sm:$0xff] %v3097_v8   ;;  %v1567_v20 = vadd.f32 %v3741_v7, %v1432_v11  ;;  %v1494_v21 = vmul.f32 %v3736_v5, %v1230_v18  ;;  %v1758_v27 = vmax.f32 %v1630_v14, 0.0  ;;  %v1692_v28 = vmax.f32 %v1564_v15, 0.0 }
 0x114   : > { %v1631_v22 = vadd.f32 %v3741_v7, %v1496_v16  ;;  %v1565_v23 = vadd.f32 %v3741_v7, %v1430_v17  ;;  %v1756_v32 = vmax.f32 %v1628_v19, 0.0 }
 0x115   : > { %v1695_v25 = vmax.f32 %v1567_v20, 0.0  ;;  %v1629_v26 = vadd.f32 %v3741_v7, %v1494_v21  ;;  %v3370_v31 = vpop.f32.mrb[24].mxu0 }
 0x116   : > { %v1759_v29 = vmax.f32 %v1631_v22, 0.0  ;;  %v1693_v30 = vmax.f32 %v1565_v23, 0.0  ;;  %v1435_v35 = vmul.f32 %v3370_v31, %v3736_v5  ;;  %v3434_v36 = vpop.f32.mrb[24].mxu1  ;;  %v987_v37 = vpop.f32.mrb[25].mxu0 }
 0x117   : > { %v2952_v33 = vpack.c.bf16 %v1695_v25, %v1694_v24  ;;  %v1757_v34 = vmax.f32 %v1629_v26, 0.0  ;;  %v1499_v40 = vmul.f32 %v3434_v36, %v3736_v5  ;;  %v1433_v41 = vmul.f32 %v3736_v5, %v987_v37  ;;  %v1243_v42 = vpop.f32.mrb[25].mxu1  ;;  %v3371_v43 = vpop.f32.mrb[26].mxu0 }
 0x118   : > { %v3112_v38 = vpack.c.bf16 %v1759_v29, %v1758_v27  ;;  %v2947_v39 = vpack.c.bf16 %v1693_v30, %v1692_v28  ;;  %v1570_v45 = vadd.f32 %v3741_v7, %v1435_v35  ;;  %v1497_v46 = vmul.f32 %v3736_v5, %v1243_v42  ;;  %v3435_v48 = vpop.f32.mrb[26].mxu1  ;;  %v990_v49 = vpop.f32.mrb[27].mxu0 }
 0x119   : > { %3224 = vst [vmem:[%s3764_s30 + $0x58] sm:$0xff] %v2952_v33   ;;  %v3107_v44 = vpack.c.bf16 %v1757_v34, %v1756_v32  ;;  %v1436_v47 = vmul.f32 %v3371_v43, %v3736_v5  ;;  %v1634_v50 = vadd.f32 %v3741_v7, %v1499_v40  ;;  %v1568_v51 = vadd.f32 %v3741_v7, %v1433_v41  ;;  %v1246_v54 = vpop.f32.mrb[27].mxu1 }
 0x11a   : > { %3256 = vst [vmem:[%s3764_s30 + $0x158] sm:$0xff] %v3112_v38   ;;  %3223 = vst [vmem:[%s3764_s30 + $0x50] sm:$0xff] %v2947_v39   ;;  %v1500_v52 = vmul.f32 %v3435_v48, %v3736_v5  ;;  %v1434_v53 = vmul.f32 %v3736_v5, %v990_v49  ;;  %v1632_v55 = vadd.f32 %v3741_v7, %v1497_v46  ;;  %v1698_v60 = vmax.f32 %v1570_v45, 0.0 }
 0x11b   : > { %3255 = vst [vmem:[%s3764_s30 + $0x150] sm:$0xff] %v3107_v44   ;;  %v1571_v56 = vadd.f32 %v3741_v7, %v1436_v47  ;;  %v1498_v57 = vmul.f32 %v3736_v5, %v1246_v54  ;;  %v1762_v63 = vmax.f32 %v1634_v50, 0.0  ;;  %v1696_v0 = vmax.f32 %v1568_v51, 0.0 }
 0x11c   : > { %v1635_v58 = vadd.f32 %v3741_v7, %v1500_v52  ;;  %v1569_v59 = vadd.f32 %v3741_v7, %v1434_v53  ;;  %v1760_v4 = vmax.f32 %v1632_v55, 0.0 }
 0x11d   : > { %v1699_v61 = vmax.f32 %v1571_v56, 0.0  ;;  %v1633_v62 = vadd.f32 %v3741_v7, %v1498_v57  ;;  %v3374_v3 = vpop.f32.mrb[28].mxu0 }
 0x11e   : > { %v1763_v1 = vmax.f32 %v1635_v58, 0.0  ;;  %v1697_v2 = vmax.f32 %v1569_v59, 0.0  ;;  %v1439_v9 = vmul.f32 %v3374_v3, %v3736_v5  ;;  %v3438_v10 = vpop.f32.mrb[28].mxu1  ;;  %v1003_v11 = vpop.f32.mrb[29].mxu0 }
 0x11f   : > { %v2962_v6 = vpack.c.bf16 %v1699_v61, %v1698_v60  ;;  %v1761_v8 = vmax.f32 %v1633_v62, 0.0  ;;  %v1503_v14 = vmul.f32 %v3438_v10, %v3736_v5  ;;  %v1437_v15 = vmul.f32 %v3736_v5, %v1003_v11  ;;  %v1259_v16 = vpop.f32.mrb[29].mxu1  ;;  %v3375_v17 = vpop.f32.mrb[30].mxu0 }
 0x120   : > { %v3122_v12 = vpack.c.bf16 %v1763_v1, %v1762_v63  ;;  %v2957_v13 = vpack.c.bf16 %v1697_v2, %v1696_v0  ;;  %v1574_v19 = vadd.f32 %v3741_v7, %v1439_v9  ;;  %v1501_v20 = vmul.f32 %v3736_v5, %v1259_v16  ;;  %v3439_v22 = vpop.f32.mrb[30].mxu1  ;;  %v1006_v23 = vpop.f32.mrb[31].mxu0 }
 0x121   : > { %3226 = vst [vmem:[%s3764_s30 + $0x68] sm:$0xff] %v2962_v6   ;;  %v3117_v18 = vpack.c.bf16 %v1761_v8, %v1760_v4  ;;  %v1440_v21 = vmul.f32 %v3375_v17, %v3736_v5  ;;  %v1638_v24 = vadd.f32 %v3741_v7, %v1503_v14  ;;  %v1572_v25 = vadd.f32 %v3741_v7, %v1437_v15  ;;  %v1262_v28 = vpop.f32.mrb[31].mxu1 }
 0x122   : > { %3258 = vst [vmem:[%s3764_s30 + $0x168] sm:$0xff] %v3122_v12   ;;  %3225 = vst [vmem:[%s3764_s30 + $0x60] sm:$0xff] %v2957_v13   ;;  %v1504_v26 = vmul.f32 %v3439_v22, %v3736_v5  ;;  %v1438_v27 = vmul.f32 %v3736_v5, %v1006_v23  ;;  %v1636_v29 = vadd.f32 %v3741_v7, %v1501_v20  ;;  %v1702_v34 = vmax.f32 %v1574_v19, 0.0 }
 0x123   : > { %3257 = vst [vmem:[%s3764_s30 + $0x160] sm:$0xff] %v3117_v18   ;;  %v1575_v30 = vadd.f32 %v3741_v7, %v1440_v21  ;;  %v1502_v31 = vmul.f32 %v3736_v5, %v1262_v28  ;;  %v1766_v37 = vmax.f32 %v1638_v24, 0.0  ;;  %v1700_v38 = vmax.f32 %v1572_v25, 0.0 }
 0x124   : > { %v1639_v32 = vadd.f32 %v3741_v7, %v1504_v26  ;;  %v1573_v33 = vadd.f32 %v3741_v7, %v1438_v27  ;;  %v1764_v42 = vmax.f32 %v1636_v29, 0.0 }
 0x125   : > { %v1703_v35 = vmax.f32 %v1575_v30, 0.0  ;;  %v1637_v36 = vadd.f32 %v3741_v7, %v1502_v31  ;;  %v3378_v41 = vpop.f32.mrb[32].mxu0 }
 0x126   : > { %v1767_v39 = vmax.f32 %v1639_v32, 0.0  ;;  %v1701_v40 = vmax.f32 %v1573_v33, 0.0  ;;  %v1443_v45 = vmul.f32 %v3378_v41, %v3736_v5  ;;  %v3442_v46 = vpop.f32.mrb[32].mxu1  ;;  %v1019_v47 = vpop.f32.mrb[33].mxu0 }
 0x127   : > { %v2972_v43 = vpack.c.bf16 %v1703_v35, %v1702_v34  ;;  %v1765_v44 = vmax.f32 %v1637_v36, 0.0  ;;  %v1507_v50 = vmul.f32 %v3442_v46, %v3736_v5  ;;  %v1441_v51 = vmul.f32 %v3736_v5, %v1019_v47  ;;  %v1275_v52 = vpop.f32.mrb[33].mxu1  ;;  %v3379_v53 = vpop.f32.mrb[34].mxu0 }
 0x128   : > { %v3132_v48 = vpack.c.bf16 %v1767_v39, %v1766_v37  ;;  %v2967_v49 = vpack.c.bf16 %v1701_v40, %v1700_v38  ;;  %v1578_v55 = vadd.f32 %v3741_v7, %v1443_v45  ;;  %v1505_v56 = vmul.f32 %v3736_v5, %v1275_v52  ;;  %v3443_v58 = vpop.f32.mrb[34].mxu1  ;;  %v1022_v59 = vpop.f32.mrb[35].mxu0 }
 0x129   : > { %3228 = vst [vmem:[%s3764_s30 + $0x78] sm:$0xff] %v2972_v43   ;;  %v3127_v54 = vpack.c.bf16 %v1765_v44, %v1764_v42  ;;  %v1444_v57 = vmul.f32 %v3379_v53, %v3736_v5  ;;  %v1642_v60 = vadd.f32 %v3741_v7, %v1507_v50  ;;  %v1576_v61 = vadd.f32 %v3741_v7, %v1441_v51  ;;  %v1278_v0 = vpop.f32.mrb[35].mxu1 }
 0x12a   : > { %3260 = vst [vmem:[%s3764_s30 + $0x178] sm:$0xff] %v3132_v48   ;;  %3227 = vst [vmem:[%s3764_s30 + $0x70] sm:$0xff] %v2967_v49   ;;  %v1508_v62 = vmul.f32 %v3443_v58, %v3736_v5  ;;  %v1442_v63 = vmul.f32 %v3736_v5, %v1022_v59  ;;  %v1640_v1 = vadd.f32 %v3741_v7, %v1505_v56  ;;  %v1706_v8 = vmax.f32 %v1578_v55, 0.0 }
 0x12b   : > { %3259 = vst [vmem:[%s3764_s30 + $0x170] sm:$0xff] %v3127_v54   ;;  %v1579_v2 = vadd.f32 %v3741_v7, %v1444_v57  ;;  %v1506_v3 = vmul.f32 %v3736_v5, %v1278_v0  ;;  %v1770_v11 = vmax.f32 %v1642_v60, 0.0  ;;  %v1704_v12 = vmax.f32 %v1576_v61, 0.0 }
 0x12c   : > { %v1643_v4 = vadd.f32 %v3741_v7, %v1508_v62  ;;  %v1577_v6 = vadd.f32 %v3741_v7, %v1442_v63  ;;  %v1768_v16 = vmax.f32 %v1640_v1, 0.0 }
 0x12d   : > { %v1707_v9 = vmax.f32 %v1579_v2, 0.0  ;;  %v1641_v10 = vadd.f32 %v3741_v7, %v1506_v3  ;;  %v3382_v15 = vpop.f32.mrb[36].mxu0 }
 0x12e   : > { %v1771_v13 = vmax.f32 %v1643_v4, 0.0  ;;  %v1705_v14 = vmax.f32 %v1577_v6, 0.0  ;;  %v1447_v19 = vmul.f32 %v3382_v15, %v3736_v5  ;;  %v3446_v20 = vpop.f32.mrb[36].mxu1  ;;  %v1035_v21 = vpop.f32.mrb[37].mxu0 }
 0x12f   : > { %v2982_v17 = vpack.c.bf16 %v1707_v9, %v1706_v8  ;;  %v1769_v18 = vmax.f32 %v1641_v10, 0.0  ;;  %v1511_v24 = vmul.f32 %v3446_v20, %v3736_v5  ;;  %v1445_v25 = vmul.f32 %v3736_v5, %v1035_v21  ;;  %v1291_v26 = vpop.f32.mrb[37].mxu1  ;;  %v3383_v27 = vpop.f32.mrb[38].mxu0 }
 0x130   : > { %v3142_v22 = vpack.c.bf16 %v1771_v13, %v1770_v11  ;;  %v2977_v23 = vpack.c.bf16 %v1705_v14, %v1704_v12  ;;  %v1582_v29 = vadd.f32 %v3741_v7, %v1447_v19  ;;  %v1509_v30 = vmul.f32 %v3736_v5, %v1291_v26  ;;  %v3447_v32 = vpop.f32.mrb[38].mxu1  ;;  %v1038_v33 = vpop.f32.mrb[39].mxu0 }
 0x131   : > { %3230 = vst [vmem:[%s3764_s30 + $0x88] sm:$0xff] %v2982_v17   ;;  %v3137_v28 = vpack.c.bf16 %v1769_v18, %v1768_v16  ;;  %v1448_v31 = vmul.f32 %v3383_v27, %v3736_v5  ;;  %v1646_v34 = vadd.f32 %v3741_v7, %v1511_v24  ;;  %v1580_v35 = vadd.f32 %v3741_v7, %v1445_v25  ;;  %v1294_v38 = vpop.f32.mrb[39].mxu1 }
 0x132   : > { %3262 = vst [vmem:[%s3764_s30 + $0x188] sm:$0xff] %v3142_v22   ;;  %3229 = vst [vmem:[%s3764_s30 + $0x80] sm:$0xff] %v2977_v23   ;;  %v1512_v36 = vmul.f32 %v3447_v32, %v3736_v5  ;;  %v1446_v37 = vmul.f32 %v3736_v5, %v1038_v33  ;;  %v1644_v39 = vadd.f32 %v3741_v7, %v1509_v30  ;;  %v1710_v44 = vmax.f32 %v1582_v29, 0.0 }
 0x133   : > { %3261 = vst [vmem:[%s3764_s30 + $0x180] sm:$0xff] %v3137_v28   ;;  %v1583_v40 = vadd.f32 %v3741_v7, %v1448_v31  ;;  %v1510_v41 = vmul.f32 %v3736_v5, %v1294_v38  ;;  %v1774_v47 = vmax.f32 %v1646_v34, 0.0  ;;  %v1708_v48 = vmax.f32 %v1580_v35, 0.0 }
 0x134   : > { %v1647_v42 = vadd.f32 %v3741_v7, %v1512_v36  ;;  %v1581_v43 = vadd.f32 %v3741_v7, %v1446_v37  ;;  %v1772_v52 = vmax.f32 %v1644_v39, 0.0 }
 0x135   : > { %v1711_v45 = vmax.f32 %v1583_v40, 0.0  ;;  %v1645_v46 = vadd.f32 %v3741_v7, %v1510_v41  ;;  %v3386_v51 = vpop.f32.mrb[40].mxu0 }
 0x136   : > { %v1775_v49 = vmax.f32 %v1647_v42, 0.0  ;;  %v1709_v50 = vmax.f32 %v1581_v43, 0.0  ;;  %v1451_v55 = vmul.f32 %v3386_v51, %v3736_v5  ;;  %v3450_v56 = vpop.f32.mrb[40].mxu1  ;;  %v1051_v57 = vpop.f32.mrb[41].mxu0 }
 0x137   : > { %v2992_v53 = vpack.c.bf16 %v1711_v45, %v1710_v44  ;;  %v1773_v54 = vmax.f32 %v1645_v46, 0.0  ;;  %v1515_v60 = vmul.f32 %v3450_v56, %v3736_v5  ;;  %v1449_v61 = vmul.f32 %v3736_v5, %v1051_v57  ;;  %v1307_v62 = vpop.f32.mrb[41].mxu1  ;;  %v3387_v63 = vpop.f32.mrb[42].mxu0 }
 0x138   : > { %v3152_v58 = vpack.c.bf16 %v1775_v49, %v1774_v47  ;;  %v2987_v59 = vpack.c.bf16 %v1709_v50, %v1708_v48  ;;  %v1586_v1 = vadd.f32 %v3741_v7, %v1451_v55  ;;  %v1513_v2 = vmul.f32 %v3736_v5, %v1307_v62  ;;  %v3451_v4 = vpop.f32.mrb[42].mxu1  ;;  %v1054_v6 = vpop.f32.mrb[43].mxu0 }
 0x139   : > { %3232 = vst [vmem:[%s3764_s30 + $0x98] sm:$0xff] %v2992_v53   ;;  %v3147_v0 = vpack.c.bf16 %v1773_v54, %v1772_v52  ;;  %v1452_v3 = vmul.f32 %v3387_v63, %v3736_v5  ;;  %v1650_v8 = vadd.f32 %v3741_v7, %v1515_v60  ;;  %v1584_v9 = vadd.f32 %v3741_v7, %v1449_v61  ;;  %v1310_v12 = vpop.f32.mrb[43].mxu1 }
 0x13a   : > { %3264 = vst [vmem:[%s3764_s30 + $0x198] sm:$0xff] %v3152_v58   ;;  %3231 = vst [vmem:[%s3764_s30 + $0x90] sm:$0xff] %v2987_v59   ;;  %v1516_v10 = vmul.f32 %v3451_v4, %v3736_v5  ;;  %v1450_v11 = vmul.f32 %v3736_v5, %v1054_v6  ;;  %v1648_v13 = vadd.f32 %v3741_v7, %v1513_v2  ;;  %v1714_v18 = vmax.f32 %v1586_v1, 0.0 }
 0x13b   : > { %3263 = vst [vmem:[%s3764_s30 + $0x190] sm:$0xff] %v3147_v0   ;;  %v1587_v14 = vadd.f32 %v3741_v7, %v1452_v3  ;;  %v1514_v15 = vmul.f32 %v3736_v5, %v1310_v12  ;;  %v1778_v21 = vmax.f32 %v1650_v8, 0.0  ;;  %v1712_v22 = vmax.f32 %v1584_v9, 0.0 }
 0x13c   : > { %v1651_v16 = vadd.f32 %v3741_v7, %v1516_v10  ;;  %v1585_v17 = vadd.f32 %v3741_v7, %v1450_v11  ;;  %v1776_v26 = vmax.f32 %v1648_v13, 0.0 }
 0x13d   : > { %v1715_v19 = vmax.f32 %v1587_v14, 0.0  ;;  %v1649_v20 = vadd.f32 %v3741_v7, %v1514_v15  ;;  %v3390_v25 = vpop.f32.mrb[44].mxu0 }
 0x13e   : > { %v1779_v23 = vmax.f32 %v1651_v16, 0.0  ;;  %v1713_v24 = vmax.f32 %v1585_v17, 0.0  ;;  %v1455_v29 = vmul.f32 %v3390_v25, %v3736_v5  ;;  %v3454_v30 = vpop.f32.mrb[44].mxu1  ;;  %v1067_v31 = vpop.f32.mrb[45].mxu0 }
 0x13f   : > { %v3002_v27 = vpack.c.bf16 %v1715_v19, %v1714_v18  ;;  %v1777_v28 = vmax.f32 %v1649_v20, 0.0  ;;  %v1519_v34 = vmul.f32 %v3454_v30, %v3736_v5  ;;  %v1453_v35 = vmul.f32 %v3736_v5, %v1067_v31  ;;  %v1323_v36 = vpop.f32.mrb[45].mxu1  ;;  %v3391_v37 = vpop.f32.mrb[46].mxu0 }
 0x140   : > { %v3162_v32 = vpack.c.bf16 %v1779_v23, %v1778_v21  ;;  %v2997_v33 = vpack.c.bf16 %v1713_v24, %v1712_v22  ;;  %v1590_v39 = vadd.f32 %v3741_v7, %v1455_v29  ;;  %v1517_v40 = vmul.f32 %v3736_v5, %v1323_v36  ;;  %v3455_v42 = vpop.f32.mrb[46].mxu1  ;;  %v1070_v43 = vpop.f32.mrb[47].mxu0 }
 0x141   : > { %3234 = vst [vmem:[%s3764_s30 + $0xa8] sm:$0xff] %v3002_v27   ;;  %v3157_v38 = vpack.c.bf16 %v1777_v28, %v1776_v26  ;;  %v1456_v41 = vmul.f32 %v3391_v37, %v3736_v5  ;;  %v1654_v44 = vadd.f32 %v3741_v7, %v1519_v34  ;;  %v1588_v45 = vadd.f32 %v3741_v7, %v1453_v35  ;;  %v1326_v48 = vpop.f32.mrb[47].mxu1 }
 0x142   : > { %3266 = vst [vmem:[%s3764_s30 + $0x1a8] sm:$0xff] %v3162_v32   ;;  %3233 = vst [vmem:[%s3764_s30 + $0xa0] sm:$0xff] %v2997_v33   ;;  %v1520_v46 = vmul.f32 %v3455_v42, %v3736_v5  ;;  %v1454_v47 = vmul.f32 %v3736_v5, %v1070_v43  ;;  %v1652_v49 = vadd.f32 %v3741_v7, %v1517_v40  ;;  %v1718_v54 = vmax.f32 %v1590_v39, 0.0 }
 0x143   : > { %3265 = vst [vmem:[%s3764_s30 + $0x1a0] sm:$0xff] %v3157_v38   ;;  %v1591_v50 = vadd.f32 %v3741_v7, %v1456_v41  ;;  %v1518_v51 = vmul.f32 %v3736_v5, %v1326_v48  ;;  %v1782_v57 = vmax.f32 %v1654_v44, 0.0  ;;  %v1716_v58 = vmax.f32 %v1588_v45, 0.0  ;;  %v4018_v48 = vld [vmem:[%s4086_s3] ss:$0 sm:$0xff] }
 0x144   : > { %v1655_v52 = vadd.f32 %v3741_v7, %v1520_v46  ;;  %v1589_v53 = vadd.f32 %v3741_v7, %v1454_v47  ;;  %v1780_v62 = vmax.f32 %v1652_v49, 0.0 }
 0x145   : > { %v1719_v55 = vmax.f32 %v1591_v50, 0.0  ;;  %v1653_v56 = vadd.f32 %v3741_v7, %v1518_v51  ;;  %v3394_v61 = vpop.f32.mrb[48].mxu0 }
 0x146   : > { %v1783_v59 = vmax.f32 %v1655_v52, 0.0  ;;  %v1717_v60 = vmax.f32 %v1589_v53, 0.0  ;;  %v1459_v1 = vmul.f32 %v3394_v61, %v3736_v5  ;;  %v3458_v2 = vpop.f32.mrb[48].mxu1  ;;  %v1083_v3 = vpop.f32.mrb[49].mxu0 }
 0x147   : > { %v3012_v63 = vpack.c.bf16 %v1719_v55, %v1718_v54  ;;  %v1781_v0 = vmax.f32 %v1653_v56, 0.0  ;;  %v1523_v8 = vmul.f32 %v3458_v2, %v3736_v5  ;;  %v1457_v9 = vmul.f32 %v3736_v5, %v1083_v3  ;;  %v1339_v10 = vpop.f32.mrb[49].mxu1  ;;  %v3395_v11 = vpop.f32.mrb[50].mxu0 }
 0x148   : > { %v3172_v4 = vpack.c.bf16 %v1783_v59, %v1782_v57  ;;  %v3007_v6 = vpack.c.bf16 %v1717_v60, %v1716_v58  ;;  %v1594_v13 = vadd.f32 %v3741_v7, %v1459_v1  ;;  %v1521_v14 = vmul.f32 %v3736_v5, %v1339_v10  ;;  %v3459_v16 = vpop.f32.mrb[50].mxu1  ;;  %v1086_v17 = vpop.f32.mrb[51].mxu0 }
 0x149   : > { %3236 = vst [vmem:[%s3764_s30 + $0xb8] sm:$0xff] %v3012_v63   ;;  %v3167_v12 = vpack.c.bf16 %v1781_v0, %v1780_v62  ;;  %v1460_v15 = vmul.f32 %v3395_v11, %v3736_v5  ;;  %v1658_v18 = vadd.f32 %v3741_v7, %v1523_v8  ;;  %v1592_v19 = vadd.f32 %v3741_v7, %v1457_v9  ;;  %v1342_v22 = vpop.f32.mrb[51].mxu1 }
 0x14a   : > { %3268 = vst [vmem:[%s3764_s30 + $0x1b8] sm:$0xff] %v3172_v4   ;;  %3235 = vst [vmem:[%s3764_s30 + $0xb0] sm:$0xff] %v3007_v6   ;;  %v1524_v20 = vmul.f32 %v3459_v16, %v3736_v5  ;;  %v1458_v21 = vmul.f32 %v3736_v5, %v1086_v17  ;;  %v1656_v23 = vadd.f32 %v3741_v7, %v1521_v14  ;;  %v1722_v28 = vmax.f32 %v1594_v13, 0.0 }
 0x14b   : > { %3267 = vst [vmem:[%s3764_s30 + $0x1b0] sm:$0xff] %v3167_v12   ;;  %v1595_v24 = vadd.f32 %v3741_v7, %v1460_v15  ;;  %v1522_v25 = vmul.f32 %v3736_v5, %v1342_v22  ;;  %v1786_v31 = vmax.f32 %v1658_v18, 0.0  ;;  %v1720_v32 = vmax.f32 %v1592_v19, 0.0  ;;  %v4009_v5 = vld [vmem:[%s4085_s2] ss:$0 sm:$0xff] }
 0x14c   : > { %v1659_v26 = vadd.f32 %v3741_v7, %v1524_v20  ;;  %v1593_v27 = vadd.f32 %v3741_v7, %v1458_v21  ;;  %v1784_v36 = vmax.f32 %v1656_v23, 0.0 }
 0x14d   : > { %v1723_v29 = vmax.f32 %v1595_v24, 0.0  ;;  %v1657_v30 = vadd.f32 %v3741_v7, %v1522_v25  ;;  %v3398_v35 = vpop.f32.mrb[52].mxu0 }
 0x14e   : > { %v1787_v33 = vmax.f32 %v1659_v26, 0.0  ;;  %v1721_v34 = vmax.f32 %v1593_v27, 0.0  ;;  %v1463_v39 = vmul.f32 %v4009_v5, %v3398_v35  ;;  %v3462_v40 = vpop.f32.mrb[52].mxu1  ;;  %v1099_v41 = vpop.f32.mrb[53].mxu0 }
 0x14f   : > { %v3022_v37 = vpack.c.bf16 %v1723_v29, %v1722_v28  ;;  %v1785_v38 = vmax.f32 %v1657_v30, 0.0  ;;  %v1527_v43 = vmul.f32 %v4009_v5, %v3462_v40  ;;  %v1461_v44 = vmul.f32 %v4009_v5, %v1099_v41  ;;  %v1355_v45 = vpop.f32.mrb[53].mxu1  ;;  %v3399_v46 = vpop.f32.mrb[54].mxu0 }
 0x150   : > { %v3182_v7 = vpack.c.bf16 %v1787_v33, %v1786_v31  ;;  %v3017_v42 = vpack.c.bf16 %v1721_v34, %v1720_v32  ;;  %v1598_v49 = vadd.f32 %v4018_v48, %v1463_v39  ;;  %v1525_v50 = vmul.f32 %v4009_v5, %v1355_v45  ;;  %v3463_v52 = vpop.f32.mrb[54].mxu1  ;;  %v1102_v53 = vpop.f32.mrb[55].mxu0 }
 0x151   : > { %3238 = vst [vmem:[%s3764_s30 + $0xc8] sm:$0xff] %v3022_v37   ;;  %v3177_v47 = vpack.c.bf16 %v1785_v38, %v1784_v36  ;;  %v1464_v51 = vmul.f32 %v4009_v5, %v3399_v46  ;;  %v1662_v54 = vadd.f32 %v4018_v48, %v1527_v43  ;;  %v1596_v55 = vadd.f32 %v4018_v48, %v1461_v44  ;;  %v1358_v58 = vpop.f32.mrb[55].mxu1 }
 0x152   : > { %3270 = vst [vmem:[%s3764_s30 + $0x1c8] sm:$0xff] %v3182_v7   ;;  %3237 = vst [vmem:[%s3764_s30 + $0xc0] sm:$0xff] %v3017_v42   ;;  %v1528_v56 = vmul.f32 %v4009_v5, %v3463_v52  ;;  %v1462_v57 = vmul.f32 %v4009_v5, %v1102_v53  ;;  %v1660_v59 = vadd.f32 %v4018_v48, %v1525_v50  ;;  %v1726_v0 = vmax.f32 %v1598_v49, 0.0 }
 0x153   : > { %3269 = vst [vmem:[%s3764_s30 + $0x1c0] sm:$0xff] %v3177_v47   ;;  %v1599_v60 = vadd.f32 %v4018_v48, %v1464_v51  ;;  %v1526_v61 = vmul.f32 %v4009_v5, %v1358_v58  ;;  %v1790_v3 = vmax.f32 %v1662_v54, 0.0  ;;  %v1724_v4 = vmax.f32 %v1596_v55, 0.0 }
 0x154   : > { %v1663_v62 = vadd.f32 %v4018_v48, %v1528_v56  ;;  %v1597_v63 = vadd.f32 %v4018_v48, %v1462_v57  ;;  %v1788_v10 = vmax.f32 %v1660_v59, 0.0 }
 0x155   : > { %v1727_v1 = vmax.f32 %v1599_v60, 0.0  ;;  %v1661_v2 = vadd.f32 %v4018_v48, %v1526_v61  ;;  %v3402_v9 = vpop.f32.mrb[56].mxu0 }
 0x156   : > { %v1791_v6 = vmax.f32 %v1663_v62, 0.0  ;;  %v1725_v8 = vmax.f32 %v1597_v63, 0.0  ;;  %v1467_v13 = vmul.f32 %v4009_v5, %v3402_v9  ;;  %v3466_v14 = vpop.f32.mrb[56].mxu1  ;;  %v1115_v15 = vpop.f32.mrb[57].mxu0 }
 0x157   : > { %v3032_v11 = vpack.c.bf16 %v1727_v1, %v1726_v0  ;;  %v1789_v12 = vmax.f32 %v1661_v2, 0.0  ;;  %v1531_v18 = vmul.f32 %v4009_v5, %v3466_v14  ;;  %v1465_v19 = vmul.f32 %v4009_v5, %v1115_v15  ;;  %v1371_v20 = vpop.f32.mrb[57].mxu1  ;;  %v3403_v21 = vpop.f32.mrb[58].mxu0 }
 0x158   : > { %v3192_v16 = vpack.c.bf16 %v1791_v6, %v1790_v3  ;;  %v3027_v17 = vpack.c.bf16 %v1725_v8, %v1724_v4  ;;  %v1602_v23 = vadd.f32 %v4018_v48, %v1467_v13  ;;  %v1529_v24 = vmul.f32 %v4009_v5, %v1371_v20  ;;  %v3467_v26 = vpop.f32.mrb[58].mxu1  ;;  %v1118_v27 = vpop.f32.mrb[59].mxu0 }
 0x159   : > { %3240 = vst [vmem:[%s3764_s30 + $0xd8] sm:$0xff] %v3032_v11   ;;  %v3187_v22 = vpack.c.bf16 %v1789_v12, %v1788_v10  ;;  %v1468_v25 = vmul.f32 %v4009_v5, %v3403_v21  ;;  %v1666_v28 = vadd.f32 %v4018_v48, %v1531_v18  ;;  %v1600_v29 = vadd.f32 %v4018_v48, %v1465_v19  ;;  %v1374_v32 = vpop.f32.mrb[59].mxu1 }
 0x15a   : > { %3272 = vst [vmem:[%s3764_s30 + $0x1d8] sm:$0xff] %v3192_v16   ;;  %3239 = vst [vmem:[%s3764_s30 + $0xd0] sm:$0xff] %v3027_v17   ;;  %v1532_v30 = vmul.f32 %v4009_v5, %v3467_v26  ;;  %v1466_v31 = vmul.f32 %v4009_v5, %v1118_v27  ;;  %v1664_v33 = vadd.f32 %v4018_v48, %v1529_v24  ;;  %v1730_v38 = vmax.f32 %v1602_v23, 0.0 }
 0x15b   : > { %3271 = vst [vmem:[%s3764_s30 + $0x1d0] sm:$0xff] %v3187_v22   ;;  %v1603_v34 = vadd.f32 %v4018_v48, %v1468_v25  ;;  %v1530_v35 = vmul.f32 %v4009_v5, %v1374_v32  ;;  %v1794_v41 = vmax.f32 %v1666_v28, 0.0  ;;  %v1728_v7 = vmax.f32 %v1600_v29, 0.0 }
 0x15c   : > { %v1667_v36 = vadd.f32 %v4018_v48, %v1532_v30  ;;  %v1601_v37 = vadd.f32 %v4018_v48, %v1466_v31  ;;  %v1792_v45 = vmax.f32 %v1664_v33, 0.0 }
 0x15d   : > { %v1731_v39 = vmax.f32 %v1603_v34, 0.0  ;;  %v1665_v40 = vadd.f32 %v4018_v48, %v1530_v35  ;;  %v3406_v44 = vpop.f32.mrb[60].mxu0 }
 0x15e   : > { %v1795_v42 = vmax.f32 %v1667_v36, 0.0  ;;  %v1729_v43 = vmax.f32 %v1601_v37, 0.0  ;;  %v1471_v49 = vmul.f32 %v4009_v5, %v3406_v44  ;;  %v3470_v50 = vpop.f32.mrb[60].mxu1  ;;  %v1131_v51 = vpop.f32.mrb[61].mxu0 }
 0x15f   : > { %v3042_v46 = vpack.c.bf16 %v1731_v39, %v1730_v38  ;;  %v1793_v47 = vmax.f32 %v1665_v40, 0.0  ;;  %v1535_v54 = vmul.f32 %v4009_v5, %v3470_v50  ;;  %v1469_v55 = vmul.f32 %v4009_v5, %v1131_v51  ;;  %v1387_v56 = vpop.f32.mrb[61].mxu1  ;;  %v3407_v57 = vpop.f32.mrb[62].mxu0 }
 0x160   : > { %v3202_v52 = vpack.c.bf16 %v1795_v42, %v1794_v41  ;;  %v3037_v53 = vpack.c.bf16 %v1729_v43, %v1728_v7  ;;  %v1606_v59 = vadd.f32 %v4018_v48, %v1471_v49  ;;  %v1533_v60 = vmul.f32 %v4009_v5, %v1387_v56  ;;  %v3471_v62 = vpop.f32.mrb[62].mxu1  ;;  %v1134_v63 = vpop.f32.mrb[63].mxu0 }
 0x161   : > { %3242 = vst [vmem:[%s3764_s30 + $0xe8] sm:$0xff] %v3042_v46   ;;  %v3197_v58 = vpack.c.bf16 %v1793_v47, %v1792_v45  ;;  %v1472_v61 = vmul.f32 %v4009_v5, %v3407_v57  ;;  %v1670_v0 = vadd.f32 %v4018_v48, %v1535_v54  ;;  %v1604_v1 = vadd.f32 %v4018_v48, %v1469_v55  ;;  %v1390_v4 = vpop.f32.mrb[63].mxu1 }
 0x162   : > { %3274 = vst [vmem:[%s3764_s30 + $0x1e8] sm:$0xff] %v3202_v52   ;;  %3241 = vst [vmem:[%s3764_s30 + $0xe0] sm:$0xff] %v3037_v53   ;;  %v1536_v2 = vmul.f32 %v4009_v5, %v3471_v62  ;;  %v1470_v3 = vmul.f32 %v4009_v5, %v1134_v63  ;;  %v1668_v6 = vadd.f32 %v4018_v48, %v1533_v60  ;;  %v1734_v12 = vmax.f32 %v1606_v59, 0.0 }
 0x163   : > { %3273 = vst [vmem:[%s3764_s30 + $0x1e0] sm:$0xff] %v3197_v58   ;;  %v1607_v8 = vadd.f32 %v4018_v48, %v1472_v61  ;;  %v1534_v9 = vmul.f32 %v4009_v5, %v1390_v4  ;;  %v1798_v15 = vmax.f32 %v1670_v0, 0.0  ;;  %v1732_v16 = vmax.f32 %v1604_v1, 0.0 }
 0x164   : > { %v1671_v10 = vadd.f32 %v4018_v48, %v1536_v2  ;;  %v1605_v11 = vadd.f32 %v4018_v48, %v1470_v3  ;;  %v1796_v19 = vmax.f32 %v1668_v6, 0.0 }
 0x165   : > { %v1735_v13 = vmax.f32 %v1607_v8, 0.0  ;;  %v1669_v14 = vadd.f32 %v4018_v48, %v1534_v9 }
 0x166   : > { %v1799_v17 = vmax.f32 %v1671_v10, 0.0  ;;  %v1733_v18 = vmax.f32 %v1605_v11, 0.0 }
 0x167   : > { %v3052_v20 = vpack.c.bf16 %v1735_v13, %v1734_v12  ;;  %v1797_v21 = vmax.f32 %v1669_v14, 0.0 }
 0x168   : > { %v3212_v22 = vpack.c.bf16 %v1799_v17, %v1798_v15  ;;  %v3047_v5 = vpack.c.bf16 %v1733_v18, %v1732_v16 }
 0x169   : > { %3244 = vst [vmem:[%s3764_s30 + $0xf8] sm:$0xff] %v3052_v20   ;;  %v3207_v23 = vpack.c.bf16 %v1797_v21, %v1796_v19 }
 0x16a   : > { %3276 = vst [vmem:[%s3764_s30 + $0x1f8] sm:$0xff] %v3212_v22   ;;  %3243 = vst [vmem:[%s3764_s30 + $0xf0] sm:$0xff] %v3047_v5  }
 0x16b   : > { %3275 = vst [vmem:[%s3764_s30 + $0x1f0] sm:$0xff] %v3207_v23  }
 0x16c PF: > { %s14_s15 = sadd.s32 1, %s3556_s15  }
 0x16d   : > { %p11_p4 = scmp.ge.s32.totalorder %s14_s15, 6  }
 0x16f   :  { %13 = sbr.rel (!%p11_p4) target bundleno = 1 (0x1), region = 66 }

// kernel: crnn_forward.10
= control target key start
LH: loop header
LB: loop body
LE: loop exit
PB: predicated region body
PF: predicated region fallthrough
CT: control target
= control target key end

     0   :  { %s2298_s15 = smov 0   ;;  %s2643_s0 = inlined_call_operand.vmem [shape: bf16[2,18,34,128], index: 0, kind: input, shape index: {}]   ;;  %s2644_s1 = inlined_call_operand.vmem [shape: bf16[9,128,128], index: 1, kind: input, shape index: {}]   ;;  %s2645_s2 = inlined_call_operand.vmem [shape: f32[1,128], index: 2, kind: input, shape index: {}]   ;;  %s2646_s3 = inlined_call_operand.vmem [shape: f32[1,128], index: 3, kind: input, shape index: {}]   ;;  %s2647_s4 = inlined_call_operand.vmem [shape: bf16[2,16,32,128], index: 4, kind: output, shape index: {}]  }
   0x1 LB: > { %s1577_s16 = sadd.s32 4294967295, %s2267_s15   ;;  %p1581_p0 = scmp.ge.s32.totalorder %s2267_s15, 1  ;;  %s2267_s15 = sphi %s2298_s15, %s14_s15  }
   0x2   : > { %p162_p1 = scmp.lt.s32.totalorder %s2267_s15, 3 }
   0x4   : > { %p163_p2 = pnand %p1581_p0, %p162_p1 }
   0x5   : > { %p188_p3 = scmp.lt.s32.totalorder (!%p163_p2), %s1577_s16, 1  ;;  %v2309_v0 = vld [vmem:[%s2645_s2] ss:$0 sm:$0xff] (!%p163_p2)  ;;  %s2326_s29 = smov (!%p163_p2), 0  }
   0x6   : > { %166 = sbr.rel (%p163_p2) target bundleno = 405 (0x195), region = 36  ;;  %v2314_v1 = vld [vmem:[%s2646_s3] ss:$0 sm:$0xff] (!%p163_p2) }
   0xd   : > { %s2649_s16 = smov (!%p188_p3, %s1577_s16), 1 }
   0xe   : > { %s2152_s21 = smul.u32 360, %s2649_s16  ;;  %s1832_s22 = sshll.u32 %s2649_s16, 8 }
   0xf   : > { %s2319_s25 = scalar_lea.vmem %s2647_s4, %s1832_s22 }
  0x10   : > { %s2324_s28 = scalar_lea.vmem %s2643_s0, %s2152_s21 }
  0x11 LB: >> { %v2169_v2 = vld [vmem:[%s2644_s1 + $0x40] sm:$0xff]   ;;  %v2171_v4 = vld [vmem:[%s2644_s1 + $0x48] sm:$0xff]   ;;  %v2173_v6 = vld [vmem:[%s2644_s1 + $0x50] sm:$0xff]   ;;  %s1833_s21 = smul.u32 20, %s2271_s29  ;;  %vm261_vm0 = vsmask.f32 7424  ;;  %s2271_s29 = sphi %s2326_s29, %s206_s29  }
  0x12   : >> { %v2170_v3 = vld [vmem:[%s2644_s1 + $0x100] sm:$0xff]   ;;  %1940 = vmatprep.subr.bf16.mxu1 %v2169_v2  ;;  %v2172_v5 = vld [vmem:[%s2644_s1 + $0x108] sm:$0xff]   ;;  %v2174_v7 = vld [vmem:[%s2644_s1 + $0x110] sm:$0xff]   ;;  %vm501_vm1 = vcmask 1046528   ;;  %s1838_s23 = sshll.u32 %s2271_s29, 4  ;;  %s206_s29 = sadd.s32 1, %s2271_s29  }
  0x13   : >> { %2020 = vmatprep.subr.bf16.mxu0 %v2170_v3  ;;  %1941 = vmatpush3.bf16.msra.mxu1 %v2169_v2  ;;  %v2175_v8 = vld [vmem:[%s2644_s1 + $0x58] sm:$0xff]   ;;  %v2177_v10 = vld [vmem:[%s2644_s1 + $0x60] sm:$0xff]   ;;  %s2363_s27 = scalar_lea.vmem %s2324_s28, %s1833_s21  ;;  %v2179_v12 = vld [vmem:[%s2644_s1 + $0x68] sm:$0xff]   ;;  %s1502_s24 = scalar_lea.vmem %s2319_s25, %s1838_s23 }
  0x14   : >> { %2021 = vmatpush3.bf16.msra.mxu0 %v2170_v3  ;;  %1942 = vmatprep.subr.bf16.mxu1 %v2171_v4  ;;  %v2176_v9 = vld [vmem:[%s2644_s1 + $0x118] sm:$0xff]   ;;  %v2178_v11 = vld [vmem:[%s2644_s1 + $0x120] sm:$0xff]   ;;  %v2180_v15 = vld [vmem:[%s2644_s1 + $0x128] sm:$0xff]   ;;  %p203_p4 = scmp.ge.s32.totalorder %s206_s29, 16  }
  0x15   : >> { %2022 = vmatprep.subr.bf16.mxu0 %v2172_v5  ;;  %v210_v13 = vld [vmem:[%s2363_s27] sm:$0xf]  ;;  %v2370_v14 = vld [vmem:[%s2363_s27 + $0x4] sm:$0xf]  ;;  %v2379_v17 = vld [vmem:[%s2363_s27 + $0x8] sm:$0xff]  }
  0x16   : >> { %v2376_v16 = vcombine.low %v210_v13, %v2370_v14  ;;  %v2181_v18 = vld [vmem:[%s2644_s1 + $0x70] sm:$0xff]   ;;  %v270_v22 = vshll.u32 %v2379_v17, 16  ;;  %v2389_v23 = vld [vmem:[%s2363_s27 + $0x18] sm:$0xf]  ;;  %v2392_v24 = vld [vmem:[%s2363_s27 + $0x1c] sm:$0xff]   ;;  %v274_v33 = vshrl.u32 %v2379_v17, 16 }
  0x17   : >> { %1943 = vmatpush3.bf16.msra.mxu1 %v2171_v4  ;;  %v1676_v19 = vld [vmem:[%s2363_s27 + $0x14] sm:$0xf]  ;;  %v791_v29 = vshll.u32 %v2392_v24, 16  ;;  %v2183_v30 = vld [vmem:[%s2644_s1 + $0x78] sm:$0xff]   ;;  %v795_v34 = vshrl.u32 %v2392_v24, 16  ;;  %v2187_v47 = vld [vmem:[%s2644_s1] sm:$0xff]  }
  0x18   : >> { %2023 = vmatpush3.bf16.msra.mxu0 %v2172_v5  ;;  %1944 = vmatprep.subr.bf16.mxu1 %v2173_v6  ;;  %v263_v20 = vshrl.u32 %v2376_v16, 16  ;;  %v265_v21 = vshll.u32 %v2376_v16, 16  ;;  %v1697_v25 = vcombine.low %v1676_v19, %v2389_v23  ;;  %v2182_v26 = vld [vmem:[%s2644_s1 + $0x130] sm:$0xff]   ;;  %v272_v28 = vrot.slane %v270_v22, 1  ;;  %v2184_v40 = vld [vmem:[%s2644_s1 + $0x138] sm:$0xff]   ;;  %v2190_v51 = vld [vmem:[%s2644_s1 + $0x140] sm:$0xff]  }
  0x19   : >> { %2024 = vmatprep.subr.bf16.mxu0 %v2174_v7  ;;  %v793_v36 = vrot.slane %v791_v29, 1  ;;  %v2405_v37 = vld [vmem:[%s2363_s27 + $0x10] ss:$0 sps:$4 sm:$0x11]   ;;  %v2193_v54 = vld [vmem:[%s2644_s1 + $0x8] sm:$0xff]   ;;  %v2197_v59 = vld [vmem:[%s2644_s1 + $0x18] sm:$0xff]  }
  0x1a   : >> { %v267_v27 = vrot.slane %v265_v21, 1  ;;  %v784_v31 = vshrl.u32 %v1697_v25, 16  ;;  %v786_v32 = vshll.u32 %v1697_v25, 16  ;;  %v2408_v39 = vld [vmem:[%s2363_s27 + $0x24] ss:$0 sps:$4 sm:$0x11]   ;;  %v276_v45 = vor.u32 %v274_v33, %v272_v28 }
  0x1b   : >> { %1945 = vmatpush3.bf16.msra.mxu1 %v2173_v6  ;;  %v278_v42 = vshll.u32 %v2405_v37, 16  ;;  %v799_v44 = vshll.u32 %v2408_v39, 16  ;;  %v797_v49 = vor.u32 %v795_v34, %v793_v36  ;;  %v2194_v55 = vld [vmem:[%s2644_s1 + $0x148] sm:$0xff]   ;;  %v2195_v56 = vld [vmem:[%s2644_s1 + $0x10] sm:$0xff]   ;;  %v928_v61 = vrot.slane %v2392_v24, 1  ;;  %v2198_v62 = vld [vmem:[%s2644_s1 + $0x158] sm:$0xff]  }
  0x1c   : >> { %2025 = vmatpush3.bf16.msra.mxu0 %v2174_v7  ;;  %1946 = vmatprep.subr.bf16.mxu1 %v2175_v8  ;;  %v268_v35 = vor.u32 %v267_v27, %v263_v20  ;;  %v788_v38 = vrot.slane %v786_v32, 1  ;;  %v2196_v57 = vld [vmem:[%s2644_s1 + $0x150] sm:$0xff]   ;;  %v2199_v2 = vld [vmem:[%s2644_s1 + $0x20] sm:$0xff]   ;;  %v2201_v5 = vld [vmem:[%s2644_s1 + $0x28] sm:$0xff]   ;;  %v503_v19 = vrot.slane %v2379_v17, 1 }
  0x1d   : >> { %2026 = vmatprep.subr.bf16.mxu0 %v2176_v9  ;;  %v280_v46 = vrot.slane %v278_v42, 1  ;;  %v801_v50 = vrot.slane %v799_v44, 1  ;;  %v1708_v58 = vld [vmem:[%s2363_s27 + $0x14] sm:$0xe]  ;;  %v2200_v4 = vld [vmem:[%s2644_s1 + $0x160] sm:$0xff]   ;;  %v2202_v6 = vld [vmem:[%s2644_s1 + $0x168] sm:$0xff]  }
  0x1e   : >> { %v273_v41 = vsel %vm261_vm0, %v268_v35, %v272_v28  ;;  %v789_v43 = vor.u32 %v788_v38, %v784_v31  ;;  %v1725_v60 = vcombine.low %v1708_v58, %v2389_v23  ;;  %v2203_v7 = vld [vmem:[%s2644_s1 + $0x30] sm:$0xff]   ;;  %v2207_v13 = vld [vmem:[%s2644_s1 + $0x80] sm:$0xff]   ;;  %v2210_v20 = vld [vmem:[%s2644_s1 + $0x88] sm:$0xff]   ;;  %v505_v42 = vrot.slane %v2405_v37, 1 }
  0x1f   : >> { %1947 = vmatpush3.bf16.msra.mxu1 %v2175_v8  ;;  %1956 = vmatprep.mubr.bf16.mxu1 %v273_v41  ;;  %v281_v52 = vsel %vm261_vm0, %v276_v45, %v280_v46  ;;  %v802_v53 = vsel %vm261_vm0, %v797_v49, %v801_v50  ;;  %v2204_v8 = vld [vmem:[%s2644_s1 + $0x170] sm:$0xff]   ;;  %v2211_v21 = vld [vmem:[%s2644_s1 + $0x188] sm:$0xff]   ;;  %v2215_v27 = vld [vmem:[%s2644_s1 + $0x198] sm:$0xff]  }
  0x20   : >> { %2027 = vmatpush3.bf16.msra.mxu0 %v2176_v9  ;;  %1948 = vmatprep.subr.bf16.mxu1 %v2177_v10  ;;  %v794_v48 = vsel %vm261_vm0, %v789_v43, %v793_v36  ;;  %v927_v63 = vrot.slane %v1725_v60, 1  ;;  %v480_v9 = vld [vmem:[%s2363_s27] sm:$0xe]  ;;  %v2226_v23 = vld [vmem:[%s2363_s27 + $0x28] sm:$0xff]   ;;  %v2212_v24 = vld [vmem:[%s2644_s1 + $0x90] sm:$0xff]   ;;  %v506_v37 = vsel %vm501_vm1, %v503_v19, %v505_v42 }
  0x21   : >> { %2028 = vmatprep.subr.bf16.mxu0 %v2178_v11  ;;  %2036 = vmatprep.mubr.bf16.mxu0 %v794_v48  ;;  %v2213_v25 = vld [vmem:[%s2644_s1 + $0x190] sm:$0xff]   ;;  %v2216_v28 = vld [vmem:[%s2644_s1 + $0xa0] sm:$0xff]   ;;  %v1764_v31 = vld [vmem:[%s2363_s27 + $0x28] sm:$0xf] }
  0x22   : >> { %v929_v3 = vsel %vm501_vm1, %v927_v63, %v928_v61  ;;  %v2217_v29 = vld [vmem:[%s2644_s1 + $0x1a0] sm:$0xff]   ;;  %v2517_v32 = vld [vmem:[%s2363_s27 + $0x2c] sm:$0xf]  ;;  %v2220_v35 = vld [vmem:[%s2644_s1 + $0xb0] sm:$0xff]  }
  0x23   : >> { %1949 = vmatpush3.bf16.msra.mxu1 %v2177_v10  ;;  %v2205_v10 = vld [vmem:[%s2644_s1 + $0x38] sm:$0xff]   ;;  %v2219_v33 = vld [vmem:[%s2644_s1 + $0x1a8] sm:$0xff]   ;;  %v1785_v34 = vcombine.low %v1764_v31, %v2517_v32  ;;  %v2221_v36 = vld [vmem:[%s2644_s1 + $0x1b0] sm:$0xff]  }
  0x24   : >> { %2029 = vmatpush3.bf16.msra.mxu0 %v2178_v11  ;;  %1950 = vmatprep.subr.bf16.mxu1 %v2179_v12  ;;  %v2206_v11 = vld [vmem:[%s2644_s1 + $0x178] sm:$0xff]   ;;  %v2530_v38 = vld [vmem:[%s2363_s27 + $0x30] sm:$0xff]   ;;  %v2225_v46 = vld [vmem:[%s2644_s1 + $0xc0] sm:$0xff]  }
  0x25   : >> { %2030 = vmatprep.subr.bf16.mxu0 %v2180_v15  ;;  %v2223_v41 = vld [vmem:[%s2644_s1 + $0x1b8] sm:$0xff]   ;;  %v1209_v43 = vshrl.u32 %v1785_v34, 16  ;;  %v1216_v45 = vshll.u32 %v2530_v38, 16  ;;  %v2228_v48 = vld [vmem:[%s2363_s27 + $0x30] sm:$0xff]   ;;  %v2235_v58 = vld [vmem:[%s2644_s1 + $0xe0] sm:$0xff]  }
  0x26   : >> { %v2237_v60 = vld [vmem:[%s2644_s1 + $0xe8] sm:$0xff]   ;;  %v2248_v63 = vld [vmem:[%s2363_s27 + $0x38] ss:$0 sps:$4 sm:$0x11]  }
  0x27   : >> { %1951 = vmatpush3.bf16.msra.mxu1 %v2179_v12  ;;  %v1637_v12 = vcombine.low %v480_v9, %v2370_v14  ;;  %v1218_v50 = vrot.slane %v1216_v45, 1 }
  0x28   : >> { %2031 = vmatpush3.bf16.msra.mxu0 %v2180_v15  ;;  %1952 = vmatprep.subr.bf16.mxu1 %v2181_v18  ;;  %v930_v15 = vrot.slane %v2408_v39, 1  ;;  %v1211_v39 = vshll.u32 %v1785_v34, 16 }
  0x29   : >> { %2032 = vmatprep.subr.bf16.mxu0 %v2182_v26 }
  0x2a   : >> { %v931_v14 = vsel %vm501_vm1, %v928_v61, %v930_v15  ;;  %v1213_v44 = vrot.slane %v1211_v39, 1  ;;  %v2238_v61 = vld [vmem:[%s2644_s1 + $0x1e8] sm:$0xff]   ;;  %v2244_v15 = vld [vmem:[%s2363_s27 + $0x1c] sm:$0xff]  }
  0x2b   : >> { %1953 = vmatpush3.bf16.msra.mxu1 %v2181_v18  ;;  %v502_v18 = vrot.slane %v1637_v12, 1 }
  0x2c   : >> { %2033 = vmatpush3.bf16.msra.mxu0 %v2182_v26  ;;  %1954 = vmatprep.subr.bf16.mxu1 %v2183_v30  ;;  %v2214_v26 = vld [vmem:[%s2644_s1 + $0x98] sm:$0xff]   ;;  %v1214_v49 = vor.u32 %v1213_v44, %v1209_v43 }
  0x2d   : >> { %2034 = vmatprep.subr.bf16.mxu0 %v2184_v40  ;;  %v504_v22 = vsel %vm501_vm1, %v502_v18, %v503_v19  ;;  %v2249_v18 = vld [vmem:[%s2644_s1 + $0x208] sm:$0xff]  }
  0x2f   : >> { %1955 = vmatpush3.bf16.msra.mxu1 %v2183_v30  ;;  %v2218_v30 = vld [vmem:[%s2644_s1 + $0xa8] sm:$0xff]  }
  0x30   : >> { %2035 = vmatpush3.bf16.msra.mxu0 %v2184_v40  ;;  %1960 = vmatprep.subr.bf16.mxu1 %v2187_v47  ;;  %v2222_v40 = vld [vmem:[%s2644_s1 + $0xb8] sm:$0xff]  }
  0x31   : >> { %2040 = vmatprep.subr.bf16.mxu0 %v2190_v51 }
  0x32   : >> { %1957 = vmatmul.mubr.bf16.vlgmr.msra.gmra.mrb[0].mxu1 %v281_v52  ;;  %v2230_v52 = vld [vmem:[%s2644_s1 + $0x1c8] sm:$0xff]  }
  0x33   : >> { %1961 = vmatpush3.bf16.msra.mxu1 %v2187_v47  ;;  %2037 = vmatmul.mubr.bf16.vlgmr.msra.gmra.mrb[0].mxu0 %v802_v53  ;;  %v2227_v47 = vld [vmem:[%s2644_s1 + $0x1c0] sm:$0xff]   ;;  %v2243_v53 = vld [vmem:[%s2363_s27 + $0x14] sm:$0xff]  }
  0x34   : >> { %2041 = vmatpush3.bf16.msra.mxu0 %v2190_v51  ;;  %1962 = vmatprep.subr.bf16.mxu1 %v2193_v54  ;;  %v2229_v51 = vld [vmem:[%s2644_s1 + $0xc8] sm:$0xff]  }
  0x35   : >> { %2042 = vmatprep.subr.bf16.mxu0 %v2194_v55  ;;  %1976 = vmatprep.mubr.bf16.mxu1 %v2376_v16  ;;  %v2209_v16 = vld [vmem:[%s2644_s1 + $0x180] sm:$0xff]  }
  0x36   : >> { %2056 = vmatprep.mubr.bf16.mxu0 %v929_v3  ;;  %v1796_v3 = vld [vmem:[%s2363_s27 + $0x28] sm:$0xe] }
  0x37   : >> { %1963 = vmatpush3.bf16.msra.mxu1 %v2193_v54  ;;  %v2231_v54 = vld [vmem:[%s2644_s1 + $0xd0] sm:$0xff]  }
  0x38   : >> { %2043 = vmatpush3.bf16.msra.mxu0 %v2194_v55  ;;  %1964 = vmatprep.subr.bf16.mxu1 %v2195_v56  ;;  %v2232_v55 = vld [vmem:[%s2644_s1 + $0x1d0] sm:$0xff]  }
  0x39   : >> { %2044 = vmatprep.subr.bf16.mxu0 %v2196_v57 }
  0x3b   : >> { %1965 = vmatpush3.bf16.msra.mxu1 %v2195_v56  ;;  %v2233_v56 = vld [vmem:[%s2644_s1 + $0xd8] sm:$0xff]  }
  0x3c   : >> { %2045 = vmatpush3.bf16.msra.mxu0 %v2196_v57  ;;  %1966 = vmatprep.subr.bf16.mxu1 %v2197_v59  ;;  %v2234_v57 = vld [vmem:[%s2644_s1 + $0x1d8] sm:$0xff]  }
  0x3d   : >> { %2046 = vmatprep.subr.bf16.mxu0 %v2198_v62 }
  0x3f   : >> { %1967 = vmatpush3.bf16.msra.mxu1 %v2197_v59  ;;  %v2236_v59 = vld [vmem:[%s2644_s1 + $0x1e0] sm:$0xff]  }
  0x40   : >> { %2047 = vmatpush3.bf16.msra.mxu0 %v2198_v62  ;;  %1968 = vmatprep.subr.bf16.mxu1 %v2199_v2  ;;  %v2239_v62 = vld [vmem:[%s2644_s1 + $0xf0] sm:$0xff]  }
  0x41   : >> { %2048 = vmatprep.subr.bf16.mxu0 %v2200_v4 }
  0x43   : >> { %1969 = vmatpush3.bf16.msra.mxu1 %v2199_v2  ;;  %v2240_v2 = vld [vmem:[%s2644_s1 + $0x1f0] sm:$0xff]  }
  0x44   : >> { %2049 = vmatpush3.bf16.msra.mxu0 %v2200_v4  ;;  %1970 = vmatprep.subr.bf16.mxu1 %v2201_v5  ;;  %v2241_v4 = vld [vmem:[%s2644_s1 + $0xf8] sm:$0xff]  }
  0x45   : >> { %2050 = vmatprep.subr.bf16.mxu0 %v2202_v6 }
  0x47   : >> { %1971 = vmatpush3.bf16.msra.mxu1 %v2201_v5  ;;  %v1220_v5 = vshrl.u32 %v2530_v38, 16 }
  0x48   : >> { %2051 = vmatpush3.bf16.msra.mxu0 %v2202_v6  ;;  %1972 = vmatprep.subr.bf16.mxu1 %v2203_v7  ;;  %v1224_v6 = vshll.u32 %v2248_v63, 16 }
  0x49   : >> { %2052 = vmatprep.subr.bf16.mxu0 %v2204_v8  ;;  %v1222_v9 = vor.u32 %v1220_v5, %v1218_v50 }
  0x4b   : >> { %1973 = vmatpush3.bf16.msra.mxu1 %v2203_v7  ;;  %v2242_v7 = vld [vmem:[%s2644_s1 + $0x1f8] sm:$0xff]  }
  0x4c   : >> { %2053 = vmatpush3.bf16.msra.mxu0 %v2204_v8  ;;  %1974 = vmatprep.subr.bf16.mxu1 %v2205_v10  ;;  %v1813_v8 = vcombine.low %v1796_v3, %v2517_v32 }
  0x4d   : >> { %2054 = vmatprep.subr.bf16.mxu0 %v2206_v11 }
  0x4e   : >> { %v1352_v12 = vrot.slane %v1813_v8, 1 }
  0x4f   : >> { %1975 = vmatpush3.bf16.msra.mxu1 %v2205_v10  ;;  %v1226_v10 = vrot.slane %v1224_v6, 1 }
  0x50   : >> { %2055 = vmatpush3.bf16.msra.mxu0 %v2206_v11  ;;  %1980 = vmatprep.subr.bf16.mxu1 %v2207_v13  ;;  %v2247_v11 = vld [vmem:[%s2644_s1 + $0x200] sm:$0xff]  }
  0x51   : >> { %2060 = vmatprep.subr.bf16.mxu0 %v2209_v16 }
  0x52   : >> { %1977 = vmatmul.mubr.bf16.vlgmr.msra.gmra.mrb[0].mxu1 %v2379_v17  ;;  %v1219_v17 = vsel %vm261_vm0, %v1214_v49, %v1218_v50 }
  0x53   : >> { %1981 = vmatpush3.bf16.msra.mxu1 %v2207_v13  ;;  %2057 = vmatmul.mubr.bf16.vlgmr.msra.gmra.mrb[0].mxu0 %v931_v14  ;;  %v1353_v13 = vrot.slane %v2530_v38, 1  ;;  %v2250_v14 = vld [vmem:[%s2644_s1 + $0x210] sm:$0xff]  }
  0x54   : >> { %2061 = vmatpush3.bf16.msra.mxu0 %v2209_v16  ;;  %1982 = vmatprep.subr.bf16.mxu1 %v2210_v20  ;;  %v1227_v16 = vsel %vm261_vm0, %v1222_v9, %v1226_v10 }
  0x55   : >> { %2062 = vmatprep.subr.bf16.mxu0 %v2211_v21  ;;  %1996 = vmatprep.mubr.bf16.mxu1 %v504_v22  ;;  %v1354_v19 = vsel %vm501_vm1, %v1352_v12, %v1353_v13  ;;  %v2253_v22 = vld [vmem:[%s2644_s1 + $0x228] sm:$0xff]  }
  0x56   : >> { %2076 = vmatprep.mubr.bf16.mxu0 %v2226_v23  ;;  %v2254_v23 = vld [vmem:[%s2644_s1 + $0x230] sm:$0xff]  }
  0x57   : >> { %1983 = vmatpush3.bf16.msra.mxu1 %v2210_v20  ;;  %v2251_v20 = vld [vmem:[%s2644_s1 + $0x218] sm:$0xff]  }
  0x58   : >> { %2063 = vmatpush3.bf16.msra.mxu0 %v2211_v21  ;;  %1984 = vmatprep.subr.bf16.mxu1 %v2212_v24  ;;  %v2252_v21 = vld [vmem:[%s2644_s1 + $0x220] sm:$0xff]  }
  0x59   : >> { %2064 = vmatprep.subr.bf16.mxu0 %v2213_v25 }
  0x5b   : >> { %1985 = vmatpush3.bf16.msra.mxu1 %v2212_v24  ;;  %v2255_v24 = vld [vmem:[%s2644_s1 + $0x238] sm:$0xff]  }
  0x5c   : >> { %2065 = vmatpush3.bf16.msra.mxu0 %v2213_v25  ;;  %1986 = vmatprep.subr.bf16.mxu1 %v2214_v26  ;;  %v1355_v25 = vrot.slane %v2248_v63, 1 }
  0x5d   : >> { %2066 = vmatprep.subr.bf16.mxu0 %v2215_v27 }
  0x5f   : >> { %1987 = vmatpush3.bf16.msra.mxu1 %v2214_v26  ;;  %v1356_v26 = vsel %vm501_vm1, %v1353_v13, %v1355_v25 }
  0x60   : >> { %2067 = vmatpush3.bf16.msra.mxu0 %v2215_v27  ;;  %1988 = vmatprep.subr.bf16.mxu1 %v2216_v28 }
  0x61   : >> { %2068 = vmatprep.subr.bf16.mxu0 %v2217_v29 }
  0x63   : >> { %1989 = vmatpush3.bf16.msra.mxu1 %v2216_v28 }
  0x64   : >> { %2069 = vmatpush3.bf16.msra.mxu0 %v2217_v29  ;;  %1990 = vmatprep.subr.bf16.mxu1 %v2218_v30 }
  0x65   : >> { %2070 = vmatprep.subr.bf16.mxu0 %v2219_v33 }
  0x67   : >> { %1991 = vmatpush3.bf16.msra.mxu1 %v2218_v30 }
  0x68   : >> { %2071 = vmatpush3.bf16.msra.mxu0 %v2219_v33  ;;  %1992 = vmatprep.subr.bf16.mxu1 %v2220_v35 }
  0x69   : >> { %2072 = vmatprep.subr.bf16.mxu0 %v2221_v36 }
  0x6b   : >> { %1993 = vmatpush3.bf16.msra.mxu1 %v2220_v35 }
  0x6c   : >> { %2073 = vmatpush3.bf16.msra.mxu0 %v2221_v36  ;;  %1994 = vmatprep.subr.bf16.mxu1 %v2222_v40 }
  0x6d   : >> { %2074 = vmatprep.subr.bf16.mxu0 %v2223_v41 }
  0x6f   : >> { %1995 = vmatpush3.bf16.msra.mxu1 %v2222_v40 }
  0x70   : >> { %2075 = vmatpush3.bf16.msra.mxu0 %v2223_v41  ;;  %2000 = vmatprep.subr.bf16.mxu1 %v2225_v46 }
  0x71   : >> { %2080 = vmatprep.subr.bf16.mxu0 %v2227_v47 }
  0x72   : >> { %1997 = vmatmul.mubr.bf16.vlgmr.msra.gmra.mrb[0].mxu1 %v506_v37 }
  0x73   : >> { %2001 = vmatpush3.bf16.msra.mxu1 %v2225_v46  ;;  %2077 = vmatmul.mubr.bf16.vlgmr.msra.gmra.mrb[0].mxu0 %v2228_v48 }
  0x74   : >> { %2081 = vmatpush3.bf16.msra.mxu0 %v2227_v47  ;;  %2002 = vmatprep.subr.bf16.mxu1 %v2229_v51 }
  0x75   : >> { %2082 = vmatprep.subr.bf16.mxu0 %v2230_v52  ;;  %2016 = vmatprep.mubr.bf16.mxu1 %v2243_v53 }
  0x76   : >> { %2096 = vmatprep.mubr.bf16.mxu0 %v1219_v17 }
  0x77   : >> { %2003 = vmatpush3.bf16.msra.mxu1 %v2229_v51 }
  0x78   : >> { %2083 = vmatpush3.bf16.msra.mxu0 %v2230_v52  ;;  %2004 = vmatprep.subr.bf16.mxu1 %v2231_v54 }
  0x79   : >> { %2084 = vmatprep.subr.bf16.mxu0 %v2232_v55 }
  0x7b   : >> { %2005 = vmatpush3.bf16.msra.mxu1 %v2231_v54 }
  0x7c   : >> { %2085 = vmatpush3.bf16.msra.mxu0 %v2232_v55  ;;  %2006 = vmatprep.subr.bf16.mxu1 %v2233_v56 }
  0x7d   : >> { %2086 = vmatprep.subr.bf16.mxu0 %v2234_v57 }
  0x7f   : >> { %2007 = vmatpush3.bf16.msra.mxu1 %v2233_v56 }
  0x80   : >> { %2087 = vmatpush3.bf16.msra.mxu0 %v2234_v57  ;;  %2008 = vmatprep.subr.bf16.mxu1 %v2235_v58 }
  0x81   : >> { %2088 = vmatprep.subr.bf16.mxu0 %v2236_v59 }
  0x83   : >> { %2009 = vmatpush3.bf16.msra.mxu1 %v2235_v58 }
  0x84   : >> { %2089 = vmatpush3.bf16.msra.mxu0 %v2236_v59  ;;  %2010 = vmatprep.subr.bf16.mxu1 %v2237_v60 }
  0x85   : >> { %2090 = vmatprep.subr.bf16.mxu0 %v2238_v61 }
  0x87   : >> { %2011 = vmatpush3.bf16.msra.mxu1 %v2237_v60 }
  0x88   : >> { %2091 = vmatpush3.bf16.msra.mxu0 %v2238_v61  ;;  %2012 = vmatprep.subr.bf16.mxu1 %v2239_v62 }
  0x89   : >> { %2092 = vmatprep.subr.bf16.mxu0 %v2240_v2 }
  0x8b   : >> { %2013 = vmatpush3.bf16.msra.mxu1 %v2239_v62 }
  0x8c   : >> { %2093 = vmatpush3.bf16.msra.mxu0 %v2240_v2  ;;  %2014 = vmatprep.subr.bf16.mxu1 %v2241_v4 }
  0x8d   : >> { %2094 = vmatprep.subr.bf16.mxu0 %v2242_v7 }
  0x8f   : >> { %2015 = vmatpush3.bf16.msra.mxu1 %v2241_v4 }
  0x90   : >> { %2095 = vmatpush3.bf16.msra.mxu0 %v2242_v7 }
  0x91   : >> { %2100 = vmatprep.subr.bf16.mxu0 %v2247_v11 }
  0x92   : >> { %2017 = vmatmul.mubr.bf16.vlgmr.msra.gmra.mrb[0].mxu1 %v2244_v15 }
  0x93   : >> { %2097 = vmatmul.mubr.bf16.vlgmr.msra.gmra.mrb[0].mxu0 %v1227_v16 }
  0x94   : >> { %2101 = vmatpush3.bf16.msra.mxu0 %v2247_v11  ;;  %2116 = vmatprep.mubr.bf16.mxu0 %v1354_v19 }
  0x95   : >> { %2102 = vmatprep.subr.bf16.mxu0 %v2249_v18 }
  0x98   : >> { %2103 = vmatpush3.bf16.msra.mxu0 %v2249_v18 }
  0x99   : >> { %2104 = vmatprep.subr.bf16.mxu0 %v2250_v14 }
  0x9c   : >> { %2105 = vmatpush3.bf16.msra.mxu0 %v2250_v14 }
  0x9d   : >> { %2106 = vmatprep.subr.bf16.mxu0 %v2251_v20 }
  0xa0   : >> { %2107 = vmatpush3.bf16.msra.mxu0 %v2251_v20 }
  0xa1   : >> { %2108 = vmatprep.subr.bf16.mxu0 %v2252_v21 }
  0xa4   : >> { %2109 = vmatpush3.bf16.msra.mxu0 %v2252_v21 }
  0xa5   : >> { %2110 = vmatprep.subr.bf16.mxu0 %v2253_v22 }
  0xa8   : >> { %2111 = vmatpush3.bf16.msra.mxu0 %v2253_v22 }
  0xa9   : >> { %2112 = vmatprep.subr.bf16.mxu0 %v2254_v23 }
  0xac   : >> { %2113 = vmatpush3.bf16.msra.mxu0 %v2254_v23 }
  0xad   : >> { %2114 = vmatprep.subr.bf16.mxu0 %v2255_v24 }
  0xb0   : >> { %2115 = vmatpush3.bf16.msra.mxu0 %v2255_v24 }
  0xb3   : >> { %2117 = vmatmul.mubr.bf16.vlgmr.msra.gmra.mrb[0].mxu0 %v1356_v26 }
 0x165   : >> { %v2018_v27 = vpop.f32.mrb[0].mxu1 }
 0x166   : >> { %v729_v28 = vpop.f32.mrb[1].mxu1 }
 0x167   : >> { %v2019_v29 = vpop.f32.mrb[2].mxu1 }
 0x168   : >> { %v732_v30 = vpop.f32.mrb[3].mxu1 }
 0x186   : >> { %v2118_v31 = vpop.f32.mrb[0].mxu0 }
 0x187   : >> { %v2120_v32 = vadd.f32 %v2118_v31, %v2018_v27  ;;  %v1441_v33 = vpop.f32.mrb[1].mxu0 }
 0x188   : >> { %v2121_v34 = vadd.f32 %v1441_v33, %v729_v28  ;;  %v2119_v35 = vpop.f32.mrb[2].mxu0 }
 0x189   : >> { %v1468_v36 = vmul.f32 %v2120_v32, %v2309_v0  ;;  %v2122_v38 = vadd.f32 %v2119_v35, %v2019_v29  ;;  %v1444_v39 = vpop.f32.mrb[3].mxu0 }
 0x18a   : >> { %v1466_v40 = vmul.f32 %v2121_v34, %v2309_v0  ;;  %v2123_v41 = vadd.f32 %v1444_v39, %v732_v30 }
 0x18b   : >> { %v1478_v42 = vadd.f32 %v2314_v1, %v1468_v36  ;;  %v1469_v43 = vmul.f32 %v2122_v38, %v2309_v0 }
 0x18c   : >> { %v1476_v44 = vadd.f32 %v2314_v1, %v1466_v40  ;;  %v1467_v45 = vmul.f32 %v2123_v41, %v2309_v0 }
 0x18d   : >> { %v1479_v46 = vadd.f32 %v2314_v1, %v1469_v43  ;;  %v1482_v37 = vmax.f32 %v1478_v42, 0.0 }
 0x18e   : >> { %v1477_v47 = vadd.f32 %v2314_v1, %v1467_v45  ;;  %v1480_v49 = vmax.f32 %v1476_v44, 0.0  ;;  %205 = sbr.rel (!%p203_p4) target bundleno = 17 (0x11), region = 85 }
 0x18f   : >> { %v1483_v48 = vmax.f32 %v1479_v46, 0.0 }
 0x190   : >> { %v1481_v50 = vmax.f32 %v1477_v47, 0.0 }
 0x191   : >> { %v1847_v51 = vpack.c.bf16 %v1483_v48, %v1482_v37 }
 0x192   : >> { %v1842_v52 = vpack.c.bf16 %v1481_v50, %v1480_v49 }
 0x193   : >> { %1849 = vst [vmem:[%s1502_s24 + $0x8] sm:$0xff] %v1847_v51  }
 0x194   : >> { %1843 = vst [vmem:[%s1502_s24] sm:$0xff] %v1842_v52  }
 0x195 PF: > { %s14_s15 = sadd.s32 1, %s2267_s15  }
 0x196   : > { %p11_p5 = scmp.ge.s32.totalorder %s14_s15, 4  }
 0x198   :  { %13 = sbr.rel (!%p11_p5) target bundleno = 1 (0x1), region = 96 }

// kernel: crnn_forward.11
= control target key start
LH: loop header
LB: loop body
LE: loop exit
PB: predicated region body
PF: predicated region fallthrough
CT: control target
= control target key end

     0   :  { %s2087_s15 = smov 0   ;;  %s2492_s0 = inlined_call_operand.vmem [shape: bf16[2,10,18,128], index: 0, kind: input, shape index: {}]   ;;  %s2493_s1 = inlined_call_operand.vmem [shape: bf16[9,128,128], index: 1, kind: input, shape index: {}]   ;;  %s2494_s2 = inlined_call_operand.vmem [shape: f32[1,128], index: 2, kind: input, shape index: {}]   ;;  %s2495_s3 = inlined_call_operand.vmem [shape: f32[1,128], index: 3, kind: input, shape index: {}]   ;;  %s2496_s4 = inlined_call_operand.vmem [shape: bf16[2,8,16,128], index: 4, kind: output, shape index: {}]  }
   0x1 LB: > { %s1401_s16 = sadd.s32 4294967295, %s2054_s15   ;;  %p1405_p0 = scmp.ge.s32.totalorder %s2054_s15, 1  ;;  %s2054_s15 = sphi %s2087_s15, %s14_s15  }
   0x2   : > { %p162_p1 = scmp.lt.s32.totalorder %s2054_s15, 3 }
   0x4   : > { %p163_p2 = pnand %p1405_p0, %p162_p1 }
   0x5   : > { %p188_p3 = scmp.lt.s32.totalorder (!%p163_p2), %s1401_s16, 1  ;;  %v2098_v0 = vld [vmem:[%s2494_s2] ss:$0 sm:$0xff] (!%p163_p2)  ;;  %s2115_s29 = smov (!%p163_p2), 0  }
   0x6   : > { %166 = sbr.rel (%p163_p2) target bundleno = 404 (0x194), region = 36  ;;  %v2103_v1 = vld [vmem:[%s2495_s3] ss:$0 sm:$0xff] (!%p163_p2) }
   0xd   : > { %s2498_s16 = smov (!%p188_p3, %s1401_s16), 1 }
   0xe   : > { %s1942_s21 = smul.u32 120, %s2498_s16  ;;  %s1641_s22 = sshll.u32 %s2498_s16, 6 }
   0xf   : > { %s2108_s25 = scalar_lea.vmem %s2496_s4, %s1641_s22 }
  0x10   : > { %s2113_s28 = scalar_lea.vmem %s2492_s0, %s1942_s21 }
  0x11 LB: >> { %v1961_v2 = vld [vmem:[%s2493_s1 + $0x40] sm:$0xff]   ;;  %v2060_v3 = vmov 0.0   ;;  %v1963_v5 = vld [vmem:[%s2493_s1 + $0x48] sm:$0xff]   ;;  %vm2061_vm0 = vmmov 0   ;;  %v1965_v7 = vld [vmem:[%s2493_s1 + $0x50] sm:$0xff]   ;;  %s1642_s17 = smul.u32 12, %s2058_s29  ;;  %s2058_s29 = sphi %s2115_s29, %s206_s29  }
  0x12   : >> { %1732 = vmatprep.subr.bf16.mxu1 %v2060_v3  ;;  %1812 = vmatprep.subr.bf16.mxu0 %v2060_v3  ;;  %v1962_v4 = vld [vmem:[%s2493_s1 + $0x100] sm:$0xff]   ;;  %v1964_v6 = vld [vmem:[%s2493_s1 + $0x108] sm:$0xff]   ;;  %v1966_v8 = vld [vmem:[%s2493_s1 + $0x110] sm:$0xff]   ;;  %vm254_vm1 = vsmask.f32 7424  ;;  %vm468_vm2 = vcmask 1046528  }
  0x13   : >> { %1733 = vmatpush3.bf16.msra.mxu1 %v1961_v2  ;;  %1748 = vmatprep.mubr.msk.bf16.mxu1 %vm2061_vm0, %v2060_v3  ;;  %v1967_v9 = vld [vmem:[%s2493_s1 + $0x58] sm:$0xff]   ;;  %s2158_s22 = scalar_lea.vmem %s2113_s28, %s1642_s17  ;;  %v1969_v11 = vld [vmem:[%s2493_s1 + $0x60] sm:$0xff]   ;;  %v1971_v15 = vld [vmem:[%s2493_s1 + $0x68] sm:$0xff]   ;;  %s1645_s24 = sshll.u32 %s2058_s29, 3 }
  0x14   : >> { %1813 = vmatpush3.bf16.msra.mxu0 %v1962_v4  ;;  %1734 = vmatprep.subr.bf16.mxu1 %v2060_v3  ;;  %v1968_v10 = vld [vmem:[%s2493_s1 + $0x118] sm:$0xff]   ;;  %v1970_v12 = vld [vmem:[%s2493_s1 + $0x120] sm:$0xff]   ;;  %v2179_v17 = vld [vmem:[%s2158_s22 + $0x8] ss:$0 sps:$4 sm:$0x11]   ;;  %s1328_s26 = scalar_lea.vmem %s2108_s25, %s1645_s24  ;;  %s206_s29 = sadd.s32 1, %s2058_s29  }
  0x15   : >> { %1814 = vmatprep.subr.bf16.mxu0 %v2060_v3  ;;  %1828 = vmatprep.mubr.msk.bf16.mxu0 %vm2061_vm0, %v2060_v3  ;;  %v210_v13 = vld [vmem:[%s2158_s22] sm:$0xf]  ;;  %v2170_v14 = vld [vmem:[%s2158_s22 + $0x4] sm:$0xf]  ;;  %v1496_v18 = vld [vmem:[%s2158_s22 + $0xc] sm:$0xf] }
  0x16   : >> { %v2176_v16 = vcombine.low %v210_v13, %v2170_v14  ;;  %v1972_v19 = vld [vmem:[%s2493_s1 + $0x128] sm:$0xff]   ;;  %v2188_v21 = vld [vmem:[%s2158_s22 + $0x10] sm:$0xf]  ;;  %v2196_v24 = vld [vmem:[%s2158_s22 + $0x14] ss:$0 sps:$4 sm:$0x11]  }
  0x17   : >> { %1735 = vmatpush3.bf16.msra.mxu1 %v1963_v5  ;;  %v1973_v22 = vld [vmem:[%s2493_s1 + $0x70] sm:$0xff]   ;;  %v1515_v23 = vcombine.low %v1496_v18, %v2188_v21  ;;  %v263_v27 = vshll.u32 %v2179_v17, 16  ;;  %v720_v31 = vshll.u32 %v2196_v24, 16  ;;  %v1975_v33 = vld [vmem:[%s2493_s1 + $0x78] sm:$0xff]   ;;  %v1979_v40 = vld [vmem:[%s2493_s1] sm:$0xff]   ;;  %v470_v56 = vrot.slane %v2179_v17, 1 }
  0x18   : >> { %1815 = vmatpush3.bf16.msra.mxu0 %v1964_v6  ;;  %1736 = vmatprep.subr.bf16.mxu1 %v2060_v3  ;;  %v258_v20 = vshll.u32 %v2176_v16, 16  ;;  %v1974_v25 = vld [vmem:[%s2493_s1 + $0x130] sm:$0xff]   ;;  %v256_v26 = vshrl.u32 %v2176_v16, 16  ;;  %v1976_v36 = vld [vmem:[%s2493_s1 + $0x138] sm:$0xff]   ;;  %v1982_v42 = vld [vmem:[%s2493_s1 + $0x140] sm:$0xff]   ;;  %v838_v63 = vrot.slane %v2196_v24, 1 }
  0x19   : >> { %1816 = vmatprep.subr.bf16.mxu0 %v2060_v3  ;;  %v713_v29 = vshrl.u32 %v1515_v23, 16  ;;  %v715_v30 = vshll.u32 %v1515_v23, 16  ;;  %v265_v35 = vrot.slane %v263_v27, 1  ;;  %v722_v38 = vrot.slane %v720_v31, 1  ;;  %v1983_v43 = vld [vmem:[%s2493_s1 + $0x8] sm:$0xff]   ;;  %v1985_v45 = vld [vmem:[%s2493_s1 + $0x10] sm:$0xff]  }
  0x1a   : >> { %v260_v28 = vrot.slane %v258_v20, 1  ;;  %v1984_v44 = vld [vmem:[%s2493_s1 + $0x148] sm:$0xff]   ;;  %v1986_v46 = vld [vmem:[%s2493_s1 + $0x150] sm:$0xff]   ;;  %v1987_v47 = vld [vmem:[%s2493_s1 + $0x18] sm:$0xff]   ;;  %p203_p4 = scmp.ge.s32.totalorder %s206_s29, 8  }
  0x1b   : >> { %1737 = vmatpush3.bf16.msra.mxu1 %v1965_v7  ;;  %v717_v32 = vrot.slane %v715_v30, 1  ;;  %v1988_v48 = vld [vmem:[%s2493_s1 + $0x158] sm:$0xff]   ;;  %v1989_v49 = vld [vmem:[%s2493_s1 + $0x20] sm:$0xff]   ;;  %v1991_v51 = vld [vmem:[%s2493_s1 + $0x28] sm:$0xff]  }
  0x1c   : >> { %1817 = vmatpush3.bf16.msra.mxu0 %v1966_v8  ;;  %1738 = vmatprep.subr.bf16.mxu1 %v2060_v3  ;;  %v261_v34 = vor.u32 %v260_v28, %v256_v26  ;;  %v1990_v50 = vld [vmem:[%s2493_s1 + $0x160] sm:$0xff]   ;;  %v1992_v52 = vld [vmem:[%s2493_s1 + $0x168] sm:$0xff]   ;;  %v1993_v57 = vld [vmem:[%s2493_s1 + $0x30] sm:$0xff]  }
  0x1d   : >> { %1818 = vmatprep.subr.bf16.mxu0 %v2060_v3  ;;  %v718_v37 = vor.u32 %v717_v32, %v713_v29  ;;  %v1525_v53 = vld [vmem:[%s2158_s22 + $0xc] sm:$0xe]  ;;  %v447_v54 = vld [vmem:[%s2158_s22] sm:$0xe]  ;;  %v1994_v58 = vld [vmem:[%s2493_s1 + $0x170] sm:$0xff]  }
  0x1e   : >> { %v266_v39 = vsel %vm254_vm1, %v261_v34, %v265_v35  ;;  %v1460_v55 = vcombine.low %v447_v54, %v2170_v14  ;;  %v1542_v59 = vcombine.low %v1525_v53, %v2188_v21  ;;  %v1995_v62 = vld [vmem:[%s2493_s1 + $0x38] sm:$0xff]   ;;  %v1997_v5 = vld [vmem:[%s2493_s1 + $0x80] sm:$0xff]   ;;  %v2000_v8 = vld [vmem:[%s2493_s1 + $0x88] sm:$0xff]  }
  0x1f   : >> { %1739 = vmatpush3.bf16.msra.mxu1 %v1967_v9  ;;  %v723_v41 = vsel %vm254_vm1, %v718_v37, %v722_v38  ;;  %v1996_v2 = vld [vmem:[%s2493_s1 + $0x178] sm:$0xff]   ;;  %v1999_v7 = vld [vmem:[%s2493_s1 + $0x180] sm:$0xff]   ;;  %v2001_v9 = vld [vmem:[%s2493_s1 + $0x188] sm:$0xff]  }
  0x20   : >> { %1819 = vmatpush3.bf16.msra.mxu0 %v1968_v10  ;;  %1740 = vmatprep.subr.bf16.mxu1 %v2060_v3  ;;  %v469_v60 = vrot.slane %v1460_v55, 1  ;;  %v837_v4 = vrot.slane %v1542_v59, 1  ;;  %v2002_v10 = vld [vmem:[%s2493_s1 + $0x90] sm:$0xff]   ;;  %v1579_v13 = vld [vmem:[%s2158_s22 + $0x1c] sm:$0xf]  ;;  %v2006_v23 = vld [vmem:[%s2493_s1 + $0xa0] sm:$0xff]  }
  0x21   : >> { %1820 = vmatprep.subr.bf16.mxu0 %v2060_v3  ;;  %v2005_v20 = vld [vmem:[%s2493_s1 + $0x198] sm:$0xff]   ;;  %v2008_v30 = vld [vmem:[%s2493_s1 + $0xa8] sm:$0xff]   ;;  %v2010_v34 = vld [vmem:[%s2493_s1 + $0xb0] sm:$0xff]  }
  0x22   : >> { %v2282_v61 = vsel %vm468_vm2, %v469_v60, %v470_v56  ;;  %v839_v6 = vsel %vm468_vm2, %v837_v4, %v838_v63  ;;  %v1607_v27 = vld [vmem:[%s2158_s22 + $0x18] sm:$0xe]  ;;  %v2009_v31 = vld [vmem:[%s2493_s1 + $0x1a8] sm:$0xff]   ;;  %v2011_v35 = vld [vmem:[%s2493_s1 + $0x1b0] sm:$0xff]  }
  0x23   : >> { %1741 = vmatpush3.bf16.msra.mxu1 %v1969_v11  ;;  %v2003_v11 = vld [vmem:[%s2493_s1 + $0x190] sm:$0xff]   ;;  %v1624_v28 = vcombine.low %v1607_v27, %v1579_v13  ;;  %v2013_v37 = vld [vmem:[%s2493_s1 + $0x1b8] sm:$0xff]   ;;  %v2015_v38 = vld [vmem:[%s2493_s1 + $0xc0] sm:$0xff]  }
  0x24   : >> { %1821 = vmatpush3.bf16.msra.mxu0 %v1970_v12  ;;  %1742 = vmatprep.subr.bf16.mxu1 %v2060_v3  ;;  %v1578_v12 = vld [vmem:[%s2158_s22 + $0x18] sm:$0xf]  ;;  %v2032_v55 = vld [vmem:[%s2158_s22 + $0xc] sm:$0xff]   ;;  %v2035_v56 = vld [vmem:[%s2493_s1 + $0x200] sm:$0xff]  }
  0x25   : >> { %1822 = vmatprep.subr.bf16.mxu0 %v2060_v3  ;;  %v1597_v14 = vcombine.low %v1578_v12, %v1579_v13  ;;  %v1205_v32 = vrot.slane %v1624_v28, 1  ;;  %v2030_v53 = vld [vmem:[%s2493_s1 + $0xf8] sm:$0xff]   ;;  %v2039_v60 = vld [vmem:[%s2493_s1 + $0x220] sm:$0xff]  }
  0x26   : >> { %v2031_v54 = vld [vmem:[%s2493_s1 + $0x1f8] sm:$0xff]  }
  0x27   : >> { %1743 = vmatpush3.bf16.msra.mxu1 %v1971_v15  ;;  %v2034_v15 = vld [vmem:[%s2158_s22 + $0x20] ss:$0 sps:$4 sm:$0x11]   ;;  %v1081_v17 = vshrl.u32 %v1597_v14, 16  ;;  %v1083_v18 = vshll.u32 %v1597_v14, 16  ;;  %v2038_v59 = vld [vmem:[%s2493_s1 + $0x218] sm:$0xff]  }
  0x28   : >> { %1823 = vmatpush3.bf16.msra.mxu0 %v1972_v19  ;;  %1744 = vmatprep.subr.bf16.mxu1 %v2060_v3  ;;  %v1088_v19 = vshll.u32 %v2034_v15, 16  ;;  %v1206_v29 = vrot.slane %v2034_v15, 1  ;;  %v2042_v63 = vld [vmem:[%s2493_s1 + $0x238] sm:$0xff]  }
  0x29   : >> { %1824 = vmatprep.subr.bf16.mxu0 %v2060_v3  ;;  %v1085_v21 = vrot.slane %v1083_v18, 1 }
  0x2b   : >> { %1745 = vmatpush3.bf16.msra.mxu1 %v1973_v22  ;;  %v1090_v22 = vrot.slane %v1088_v19, 1  ;;  %v1086_v24 = vor.u32 %v1085_v21, %v1081_v17 }
  0x2c   : >> { %1825 = vmatpush3.bf16.msra.mxu0 %v1974_v25  ;;  %1746 = vmatprep.subr.bf16.mxu1 %v2060_v3  ;;  %v2007_v25 = vld [vmem:[%s2493_s1 + $0x1a0] sm:$0xff]  }
  0x2d   : >> { %1826 = vmatprep.subr.bf16.mxu0 %v2060_v3  ;;  %v2343_v26 = vsel %vm254_vm1, %v1086_v24, %v1090_v22 }
  0x2f   : >> { %1747 = vmatpush3.bf16.msra.mxu1 %v1975_v33  ;;  %v2355_v33 = vsel %vm468_vm2, %v1205_v32, %v1206_v29 }
  0x30   : >> { %1827 = vmatpush3.bf16.msra.mxu0 %v1976_v36  ;;  %1752 = vmatprep.subr.bf16.mxu1 %v2060_v3  ;;  %v2012_v36 = vld [vmem:[%s2493_s1 + $0xb8] sm:$0xff]  }
  0x31   : >> { %1832 = vmatprep.subr.bf16.mxu0 %v2060_v3 }
  0x32   : >> { %1749 = vmatmul.mubr.bf16.vlgmr.msra.gmra.mrb[0].mxu1 %v266_v39  ;;  %v2016_v39 = vld [vmem:[%s2158_s22 + $0x18] sm:$0xff]  }
  0x33   : >> { %1753 = vmatpush3.bf16.msra.mxu1 %v1979_v40  ;;  %1829 = vmatmul.mubr.bf16.vlgmr.msra.gmra.mrb[0].mxu0 %v723_v41  ;;  %v2017_v40 = vld [vmem:[%s2493_s1 + $0x1c0] sm:$0xff]   ;;  %v2018_v41 = vld [vmem:[%s2493_s1 + $0xc8] sm:$0xff]  }
  0x34   : >> { %1833 = vmatpush3.bf16.msra.mxu0 %v1982_v42  ;;  %1754 = vmatprep.subr.bf16.mxu1 %v2060_v3  ;;  %v2019_v42 = vld [vmem:[%s2493_s1 + $0x1c8] sm:$0xff]  }
  0x35   : >> { %1834 = vmatprep.subr.bf16.mxu0 %v2060_v3  ;;  %1768 = vmatprep.mubr.msk.bf16.mxu1 %vm2061_vm0, %v2060_v3 }
  0x36   : >> { %1848 = vmatprep.mubr.msk.bf16.mxu0 %vm2061_vm0, %v2060_v3 }
  0x37   : >> { %1755 = vmatpush3.bf16.msra.mxu1 %v1983_v43  ;;  %v2020_v43 = vld [vmem:[%s2493_s1 + $0xd0] sm:$0xff]  }
  0x38   : >> { %1835 = vmatpush3.bf16.msra.mxu0 %v1984_v44  ;;  %1756 = vmatprep.subr.bf16.mxu1 %v2060_v3  ;;  %v2021_v44 = vld [vmem:[%s2493_s1 + $0x1d0] sm:$0xff]  }
  0x39   : >> { %1836 = vmatprep.subr.bf16.mxu0 %v2060_v3 }
  0x3b   : >> { %1757 = vmatpush3.bf16.msra.mxu1 %v1985_v45  ;;  %v2022_v45 = vld [vmem:[%s2493_s1 + $0xd8] sm:$0xff]  }
  0x3c   : >> { %1837 = vmatpush3.bf16.msra.mxu0 %v1986_v46  ;;  %1758 = vmatprep.subr.bf16.mxu1 %v2060_v3  ;;  %v2023_v46 = vld [vmem:[%s2493_s1 + $0x1d8] sm:$0xff]  }
  0x3d   : >> { %1838 = vmatprep.subr.bf16.mxu0 %v2060_v3 }
  0x3f   : >> { %1759 = vmatpush3.bf16.msra.mxu1 %v1987_v47  ;;  %v2024_v47 = vld [vmem:[%s2493_s1 + $0xe0] sm:$0xff]  }
  0x40   : >> { %1839 = vmatpush3.bf16.msra.mxu0 %v1988_v48  ;;  %1760 = vmatprep.subr.bf16.mxu1 %v2060_v3  ;;  %v2025_v48 = vld [vmem:[%s2493_s1 + $0x1e0] sm:$0xff]  }
  0x41   : >> { %1840 = vmatprep.subr.bf16.mxu0 %v2060_v3 }
  0x43   : >> { %1761 = vmatpush3.bf16.msra.mxu1 %v1989_v49  ;;  %v2026_v49 = vld [vmem:[%s2493_s1 + $0xe8] sm:$0xff]  }
  0x44   : >> { %1841 = vmatpush3.bf16.msra.mxu0 %v1990_v50  ;;  %1762 = vmatprep.subr.bf16.mxu1 %v2060_v3  ;;  %v2027_v50 = vld [vmem:[%s2493_s1 + $0x1e8] sm:$0xff]  }
  0x45   : >> { %1842 = vmatprep.subr.bf16.mxu0 %v2060_v3 }
  0x47   : >> { %1763 = vmatpush3.bf16.msra.mxu1 %v1991_v51  ;;  %v2028_v51 = vld [vmem:[%s2493_s1 + $0xf0] sm:$0xff]  }
  0x48   : >> { %1843 = vmatpush3.bf16.msra.mxu0 %v1992_v52  ;;  %1764 = vmatprep.subr.bf16.mxu1 %v2060_v3  ;;  %v2029_v52 = vld [vmem:[%s2493_s1 + $0x1f0] sm:$0xff]  }
  0x49   : >> { %1844 = vmatprep.subr.bf16.mxu0 %v2060_v3 }
  0x4b   : >> { %1765 = vmatpush3.bf16.msra.mxu1 %v1993_v57  ;;  %v2036_v57 = vld [vmem:[%s2493_s1 + $0x208] sm:$0xff]  }
  0x4c   : >> { %1845 = vmatpush3.bf16.msra.mxu0 %v1994_v58  ;;  %1766 = vmatprep.subr.bf16.mxu1 %v2060_v3  ;;  %v2037_v58 = vld [vmem:[%s2493_s1 + $0x210] sm:$0xff]  }
  0x4d   : >> { %1846 = vmatprep.subr.bf16.mxu0 %v2060_v3 }
  0x4f   : >> { %1767 = vmatpush3.bf16.msra.mxu1 %v1995_v62  ;;  %v2041_v62 = vld [vmem:[%s2493_s1 + $0x230] sm:$0xff]  }
  0x50   : >> { %1847 = vmatpush3.bf16.msra.mxu0 %v1996_v2  ;;  %1772 = vmatprep.subr.bf16.mxu1 %v2060_v3 }
  0x51   : >> { %1852 = vmatprep.subr.bf16.mxu0 %v2060_v3 }
  0x52   : >> { %1769 = vmatmul.mubr.bf16.vlgmr.msra.gmra.mrb[0].mxu1 %v2176_v16  ;;  %v2004_v16 = vld [vmem:[%s2493_s1 + $0x98] sm:$0xff]  }
  0x53   : >> { %1773 = vmatpush3.bf16.msra.mxu1 %v1997_v5  ;;  %1849 = vmatmul.mubr.bf16.vlgmr.msra.gmra.mrb[0].mxu0 %v839_v6 }
  0x54   : >> { %1853 = vmatpush3.bf16.msra.mxu0 %v1999_v7  ;;  %1774 = vmatprep.subr.bf16.mxu1 %v2060_v3 }
  0x55   : >> { %1854 = vmatprep.subr.bf16.mxu0 %v2060_v3  ;;  %1788 = vmatprep.mubr.msk.bf16.mxu1 %vm2061_vm0, %v2060_v3 }
  0x56   : >> { %1868 = vmatprep.mubr.msk.bf16.mxu0 %vm2061_vm0, %v2060_v3 }
  0x57   : >> { %1775 = vmatpush3.bf16.msra.mxu1 %v2000_v8 }
  0x58   : >> { %1855 = vmatpush3.bf16.msra.mxu0 %v2001_v9  ;;  %1776 = vmatprep.subr.bf16.mxu1 %v2060_v3 }
  0x59   : >> { %1856 = vmatprep.subr.bf16.mxu0 %v2060_v3 }
  0x5b   : >> { %1777 = vmatpush3.bf16.msra.mxu1 %v2002_v10 }
  0x5c   : >> { %1857 = vmatpush3.bf16.msra.mxu0 %v2003_v11  ;;  %1778 = vmatprep.subr.bf16.mxu1 %v2060_v3 }
  0x5d   : >> { %1858 = vmatprep.subr.bf16.mxu0 %v2060_v3 }
  0x5f   : >> { %1779 = vmatpush3.bf16.msra.mxu1 %v2004_v16 }
  0x60   : >> { %1859 = vmatpush3.bf16.msra.mxu0 %v2005_v20  ;;  %1780 = vmatprep.subr.bf16.mxu1 %v2060_v3 }
  0x61   : >> { %1860 = vmatprep.subr.bf16.mxu0 %v2060_v3 }
  0x63   : >> { %1781 = vmatpush3.bf16.msra.mxu1 %v2006_v23 }
  0x64   : >> { %1861 = vmatpush3.bf16.msra.mxu0 %v2007_v25  ;;  %1782 = vmatprep.subr.bf16.mxu1 %v2060_v3 }
  0x65   : >> { %1862 = vmatprep.subr.bf16.mxu0 %v2060_v3 }
  0x67   : >> { %1783 = vmatpush3.bf16.msra.mxu1 %v2008_v30 }
  0x68   : >> { %1863 = vmatpush3.bf16.msra.mxu0 %v2009_v31  ;;  %1784 = vmatprep.subr.bf16.mxu1 %v2060_v3 }
  0x69   : >> { %1864 = vmatprep.subr.bf16.mxu0 %v2060_v3 }
  0x6b   : >> { %1785 = vmatpush3.bf16.msra.mxu1 %v2010_v34 }
  0x6c   : >> { %1865 = vmatpush3.bf16.msra.mxu0 %v2011_v35  ;;  %1786 = vmatprep.subr.bf16.mxu1 %v2060_v3 }
  0x6d   : >> { %1866 = vmatprep.subr.bf16.mxu0 %v2060_v3 }
  0x6f   : >> { %1787 = vmatpush3.bf16.msra.mxu1 %v2012_v36 }
  0x70   : >> { %1867 = vmatpush3.bf16.msra.mxu0 %v2013_v37  ;;  %1792 = vmatprep.subr.bf16.mxu1 %v2060_v3 }
  0x71   : >> { %1872 = vmatprep.subr.bf16.mxu0 %v2060_v3 }
  0x72   : >> { %1789 = vmatmul.mubr.bf16.vlgmr.msra.gmra.mrb[0].mxu1 %v2282_v61  ;;  %v2040_v61 = vld [vmem:[%s2493_s1 + $0x228] sm:$0xff]  }
  0x73   : >> { %1793 = vmatpush3.bf16.msra.mxu1 %v2015_v38  ;;  %1869 = vmatmul.mubr.bf16.vlgmr.msra.gmra.mrb[0].mxu0 %v2016_v39 }
  0x74   : >> { %1873 = vmatpush3.bf16.msra.mxu0 %v2017_v40  ;;  %1794 = vmatprep.subr.bf16.mxu1 %v2060_v3 }
  0x75   : >> { %1874 = vmatprep.subr.bf16.mxu0 %v2060_v3  ;;  %1808 = vmatprep.mubr.msk.bf16.mxu1 %vm2061_vm0, %v2060_v3 }
  0x76   : >> { %1888 = vmatprep.mubr.msk.bf16.mxu0 %vm2061_vm0, %v2060_v3 }
  0x77   : >> { %1795 = vmatpush3.bf16.msra.mxu1 %v2018_v41 }
  0x78   : >> { %1875 = vmatpush3.bf16.msra.mxu0 %v2019_v42  ;;  %1796 = vmatprep.subr.bf16.mxu1 %v2060_v3 }
  0x79   : >> { %1876 = vmatprep.subr.bf16.mxu0 %v2060_v3 }
  0x7b   : >> { %1797 = vmatpush3.bf16.msra.mxu1 %v2020_v43 }
  0x7c   : >> { %1877 = vmatpush3.bf16.msra.mxu0 %v2021_v44  ;;  %1798 = vmatprep.subr.bf16.mxu1 %v2060_v3 }
  0x7d   : >> { %1878 = vmatprep.subr.bf16.mxu0 %v2060_v3 }
  0x7f   : >> { %1799 = vmatpush3.bf16.msra.mxu1 %v2022_v45 }
  0x80   : >> { %1879 = vmatpush3.bf16.msra.mxu0 %v2023_v46  ;;  %1800 = vmatprep.subr.bf16.mxu1 %v2060_v3 }
  0x81   : >> { %1880 = vmatprep.subr.bf16.mxu0 %v2060_v3 }
  0x83   : >> { %1801 = vmatpush3.bf16.msra.mxu1 %v2024_v47 }
  0x84   : >> { %1881 = vmatpush3.bf16.msra.mxu0 %v2025_v48  ;;  %1802 = vmatprep.subr.bf16.mxu1 %v2060_v3 }
  0x85   : >> { %1882 = vmatprep.subr.bf16.mxu0 %v2060_v3 }
  0x87   : >> { %1803 = vmatpush3.bf16.msra.mxu1 %v2026_v49 }
  0x88   : >> { %1883 = vmatpush3.bf16.msra.mxu0 %v2027_v50  ;;  %1804 = vmatprep.subr.bf16.mxu1 %v2060_v3 }
  0x89   : >> { %1884 = vmatprep.subr.bf16.mxu0 %v2060_v3 }
  0x8b   : >> { %1805 = vmatpush3.bf16.msra.mxu1 %v2028_v51 }
  0x8c   : >> { %1885 = vmatpush3.bf16.msra.mxu0 %v2029_v52  ;;  %1806 = vmatprep.subr.bf16.mxu1 %v2060_v3 }
  0x8d   : >> { %1886 = vmatprep.subr.bf16.mxu0 %v2060_v3 }
  0x8f   : >> { %1807 = vmatpush3.bf16.msra.mxu1 %v2030_v53 }
  0x90   : >> { %1887 = vmatpush3.bf16.msra.mxu0 %v2031_v54 }
  0x91   : >> { %1892 = vmatprep.subr.bf16.mxu0 %v2060_v3 }
  0x92   : >> { %1809 = vmatmul.mubr.bf16.vlgmr.msra.gmra.mrb[0].mxu1 %v2032_v55 }
  0x93   : >> { %1889 = vmatmul.mubr.bf16.vlgmr.msra.gmra.mrb[0].mxu0 %v2343_v26 }
  0x94   : >> { %1893 = vmatpush3.bf16.msra.mxu0 %v2035_v56  ;;  %1908 = vmatprep.mubr.msk.bf16.mxu0 %vm2061_vm0, %v2060_v3 }
  0x95   : >> { %1894 = vmatprep.subr.bf16.mxu0 %v2060_v3 }
  0x98   : >> { %1895 = vmatpush3.bf16.msra.mxu0 %v2036_v57 }
  0x99   : >> { %1896 = vmatprep.subr.bf16.mxu0 %v2060_v3 }
  0x9c   : >> { %1897 = vmatpush3.bf16.msra.mxu0 %v2037_v58 }
  0x9d   : >> { %1898 = vmatprep.subr.bf16.mxu0 %v2060_v3 }
  0xa0   : >> { %1899 = vmatpush3.bf16.msra.mxu0 %v2038_v59 }
  0xa1   : >> { %1900 = vmatprep.subr.bf16.mxu0 %v2060_v3 }
  0xa4   : >> { %1901 = vmatpush3.bf16.msra.mxu0 %v2039_v60 }
  0xa5   : >> { %1902 = vmatprep.subr.bf16.mxu0 %v2060_v3 }
  0xa8   : >> { %1903 = vmatpush3.bf16.msra.mxu0 %v2040_v61 }
  0xa9   : >> { %1904 = vmatprep.subr.bf16.mxu0 %v2060_v3 }
  0xac   : >> { %1905 = vmatpush3.bf16.msra.mxu0 %v2041_v62 }
  0xad   : >> { %1906 = vmatprep.subr.bf16.mxu0 %v2060_v3 }
  0xb0   : >> { %1907 = vmatpush3.bf16.msra.mxu0 %v2042_v63 }
  0xb3   : >> { %1909 = vmatmul.mubr.bf16.vlgmr.msra.gmra.mrb[0].mxu0 %v2355_v33 }
 0x165   : >> { %v675_v2 = vpop.f32.mrb[0].mxu1 }
 0x166   : >> { %v1810_v4 = vpop.f32.mrb[1].mxu1 }
 0x167   : >> { %v678_v5 = vpop.f32.mrb[2].mxu1 }
 0x168   : >> { %v1811_v6 = vpop.f32.mrb[3].mxu1 }
 0x186   : >> { %v1291_v7 = vpop.f32.mrb[0].mxu0 }
 0x187   : >> { %v1912_v8 = vadd.f32 %v1291_v7, %v675_v2  ;;  %v1910_v9 = vpop.f32.mrb[1].mxu0 }
 0x188   : >> { %v1294_v10 = vpop.f32.mrb[2].mxu0 }
 0x189   : >> { %v1306_v11 = vmul.f32 %v1912_v8, %v2098_v0  ;;  %v1913_v12 = vadd.f32 %v1294_v10, %v678_v5  ;;  %v1911_v13 = vpop.f32.mrb[3].mxu0 }
 0x18b   : >> { %v1314_v14 = vadd.f32 %v2103_v1, %v1306_v11  ;;  %v1307_v3 = vmul.f32 %v1913_v12, %v2098_v0 }
 0x18d   : >> { %v1315_v15 = vadd.f32 %v2103_v1, %v1307_v3  ;;  %v1316_v16 = vmax.f32 %v1314_v14, 0.0  ;;  %205 = sbr.rel (!%p203_p4) target bundleno = 17 (0x11), region = 85 }
 0x18f   : >> { %v1317_v17 = vmax.f32 %v1315_v15, 0.0 }
 0x191   : >> { %v1649_v18 = vpack.c.bf16 %v1317_v17, %v1316_v16 }
 0x193   : >> { %1650 = vst [vmem:[%s1328_s26] sm:$0xff] %v1649_v18  }
 0x194 PF: > { %s14_s15 = sadd.s32 1, %s2054_s15  }
 0x195   : > { %p11_p5 = scmp.ge.s32.totalorder %s14_s15, 4  }
 0x197   :  { %13 = sbr.rel (!%p11_p5) target bundleno = 1 (0x1), region = 96 }

// kernel: crnn_forward.15
= control target key start
LH: loop header
LB: loop body
LE: loop exit
PB: predicated region body
PF: predicated region fallthrough
CT: control target
= control target key end

     0   :  { %s825_s15 = smov 0   ;;  %s952_s0 = inlined_call_operand.vmem [shape: bf16[2,2,8,256], index: 0, kind: input, shape index: {}]   ;;  %s953_s1 = inlined_call_operand.vmem [shape: bf16[2,256,128], index: 1, kind: input, shape index: {}]   ;;  %s954_s2 = inlined_call_operand.vmem [shape: f32[1,128], index: 2, kind: input, shape index: {}]   ;;  %s955_s3 = inlined_call_operand.vmem [shape: f32[1,128], index: 3, kind: input, shape index: {}]   ;;  %s956_s4 = inlined_call_operand.vmem [shape: bf16[2,1,8,128], index: 4, kind: output, shape index: {}]  }
   0x1 LB: > { %s622_s16 = sadd.s32 4294967295, %s798_s15   ;;  %p626_p0 = scmp.ge.s32.totalorder %s798_s15, 1  ;;  %s798_s15 = sphi %s825_s15, %s14_s15  }
   0x2   : > { %p162_p1 = scmp.lt.s32.totalorder %s798_s15, 3 }
   0x4   : > { %p163_p2 = pnand %p626_p0, %p162_p1 }
   0x5   : > { %v756_v0 = vld [vmem:[%s953_s1 + $0xc0] sm:$0xff] (!%p163_p2)   ;;  %v760_v4 = vld [vmem:[%s953_s1 + $0xc8] sm:$0xff] (!%p163_p2)   ;;  %v764_v8 = vld [vmem:[%s953_s1 + $0xd0] sm:$0xff] (!%p163_p2)   ;;  %p187_p3 = scmp.lt.s32.totalorder (!%p163_p2), %s622_s16, 1 }
   0x6   : > { %166 = sbr.rel (%p163_p2) target bundleno = 264 (0x108), region = 36  ;;  %v757_v1 = vld [vmem:[%s953_s1 + $0x40] sm:$0xff] (!%p163_p2)   ;;  %704 = vmatprep.subr.bf16.mxu0 (!%p163_p2), %v756_v0  ;;  %v761_v5 = vld [vmem:[%s953_s1 + $0x48] sm:$0xff] (!%p163_p2)   ;;  %v765_v9 = vld [vmem:[%s953_s1 + $0x50] sm:$0xff] (!%p163_p2)  }
   0x7   : > { %v758_v2 = vld [vmem:[%s953_s1 + $0x80] sm:$0xff] (!%p163_p2)   ;;  %726 = vmatprep.subr.bf16.mxu1 (!%p163_p2), %v757_v1  ;;  %v762_v6 = vld [vmem:[%s953_s1 + $0x88] sm:$0xff] (!%p163_p2)   ;;  %v766_v10 = vld [vmem:[%s953_s1 + $0x90] sm:$0xff] (!%p163_p2)  }
   0x8   : > { %v759_v3 = vld [vmem:[%s953_s1] sm:$0xff] (!%p163_p2)   ;;  %705 = vmatpush3.bf16.msra.mxu0 (!%p163_p2), %v758_v2  ;;  %v763_v7 = vld [vmem:[%s953_s1 + $0x8] sm:$0xff] (!%p163_p2)   ;;  %v767_v11 = vld [vmem:[%s953_s1 + $0x10] sm:$0xff] (!%p163_p2)  }
   0x9   : > { %727 = vmatpush3.bf16.msra.mxu1 (!%p163_p2), %v759_v3  ;;  %706 = vmatprep.subr.bf16.mxu0 (!%p163_p2), %v760_v4  ;;  %v768_v12 = vld [vmem:[%s953_s1 + $0xd8] sm:$0xff] (!%p163_p2)   ;;  %v772_v16 = vld [vmem:[%s953_s1 + $0xe0] sm:$0xff] (!%p163_p2)   ;;  %v776_v20 = vld [vmem:[%s953_s1 + $0xe8] sm:$0xff] (!%p163_p2)  }
   0xa   : > { %728 = vmatprep.subr.bf16.mxu1 (!%p163_p2), %v761_v5  ;;  %v769_v13 = vld [vmem:[%s953_s1 + $0x58] sm:$0xff] (!%p163_p2)   ;;  %v773_v17 = vld [vmem:[%s953_s1 + $0x60] sm:$0xff] (!%p163_p2)   ;;  %v777_v21 = vld [vmem:[%s953_s1 + $0x68] sm:$0xff] (!%p163_p2)  }
   0xb   : > { %v770_v14 = vld [vmem:[%s953_s1 + $0x98] sm:$0xff] (!%p163_p2)   ;;  %v774_v18 = vld [vmem:[%s953_s1 + $0xa0] sm:$0xff] (!%p163_p2)   ;;  %v778_v22 = vld [vmem:[%s953_s1 + $0xa8] sm:$0xff] (!%p163_p2)  }
   0xc   : > { %707 = vmatpush3.bf16.msra.mxu0 (!%p163_p2), %v762_v6  ;;  %v771_v15 = vld [vmem:[%s953_s1 + $0x18] sm:$0xff] (!%p163_p2)   ;;  %v775_v19 = vld [vmem:[%s953_s1 + $0x20] sm:$0xff] (!%p163_p2)   ;;  %v779_v23 = vld [vmem:[%s953_s1 + $0x28] sm:$0xff] (!%p163_p2)  }
   0xd   : > { %729 = vmatpush3.bf16.msra.mxu1 %v763_v7  ;;  %708 = vmatprep.subr.bf16.mxu0 %v764_v8  ;;  %s958_s16 = smov (!%p187_p3, %s622_s16), 1  ;;  %v780_v24 = vld [vmem:[%s953_s1 + $0xf0] sm:$0xff]   ;;  %v784_v28 = vld [vmem:[%s953_s1 + $0xf8] sm:$0xff]   ;;  %v699_v46 = vld [vmem:[%s954_s2] ss:$0 sm:$0xff] }
   0xe   : > { %730 = vmatprep.subr.bf16.mxu1 %v765_v9  ;;  %v781_v25 = vld [vmem:[%s953_s1 + $0x70] sm:$0xff]   ;;  %s703_s23 = sshll.u32 %s958_s16, 4  ;;  %v785_v29 = vld [vmem:[%s953_s1 + $0x78] sm:$0xff]   ;;  %v700_v50 = vld [vmem:[%s955_s3] ss:$0 sm:$0xff]  ;;  %s629_s17 = sshll.u32 %s958_s16, 2 }
   0xf   : > { %v782_v26 = vld [vmem:[%s953_s1 + $0xb0] sm:$0xff]   ;;  %s191_s6 = scalar_lea.vmem %s952_s0, %s703_s23  ;;  %v786_v30 = vld [vmem:[%s953_s1 + $0xb8] sm:$0xff]   ;;  %s195_s20 = scalar_lea.vmem %s956_s4, %s629_s17 }
  0x10   : > { %709 = vmatpush3.bf16.msra.mxu0 %v766_v10  ;;  %v783_v27 = vld [vmem:[%s953_s1 + $0x30] sm:$0xff]   ;;  %v787_v31 = vld [vmem:[%s953_s1 + $0x38] sm:$0xff]   ;;  %v630_v32 = vld [vmem:[%s191_s6 + $0x8] sm:$0xff] }
  0x11   : > { %731 = vmatpush3.bf16.msra.mxu1 %v767_v11  ;;  %710 = vmatprep.subr.bf16.mxu0 %v768_v12  ;;  %v199_v33 = vld [vmem:[%s191_s6] sm:$0xff]  ;;  %v663_v34 = vcombine.low %v630_v32, %v630_v32  ;;  %v664_v35 = vcombine.high %v630_v32, %v630_v32 }
  0x12   : > { %732 = vmatprep.subr.bf16.mxu1 %v769_v13  ;;  %v681_v36 = vcombine.low %v199_v33, %v199_v33  ;;  %v682_v37 = vcombine.high %v199_v33, %v199_v33 }
  0x13   : > { %402 = vmatprep.mubr.bf16.mxu0 %v664_v35 }
  0x14   : > { %711 = vmatpush3.bf16.msra.mxu0 %v770_v14  ;;  %545 = vmatprep.mubr.bf16.mxu1 %v682_v37 }
  0x15   : > { %733 = vmatpush3.bf16.msra.mxu1 %v771_v15  ;;  %712 = vmatprep.subr.bf16.mxu0 %v772_v16 }
  0x16   : > { %734 = vmatprep.subr.bf16.mxu1 %v773_v17 }
  0x18   : > { %713 = vmatpush3.bf16.msra.mxu0 %v774_v18 }
  0x19   : > { %735 = vmatpush3.bf16.msra.mxu1 %v775_v19  ;;  %714 = vmatprep.subr.bf16.mxu0 %v776_v20 }
  0x1a   : > { %736 = vmatprep.subr.bf16.mxu1 %v777_v21 }
  0x1c   : > { %715 = vmatpush3.bf16.msra.mxu0 %v778_v22 }
  0x1d   : > { %737 = vmatpush3.bf16.msra.mxu1 %v779_v23  ;;  %716 = vmatprep.subr.bf16.mxu0 %v780_v24 }
  0x1e   : > { %738 = vmatprep.subr.bf16.mxu1 %v781_v25 }
  0x20   : > { %717 = vmatpush3.bf16.msra.mxu0 %v782_v26 }
  0x21   : > { %739 = vmatpush3.bf16.msra.mxu1 %v783_v27  ;;  %718 = vmatprep.subr.bf16.mxu0 %v784_v28 }
  0x22   : > { %740 = vmatprep.subr.bf16.mxu1 %v785_v29 }
  0x24   : > { %719 = vmatpush3.bf16.msra.mxu0 %v786_v30 }
  0x25   : > { %741 = vmatpush3.bf16.msra.mxu1 %v787_v31 }
  0x27   : > { %403 = vmatmul.mubr.bf16.vlgmr.msra.gmra.mrb[0].mxu0 %v663_v34 }
  0x28   : > { %546 = vmatmul.mubr.bf16.vlgmr.msra.gmra.mrb[0].mxu1 %v681_v36 }
  0xfa   : > { %v720_v38 = vpop.f32.mrb[0].mxu0 }
  0xfb   : > { %v742_v39 = vpop.f32.mrb[0].mxu1  ;;  %v721_v40 = vpop.f32.mrb[1].mxu0 }
  0xfc   : > { %v743_v41 = vpop.f32.mrb[1].mxu1  ;;  %v722_v42 = vadd.f32 %v721_v40, %v720_v38  ;;  %v723_v44 = vpop.f32.mrb[2].mxu0 }
  0xfd   : > { %v744_v43 = vadd.f32 %v743_v41, %v742_v39  ;;  %v745_v45 = vpop.f32.mrb[2].mxu1  ;;  %v724_v47 = vpop.f32.mrb[3].mxu0 }
  0xfe   : > { %v746_v48 = vpop.f32.mrb[3].mxu1 }
  0xff   : > { %v548_v49 = vadd.f32 %v744_v43, %v722_v42 }
 0x101   : > { %v559_v51 = vmul.f32 %v699_v46, %v548_v49 }
 0x103   : > { %v566_v52 = vadd.f32 %v700_v50, %v559_v51 }
 0x105   : > { %v567_v53 = vpack.c.bf16 %v566_v52, %v566_v52 }
 0x107   : > { %568 = vst [vmem:[%s195_s20] sm:$0xf] %v567_v53 }
 0x108 PF: > { %s14_s15 = sadd.s32 1, %s798_s15  }
 0x109   : > { %p11_p4 = scmp.ge.s32.totalorder %s14_s15, 4  }
 0x10b   :  { %13 = sbr.rel (!%p11_p4) target bundleno = 1 (0x1), region = 68 }

// kernel: crnn_forward.13
= control target key start
LH: loop header
LB: loop body
LE: loop exit
PB: predicated region body
PF: predicated region fallthrough
CT: control target
= control target key end

     0   :  { %s1986_s15 = smov 0   ;;  %s2368_s0 = inlined_call_operand.vmem [shape: bf16[2,6,10,128], index: 0, kind: input, shape index: {}]   ;;  %s2369_s1 = inlined_call_operand.vmem [shape: bf16[9,128,128], index: 1, kind: input, shape index: {}]   ;;  %s2370_s2 = inlined_call_operand.vmem [shape: f32[1,128], index: 2, kind: input, shape index: {}]   ;;  %s2371_s3 = inlined_call_operand.vmem [shape: f32[1,128], index: 3, kind: input, shape index: {}]   ;;  %s2372_s4 = inlined_call_operand.vmem [shape: bf16[2,4,8,128], index: 4, kind: output, shape index: {}]  }
   0x1 LB: > { %s1323_s16 = sadd.s32 4294967295, %s1953_s15   ;;  %p1327_p0 = scmp.ge.s32.totalorder %s1953_s15, 1  ;;  %s1953_s15 = sphi %s1986_s15, %s14_s15  }
   0x2   : > { %p162_p1 = scmp.lt.s32.totalorder %s1953_s15, 3 }
   0x4   : > { %p163_p2 = pnand %p1327_p0, %p162_p1 }
   0x5   : > { %p188_p3 = scmp.lt.s32.totalorder (!%p163_p2), %s1323_s16, 1  ;;  %v1997_v0 = vld [vmem:[%s2370_s2] ss:$0 sm:$0xff] (!%p163_p2)  ;;  %s2014_s29 = smov (!%p163_p2), 0  }
   0x6   : > { %166 = sbr.rel (%p163_p2) target bundleno = 402 (0x192), region = 36  ;;  %v2002_v1 = vld [vmem:[%s2371_s3] ss:$0 sm:$0xff] (!%p163_p2) }
   0xd   : > { %s2374_s16 = smov (!%p188_p3, %s1323_s16), 1 }
   0xe   : > { %s1846_s21 = smul.u32 48, %s2374_s16  ;;  %s1554_s22 = sshll.u32 %s2374_s16, 4 }
   0xf   : > { %s2007_s25 = scalar_lea.vmem %s2372_s4, %s1554_s22 }
  0x10   : > { %s2012_s28 = scalar_lea.vmem %s2368_s0, %s1846_s21 }
  0x11 LB: >> { %v1865_v2 = vld [vmem:[%s2369_s1 + $0x40] sm:$0xff]   ;;  %v1959_v3 = vmov 0.0   ;;  %v1867_v5 = vld [vmem:[%s2369_s1 + $0x48] sm:$0xff]   ;;  %vm1960_vm0 = vmmov 0   ;;  %v1869_v7 = vld [vmem:[%s2369_s1 + $0x50] sm:$0xff]   ;;  %s1555_s19 = sshll.u32 %s1957_s29, 3  ;;  %s1957_s29 = sphi %s2014_s29, %s206_s29  }
  0x12   : >> { %1637 = vmatprep.subr.bf16.mxu1 %v1959_v3  ;;  %1717 = vmatprep.subr.bf16.mxu0 %v1959_v3  ;;  %v1866_v4 = vld [vmem:[%s2369_s1 + $0x100] sm:$0xff]   ;;  %v1868_v6 = vld [vmem:[%s2369_s1 + $0x108] sm:$0xff]   ;;  %v1870_v8 = vld [vmem:[%s2369_s1 + $0x110] sm:$0xff]   ;;  %s2057_s22 = scalar_lea.vmem %s2012_s28, %s1555_s19 }
  0x13   : >> { %1638 = vmatpush3.bf16.msra.mxu1 %v1865_v2  ;;  %1653 = vmatprep.mubr.msk.bf16.mxu1 %vm1960_vm0, %v1959_v3  ;;  %v1871_v9 = vld [vmem:[%s2369_s1 + $0x58] sm:$0xff]   ;;  %v1873_v11 = vld [vmem:[%s2369_s1 + $0x60] sm:$0xff]   ;;  %v1875_v15 = vld [vmem:[%s2369_s1 + $0x68] sm:$0xff]  }
  0x14   : >> { %1718 = vmatpush3.bf16.msra.mxu0 %v1866_v4  ;;  %1639 = vmatprep.subr.bf16.mxu1 %v1959_v3  ;;  %v1872_v10 = vld [vmem:[%s2369_s1 + $0x118] sm:$0xff]   ;;  %v1874_v12 = vld [vmem:[%s2369_s1 + $0x120] sm:$0xff]   ;;  %v1417_v17 = vld [vmem:[%s2057_s22 + $0x8] sm:$0xf] }
  0x15   : >> { %1719 = vmatprep.subr.bf16.mxu0 %v1959_v3  ;;  %1733 = vmatprep.mubr.msk.bf16.mxu0 %vm1960_vm0, %v1959_v3  ;;  %v2068_v13 = vld [vmem:[%s2057_s22] sm:$0xf]  ;;  %v2071_v14 = vld [vmem:[%s2057_s22 + $0x4] sm:$0x1]  ;;  %v2080_v18 = vld [vmem:[%s2057_s22 + $0xc] sm:$0x1] }
  0x16   : >> { %v1349_v16 = vcombine.low %v2068_v13, %v2071_v14  ;;  %v1876_v19 = vld [vmem:[%s2369_s1 + $0x128] sm:$0xff]   ;;  %v1435_v20 = vcombine.low %v1417_v17, %v2080_v18  ;;  %v1877_v22 = vld [vmem:[%s2369_s1 + $0x70] sm:$0xff]   ;;  %v1879_v25 = vld [vmem:[%s2369_s1 + $0x78] sm:$0xff]  }
  0x17   : >> { %1640 = vmatpush3.bf16.msra.mxu1 %v1867_v5  ;;  %v1878_v24 = vld [vmem:[%s2369_s1 + $0x130] sm:$0xff]   ;;  %v1880_v30 = vld [vmem:[%s2369_s1 + $0x138] sm:$0xff]   ;;  %v1882_v32 = vld [vmem:[%s2369_s1] sm:$0xff]  }
  0x18   : >> { %1720 = vmatpush3.bf16.msra.mxu0 %v1868_v6  ;;  %1641 = vmatprep.subr.bf16.mxu1 %v1959_v3  ;;  %v253_v21 = vshll.u32 %v1349_v16, 16  ;;  %v684_v23 = vshll.u32 %v1435_v20, 16  ;;  %v251_v26 = vshrl.u32 %v1349_v16, 16  ;;  %v682_v28 = vshrl.u32 %v1435_v20, 16  ;;  %v1884_v34 = vld [vmem:[%s2369_s1 + $0x140] sm:$0xff]   ;;  %v1885_v35 = vld [vmem:[%s2369_s1 + $0x8] sm:$0xff]  }
  0x19   : >> { %1721 = vmatprep.subr.bf16.mxu0 %v1959_v3  ;;  %v1886_v36 = vld [vmem:[%s2369_s1 + $0x148] sm:$0xff]   ;;  %v1887_v37 = vld [vmem:[%s2369_s1 + $0x10] sm:$0xff]   ;;  %v1889_v39 = vld [vmem:[%s2369_s1 + $0x18] sm:$0xff]  }
  0x1a   : >> { %v255_v27 = vrot.slane %v253_v21, 1  ;;  %v686_v29 = vrot.slane %v684_v23, 1  ;;  %v1888_v38 = vld [vmem:[%s2369_s1 + $0x150] sm:$0xff]   ;;  %v1890_v40 = vld [vmem:[%s2369_s1 + $0x158] sm:$0xff]   ;;  %v1891_v41 = vld [vmem:[%s2369_s1 + $0x20] sm:$0xff]  }
  0x1b   : >> { %1642 = vmatpush3.bf16.msra.mxu1 %v1869_v7  ;;  %v1892_v42 = vld [vmem:[%s2369_s1 + $0x160] sm:$0xff]   ;;  %v1893_v43 = vld [vmem:[%s2369_s1 + $0x28] sm:$0xff]   ;;  %v1895_v47 = vld [vmem:[%s2369_s1 + $0x30] sm:$0xff]  }
  0x1c   : >> { %1722 = vmatpush3.bf16.msra.mxu0 %v1870_v8  ;;  %1643 = vmatprep.subr.bf16.mxu1 %v1959_v3  ;;  %v256_v31 = vor.u32 %v255_v27, %v251_v26  ;;  %v687_v33 = vor.u32 %v686_v29, %v682_v28  ;;  %v2152_v44 = vld [vmem:[%s2057_s22] sm:$0xe]  ;;  %v1894_v45 = vld [vmem:[%s2369_s1 + $0x168] sm:$0xff]   ;;  %v1896_v48 = vld [vmem:[%s2369_s1 + $0x170] sm:$0xff]  }
  0x1d   : >> { %1723 = vmatprep.subr.bf16.mxu0 %v1959_v3  ;;  %v1382_v46 = vcombine.low %v2152_v44, %v2071_v14  ;;  %v1444_v49 = vld [vmem:[%s2057_s22 + $0x8] sm:$0xe]  ;;  %v1897_v50 = vld [vmem:[%s2369_s1 + $0x38] sm:$0xff]   ;;  %v1899_v53 = vld [vmem:[%s2369_s1 + $0x80] sm:$0xff]  }
  0x1e   : >> { %v1461_v51 = vcombine.low %v1444_v49, %v2080_v18  ;;  %v1898_v52 = vld [vmem:[%s2369_s1 + $0x178] sm:$0xff]   ;;  %v1901_v55 = vld [vmem:[%s2369_s1 + $0x180] sm:$0xff]   ;;  %v1902_v56 = vld [vmem:[%s2369_s1 + $0x88] sm:$0xff]  }
  0x1f   : >> { %1644 = vmatpush3.bf16.msra.mxu1 %v1871_v9  ;;  %v1903_v57 = vld [vmem:[%s2369_s1 + $0x188] sm:$0xff]   ;;  %v1904_v58 = vld [vmem:[%s2369_s1 + $0x90] sm:$0xff]   ;;  %v1906_v60 = vld [vmem:[%s2369_s1 + $0x98] sm:$0xff]   ;;  %v455_v9 = vrot.slane %v1382_v46, 1 }
  0x20   : >> { %1724 = vmatpush3.bf16.msra.mxu0 %v1872_v10  ;;  %1645 = vmatprep.subr.bf16.mxu1 %v1959_v3  ;;  %v799_v54 = vrot.slane %v1461_v51, 1  ;;  %v1905_v59 = vld [vmem:[%s2369_s1 + $0x190] sm:$0xff]   ;;  %v1907_v61 = vld [vmem:[%s2369_s1 + $0x198] sm:$0xff]   ;;  %v1908_v62 = vld [vmem:[%s2369_s1 + $0xa0] sm:$0xff]  }
  0x21   : >> { %1725 = vmatprep.subr.bf16.mxu0 %v1959_v3  ;;  %v1909_v63 = vld [vmem:[%s2369_s1 + $0x1a0] sm:$0xff]   ;;  %v1910_v2 = vld [vmem:[%s2369_s1 + $0xa8] sm:$0xff]   ;;  %v1912_v5 = vld [vmem:[%s2369_s1 + $0xb0] sm:$0xff]  }
  0x22   : >> { %v1911_v4 = vld [vmem:[%s2369_s1 + $0x1a8] sm:$0xff]   ;;  %v1913_v6 = vld [vmem:[%s2369_s1 + $0x1b0] sm:$0xff]   ;;  %v1914_v7 = vld [vmem:[%s2369_s1 + $0xb8] sm:$0xff]  }
  0x23   : >> { %1646 = vmatpush3.bf16.msra.mxu1 %v1873_v11  ;;  %v1915_v8 = vld [vmem:[%s2369_s1 + $0x1b8] sm:$0xff]   ;;  %v1917_v10 = vld [vmem:[%s2369_s1 + $0xc0] sm:$0xff]   ;;  %v1471_v11 = vld [vmem:[%s2057_s22 + $0x10] sm:$0xf] }
  0x24   : >> { %1726 = vmatpush3.bf16.msra.mxu0 %v1874_v12  ;;  %1647 = vmatprep.subr.bf16.mxu1 %v1959_v3  ;;  %v1918_v12 = vld [vmem:[%s2369_s1 + $0x1c0] sm:$0xff]   ;;  %v1920_v14 = vld [vmem:[%s2369_s1 + $0x1c8] sm:$0xff]   ;;  %v1922_v16 = vld [vmem:[%s2369_s1 + $0x1d0] sm:$0xff]  }
  0x25   : >> { %1727 = vmatprep.subr.bf16.mxu0 %v1959_v3  ;;  %v1923_v17 = vld [vmem:[%s2369_s1 + $0xd8] sm:$0xff]   ;;  %v1926_v20 = vld [vmem:[%s2369_s1 + $0x1e0] sm:$0xff]   ;;  %v1496_v21 = vld [vmem:[%s2057_s22 + $0x10] sm:$0xf] }
  0x26   : >> { %v1924_v18 = vld [vmem:[%s2369_s1 + $0x1d8] sm:$0xff]   ;;  %v1927_v23 = vld [vmem:[%s2369_s1 + $0xe8] sm:$0xff]   ;;  %v1929_v26 = vld [vmem:[%s2369_s1 + $0xf0] sm:$0xff]  }
  0x27   : >> { %1648 = vmatpush3.bf16.msra.mxu1 %v1875_v15  ;;  %v1921_v15 = vld [vmem:[%s2369_s1 + $0xd0] sm:$0xff]   ;;  %v1931_v29 = vld [vmem:[%s2369_s1 + $0xf8] sm:$0xff]  }
  0x28   : >> { %1728 = vmatpush3.bf16.msra.mxu0 %v1876_v19  ;;  %1649 = vmatprep.subr.bf16.mxu1 %v1959_v3  ;;  %v1925_v19 = vld [vmem:[%s2369_s1 + $0xe0] sm:$0xff]   ;;  %v1930_v28 = vld [vmem:[%s2369_s1 + $0x1f0] sm:$0xff]   ;;  %v1941_v44 = vld [vmem:[%s2369_s1 + $0x238] sm:$0xff]  }
  0x29   : >> { %1729 = vmatprep.subr.bf16.mxu0 %v1959_v3 }
  0x2b   : >> { %1650 = vmatpush3.bf16.msra.mxu1 %v1877_v22  ;;  %v1497_v22 = vld [vmem:[%s2057_s22 + $0x14] sm:$0x1] }
  0x2c   : >> { %1730 = vmatpush3.bf16.msra.mxu0 %v1878_v24  ;;  %1651 = vmatprep.subr.bf16.mxu1 %v1959_v3  ;;  %v1514_v24 = vcombine.low %v1496_v21, %v1497_v22 }
  0x2d   : >> { %1731 = vmatprep.subr.bf16.mxu0 %v1959_v3 }
  0x2e   : >> { %v1028_v27 = vshll.u32 %v1514_v24, 16 }
  0x2f   : >> { %1652 = vmatpush3.bf16.msra.mxu1 %v1879_v25  ;;  %v1928_v25 = vld [vmem:[%s2369_s1 + $0x1e8] sm:$0xff]  }
  0x30   : >> { %1732 = vmatpush3.bf16.msra.mxu0 %v1880_v30  ;;  %1657 = vmatprep.subr.bf16.mxu1 %v1959_v3  ;;  %v1026_v30 = vshrl.u32 %v1514_v24, 16 }
  0x31   : >> { %1737 = vmatprep.subr.bf16.mxu0 %v1959_v3 }
  0x32   : >> { %1654 = vmatmul.mubr.bf16.vlgmr.msra.gmra.mrb[0].mxu1 %v256_v31  ;;  %v1030_v31 = vrot.slane %v1028_v27, 1 }
  0x33   : >> { %1658 = vmatpush3.bf16.msra.mxu1 %v1882_v32  ;;  %1734 = vmatmul.mubr.bf16.vlgmr.msra.gmra.mrb[0].mxu0 %v687_v33  ;;  %v1932_v32 = vld [vmem:[%s2369_s1 + $0x1f8] sm:$0xff]   ;;  %v1392_v33 = vld [vmem:[%s2057_s22 + $0x8] sm:$0xf] }
  0x34   : >> { %1738 = vmatpush3.bf16.msra.mxu0 %v1884_v34  ;;  %1659 = vmatprep.subr.bf16.mxu1 %v1959_v3  ;;  %v1031_v34 = vor.u32 %v1030_v31, %v1026_v30 }
  0x35   : >> { %1739 = vmatprep.subr.bf16.mxu0 %v1959_v3  ;;  %1673 = vmatprep.mubr.msk.bf16.mxu1 %vm1960_vm0, %v1959_v3 }
  0x36   : >> { %1753 = vmatprep.mubr.msk.bf16.mxu0 %vm1960_vm0, %v1959_v3 }
  0x37   : >> { %1660 = vmatpush3.bf16.msra.mxu1 %v1885_v35  ;;  %v1934_v35 = vld [vmem:[%s2369_s1 + $0x200] sm:$0xff]  }
  0x38   : >> { %1740 = vmatpush3.bf16.msra.mxu0 %v1886_v36  ;;  %1661 = vmatprep.subr.bf16.mxu1 %v1959_v3  ;;  %v1935_v36 = vld [vmem:[%s2369_s1 + $0x208] sm:$0xff]  }
  0x39   : >> { %1741 = vmatprep.subr.bf16.mxu0 %v1959_v3 }
  0x3b   : >> { %1662 = vmatpush3.bf16.msra.mxu1 %v1887_v37  ;;  %v1936_v37 = vld [vmem:[%s2369_s1 + $0x210] sm:$0xff]  }
  0x3c   : >> { %1742 = vmatpush3.bf16.msra.mxu0 %v1888_v38  ;;  %1663 = vmatprep.subr.bf16.mxu1 %v1959_v3  ;;  %v1937_v38 = vld [vmem:[%s2369_s1 + $0x218] sm:$0xff]  }
  0x3d   : >> { %1743 = vmatprep.subr.bf16.mxu0 %v1959_v3 }
  0x3f   : >> { %1664 = vmatpush3.bf16.msra.mxu1 %v1889_v39  ;;  %v1938_v39 = vld [vmem:[%s2369_s1 + $0x220] sm:$0xff]  }
  0x40   : >> { %1744 = vmatpush3.bf16.msra.mxu0 %v1890_v40  ;;  %1665 = vmatprep.subr.bf16.mxu1 %v1959_v3  ;;  %v1939_v40 = vld [vmem:[%s2369_s1 + $0x228] sm:$0xff]  }
  0x41   : >> { %1745 = vmatprep.subr.bf16.mxu0 %v1959_v3 }
  0x43   : >> { %1666 = vmatpush3.bf16.msra.mxu1 %v1891_v41  ;;  %v1940_v41 = vld [vmem:[%s2369_s1 + $0x230] sm:$0xff]  }
  0x44   : >> { %1746 = vmatpush3.bf16.msra.mxu0 %v1892_v42  ;;  %1667 = vmatprep.subr.bf16.mxu1 %v1959_v3  ;;  %v1523_v42 = vld [vmem:[%s2057_s22 + $0x10] sm:$0xe]  ;;  %s1551_s22 = sshll.u32 %s1957_s29, 2  ;;  %s206_s29 = sadd.s32 1, %s1957_s29  }
  0x45   : >> { %1747 = vmatprep.subr.bf16.mxu0 %v1959_v3  ;;  %s1251_s26 = scalar_lea.vmem %s2007_s25, %s1551_s22  ;;  %p203_p4 = scmp.ge.s32.totalorder %s206_s29, 4  }
  0x47   : >> { %1668 = vmatpush3.bf16.msra.mxu1 %v1893_v43  ;;  %v1540_v43 = vcombine.low %v1523_v42, %v1497_v22 }
  0x48   : >> { %1748 = vmatpush3.bf16.msra.mxu0 %v1894_v45  ;;  %1669 = vmatprep.subr.bf16.mxu1 %v1959_v3 }
  0x49   : >> { %1749 = vmatprep.subr.bf16.mxu0 %v1959_v3  ;;  %v1143_v45 = vrot.slane %v1540_v43, 1 }
  0x4b   : >> { %1670 = vmatpush3.bf16.msra.mxu1 %v1895_v47 }
  0x4c   : >> { %1750 = vmatpush3.bf16.msra.mxu0 %v1896_v48  ;;  %1671 = vmatprep.subr.bf16.mxu1 %v1959_v3 }
  0x4d   : >> { %1751 = vmatprep.subr.bf16.mxu0 %v1959_v3 }
  0x4f   : >> { %1672 = vmatpush3.bf16.msra.mxu1 %v1897_v50 }
  0x50   : >> { %1752 = vmatpush3.bf16.msra.mxu0 %v1898_v52  ;;  %1677 = vmatprep.subr.bf16.mxu1 %v1959_v3 }
  0x51   : >> { %1757 = vmatprep.subr.bf16.mxu0 %v1959_v3 }
  0x52   : >> { %1674 = vmatmul.mubr.bf16.vlgmr.msra.gmra.mrb[0].mxu1 %v2068_v13  ;;  %v1919_v13 = vld [vmem:[%s2369_s1 + $0xc8] sm:$0xff]  }
  0x53   : >> { %1678 = vmatpush3.bf16.msra.mxu1 %v1899_v53  ;;  %1754 = vmatmul.mubr.bf16.vlgmr.msra.gmra.mrb[0].mxu0 %v799_v54 }
  0x54   : >> { %1758 = vmatpush3.bf16.msra.mxu0 %v1901_v55  ;;  %1679 = vmatprep.subr.bf16.mxu1 %v1959_v3 }
  0x55   : >> { %1759 = vmatprep.subr.bf16.mxu0 %v1959_v3  ;;  %1693 = vmatprep.mubr.msk.bf16.mxu1 %vm1960_vm0, %v1959_v3 }
  0x56   : >> { %1773 = vmatprep.mubr.msk.bf16.mxu0 %vm1960_vm0, %v1959_v3 }
  0x57   : >> { %1680 = vmatpush3.bf16.msra.mxu1 %v1902_v56 }
  0x58   : >> { %1760 = vmatpush3.bf16.msra.mxu0 %v1903_v57  ;;  %1681 = vmatprep.subr.bf16.mxu1 %v1959_v3 }
  0x59   : >> { %1761 = vmatprep.subr.bf16.mxu0 %v1959_v3 }
  0x5b   : >> { %1682 = vmatpush3.bf16.msra.mxu1 %v1904_v58 }
  0x5c   : >> { %1762 = vmatpush3.bf16.msra.mxu0 %v1905_v59  ;;  %1683 = vmatprep.subr.bf16.mxu1 %v1959_v3 }
  0x5d   : >> { %1763 = vmatprep.subr.bf16.mxu0 %v1959_v3 }
  0x5f   : >> { %1684 = vmatpush3.bf16.msra.mxu1 %v1906_v60 }
  0x60   : >> { %1764 = vmatpush3.bf16.msra.mxu0 %v1907_v61  ;;  %1685 = vmatprep.subr.bf16.mxu1 %v1959_v3 }
  0x61   : >> { %1765 = vmatprep.subr.bf16.mxu0 %v1959_v3 }
  0x63   : >> { %1686 = vmatpush3.bf16.msra.mxu1 %v1908_v62 }
  0x64   : >> { %1766 = vmatpush3.bf16.msra.mxu0 %v1909_v63  ;;  %1687 = vmatprep.subr.bf16.mxu1 %v1959_v3 }
  0x65   : >> { %1767 = vmatprep.subr.bf16.mxu0 %v1959_v3 }
  0x67   : >> { %1688 = vmatpush3.bf16.msra.mxu1 %v1910_v2 }
  0x68   : >> { %1768 = vmatpush3.bf16.msra.mxu0 %v1911_v4  ;;  %1689 = vmatprep.subr.bf16.mxu1 %v1959_v3 }
  0x69   : >> { %1769 = vmatprep.subr.bf16.mxu0 %v1959_v3 }
  0x6b   : >> { %1690 = vmatpush3.bf16.msra.mxu1 %v1912_v5 }
  0x6c   : >> { %1770 = vmatpush3.bf16.msra.mxu0 %v1913_v6  ;;  %1691 = vmatprep.subr.bf16.mxu1 %v1959_v3 }
  0x6d   : >> { %1771 = vmatprep.subr.bf16.mxu0 %v1959_v3 }
  0x6f   : >> { %1692 = vmatpush3.bf16.msra.mxu1 %v1914_v7 }
  0x70   : >> { %1772 = vmatpush3.bf16.msra.mxu0 %v1915_v8  ;;  %1697 = vmatprep.subr.bf16.mxu1 %v1959_v3 }
  0x71   : >> { %1777 = vmatprep.subr.bf16.mxu0 %v1959_v3 }
  0x72   : >> { %1694 = vmatmul.mubr.bf16.vlgmr.msra.gmra.mrb[0].mxu1 %v455_v9 }
  0x73   : >> { %1698 = vmatpush3.bf16.msra.mxu1 %v1917_v10  ;;  %1774 = vmatmul.mubr.bf16.vlgmr.msra.gmra.mrb[0].mxu0 %v1471_v11 }
  0x74   : >> { %1778 = vmatpush3.bf16.msra.mxu0 %v1918_v12  ;;  %1699 = vmatprep.subr.bf16.mxu1 %v1959_v3 }
  0x75   : >> { %1779 = vmatprep.subr.bf16.mxu0 %v1959_v3  ;;  %1713 = vmatprep.mubr.msk.bf16.mxu1 %vm1960_vm0, %v1959_v3 }
  0x76   : >> { %1793 = vmatprep.mubr.msk.bf16.mxu0 %vm1960_vm0, %v1959_v3 }
  0x77   : >> { %1700 = vmatpush3.bf16.msra.mxu1 %v1919_v13 }
  0x78   : >> { %1780 = vmatpush3.bf16.msra.mxu0 %v1920_v14  ;;  %1701 = vmatprep.subr.bf16.mxu1 %v1959_v3 }
  0x79   : >> { %1781 = vmatprep.subr.bf16.mxu0 %v1959_v3 }
  0x7b   : >> { %1702 = vmatpush3.bf16.msra.mxu1 %v1921_v15 }
  0x7c   : >> { %1782 = vmatpush3.bf16.msra.mxu0 %v1922_v16  ;;  %1703 = vmatprep.subr.bf16.mxu1 %v1959_v3 }
  0x7d   : >> { %1783 = vmatprep.subr.bf16.mxu0 %v1959_v3 }
  0x7f   : >> { %1704 = vmatpush3.bf16.msra.mxu1 %v1923_v17 }
  0x80   : >> { %1784 = vmatpush3.bf16.msra.mxu0 %v1924_v18  ;;  %1705 = vmatprep.subr.bf16.mxu1 %v1959_v3 }
  0x81   : >> { %1785 = vmatprep.subr.bf16.mxu0 %v1959_v3 }
  0x83   : >> { %1706 = vmatpush3.bf16.msra.mxu1 %v1925_v19 }
  0x84   : >> { %1786 = vmatpush3.bf16.msra.mxu0 %v1926_v20  ;;  %1707 = vmatprep.subr.bf16.mxu1 %v1959_v3 }
  0x85   : >> { %1787 = vmatprep.subr.bf16.mxu0 %v1959_v3 }
  0x87   : >> { %1708 = vmatpush3.bf16.msra.mxu1 %v1927_v23 }
  0x88   : >> { %1788 = vmatpush3.bf16.msra.mxu0 %v1928_v25  ;;  %1709 = vmatprep.subr.bf16.mxu1 %v1959_v3 }
  0x89   : >> { %1789 = vmatprep.subr.bf16.mxu0 %v1959_v3 }
  0x8b   : >> { %1710 = vmatpush3.bf16.msra.mxu1 %v1929_v26 }
  0x8c   : >> { %1790 = vmatpush3.bf16.msra.mxu0 %v1930_v28  ;;  %1711 = vmatprep.subr.bf16.mxu1 %v1959_v3 }
  0x8d   : >> { %1791 = vmatprep.subr.bf16.mxu0 %v1959_v3 }
  0x8f   : >> { %1712 = vmatpush3.bf16.msra.mxu1 %v1931_v29 }
  0x90   : >> { %1792 = vmatpush3.bf16.msra.mxu0 %v1932_v32 }
  0x91   : >> { %1797 = vmatprep.subr.bf16.mxu0 %v1959_v3 }
  0x92   : >> { %1714 = vmatmul.mubr.bf16.vlgmr.msra.gmra.mrb[0].mxu1 %v1392_v33 }
  0x93   : >> { %1794 = vmatmul.mubr.bf16.vlgmr.msra.gmra.mrb[0].mxu0 %v1031_v34 }
  0x94   : >> { %1798 = vmatpush3.bf16.msra.mxu0 %v1934_v35  ;;  %1813 = vmatprep.mubr.msk.bf16.mxu0 %vm1960_vm0, %v1959_v3 }
  0x95   : >> { %1799 = vmatprep.subr.bf16.mxu0 %v1959_v3 }
  0x98   : >> { %1800 = vmatpush3.bf16.msra.mxu0 %v1935_v36 }
  0x99   : >> { %1801 = vmatprep.subr.bf16.mxu0 %v1959_v3 }
  0x9c   : >> { %1802 = vmatpush3.bf16.msra.mxu0 %v1936_v37 }
  0x9d   : >> { %1803 = vmatprep.subr.bf16.mxu0 %v1959_v3 }
  0xa0   : >> { %1804 = vmatpush3.bf16.msra.mxu0 %v1937_v38 }
  0xa1   : >> { %1805 = vmatprep.subr.bf16.mxu0 %v1959_v3 }
  0xa4   : >> { %1806 = vmatpush3.bf16.msra.mxu0 %v1938_v39 }
  0xa5   : >> { %1807 = vmatprep.subr.bf16.mxu0 %v1959_v3 }
  0xa8   : >> { %1808 = vmatpush3.bf16.msra.mxu0 %v1939_v40 }
  0xa9   : >> { %1809 = vmatprep.subr.bf16.mxu0 %v1959_v3 }
  0xac   : >> { %1810 = vmatpush3.bf16.msra.mxu0 %v1940_v41 }
  0xad   : >> { %1811 = vmatprep.subr.bf16.mxu0 %v1959_v3 }
  0xb0   : >> { %1812 = vmatpush3.bf16.msra.mxu0 %v1941_v44 }
  0xb3   : >> { %1814 = vmatmul.mubr.bf16.vlgmr.msra.gmra.mrb[0].mxu0 %v1143_v45 }
 0x165   : >> { %v650_v46 = vpop.f32.mrb[0].mxu1 }
 0x166   : >> { %v1715_v47 = vpop.f32.mrb[1].mxu1 }
 0x167   : >> { %v653_v48 = vpop.f32.mrb[2].mxu1 }
 0x168   : >> { %v1716_v49 = vpop.f32.mrb[3].mxu1 }
 0x186   : >> { %v1227_v50 = vpop.f32.mrb[0].mxu0 }
 0x187   : >> { %v1817_v51 = vadd.f32 %v1227_v50, %v650_v46  ;;  %v1815_v52 = vpop.f32.mrb[1].mxu0 }
 0x188   : >> { %v1230_v53 = vpop.f32.mrb[2].mxu0 }
 0x189   : >> { %v1240_v54 = vmul.f32 %v1817_v51, %v1997_v0  ;;  %v1816_v55 = vpop.f32.mrb[3].mxu0 }
 0x18b   : >> { %v1247_v56 = vadd.f32 %v2002_v1, %v1240_v54  ;;  %205 = sbr.rel (!%p203_p4) target bundleno = 17 (0x11), region = 85 }
 0x18d   : >> { %v1248_v57 = vmax.f32 %v1247_v56, 0.0 }
 0x18f   : >> { %v1249_v3 = vpack.c.bf16 %v1248_v57, %v1248_v57 }
 0x191   : >> { %1252 = vst [vmem:[%s1251_s26] sm:$0xf] %v1249_v3 }
 0x192 PF: > { %s14_s15 = sadd.s32 1, %s1953_s15  }
 0x193   : > { %p11_p5 = scmp.ge.s32.totalorder %s14_s15, 4  }
 0x195   :  { %13 = sbr.rel (!%p11_p5) target bundleno = 1 (0x1), region = 96 }

// kernel: crnn_forward.17
= control target key start
LH: loop header
LB: loop body
LE: loop exit
PB: predicated region body
PF: predicated region fallthrough
CT: control target
= control target key end

     0   :  { %s1843_s18 = smov 0   ;;  %s2156_s0 = inlined_call_operand.vmem [shape: bf16[2,10,256], index: 0, kind: input, shape index: {}]   ;;  %s2157_s1 = inlined_call_operand.vmem [shape: bf16[3,256,128], index: 1, kind: input, shape index: {}]   ;;  %s2158_s2 = inlined_call_operand.vmem [shape: bf16[3,128,128], index: 2, kind: input, shape index: {}]   ;;  %s2159_s3 = inlined_call_operand.vmem [shape: bf16[128,128], index: 3, kind: input, shape index: {}]   ;;  %s2160_s4 = inlined_call_operand.vmem [shape: f32[1,128], index: 4, kind: input, shape index: {}]   ;;  %s2161_s5 = inlined_call_operand.vmem [shape: f32[2,8,128], index: 5, kind: output, shape index: {}]  }
   0x1 LB: > { %s1313_s19 = sadd.s32 4294967295, %s1808_s18   ;;  %p1317_p0 = scmp.ge.s32.totalorder %s1808_s18, 1  ;;  %s1808_s18 = sphi %s1843_s18, %s15_s18  }
   0x2   : > { %p187_p1 = scmp.lt.s32.totalorder %s1808_s18, 3 }
   0x4   : > { %p188_p2 = pnand %p1317_p0, %p187_p1 }
   0x5   : > { %v1712_v0 = vld [vmem:[%s2157_s1 + $0xc0] sm:$0xff] (!%p188_p2)   ;;  %v1716_v4 = vld [vmem:[%s2157_s1 + $0xc8] sm:$0xff] (!%p188_p2)   ;;  %v1720_v8 = vld [vmem:[%s2157_s1 + $0xd0] sm:$0xff] (!%p188_p2)   ;;  %p214_p3 = scmp.lt.s32.totalorder (!%p188_p2), %s1313_s19, 1  ;;  %vm1812_vm0 = vmmov (!%p188_p2), 0   ;;  %vm787_vm1 = vcmask (!%p188_p2), 1043456  }
   0x6   : > { %191 = sbr.rel (%p188_p2) target bundleno = 1113 (0x459), region = 40  ;;  %v1713_v1 = vld [vmem:[%s2157_s1 + $0x40] sm:$0xff] (!%p188_p2)   ;;  %1511 = vmatprep.subr.bf16.mxu0 (!%p188_p2), %v1712_v0  ;;  %v1717_v5 = vld [vmem:[%s2157_s1 + $0x48] sm:$0xff] (!%p188_p2)   ;;  %v1721_v9 = vld [vmem:[%s2157_s1 + $0x50] sm:$0xff] (!%p188_p2)   ;;  %vm788_vm2 = vsmask.f32 (!%p188_p2), 7938 }
   0x7   : > { %v1714_v2 = vld [vmem:[%s2157_s1 + $0x80] sm:$0xff] (!%p188_p2)   ;;  %1533 = vmatprep.subr.bf16.mxu1 (!%p188_p2), %v1713_v1  ;;  %v1718_v6 = vld [vmem:[%s2157_s1 + $0x88] sm:$0xff] (!%p188_p2)   ;;  %v1722_v10 = vld [vmem:[%s2157_s1 + $0x90] sm:$0xff] (!%p188_p2)   ;;  %vm793_vm3 = vcmask (!%p188_p2), 1040384   ;;  %vm794_vm4 = vsmask.f32 (!%p188_p2), 256 }
   0x8   : > { %v1715_v3 = vld [vmem:[%s2157_s1] sm:$0xff] (!%p188_p2)   ;;  %1512 = vmatpush3.bf16.msra.mxu0 (!%p188_p2), %v1714_v2  ;;  %v1719_v7 = vld [vmem:[%s2157_s1 + $0x8] sm:$0xff] (!%p188_p2)   ;;  %v1723_v11 = vld [vmem:[%s2157_s1 + $0x10] sm:$0xff] (!%p188_p2)  }
   0x9   : > { %1534 = vmatpush3.bf16.msra.mxu1 (!%p188_p2), %v1715_v3  ;;  %1513 = vmatprep.subr.bf16.mxu0 (!%p188_p2), %v1716_v4  ;;  %v1724_v12 = vld [vmem:[%s2157_s1 + $0xd8] sm:$0xff] (!%p188_p2)   ;;  %v1728_v16 = vld [vmem:[%s2157_s1 + $0xe0] sm:$0xff] (!%p188_p2)   ;;  %v1732_v20 = vld [vmem:[%s2157_s1 + $0xe8] sm:$0xff] (!%p188_p2)   ;;  %v1810_v4 = vmov (!%p188_p2), 0.0  }
   0xa   : > { %1535 = vmatprep.subr.bf16.mxu1 (!%p188_p2), %v1717_v5  ;;  %v1725_v13 = vld [vmem:[%s2157_s1 + $0x58] sm:$0xff] (!%p188_p2)   ;;  %v1729_v17 = vld [vmem:[%s2157_s1 + $0x60] sm:$0xff] (!%p188_p2)   ;;  %v1733_v21 = vld [vmem:[%s2157_s1 + $0x68] sm:$0xff] (!%p188_p2)  }
   0xb   : > { %v1726_v14 = vld [vmem:[%s2157_s1 + $0x98] sm:$0xff] (!%p188_p2)   ;;  %v1730_v18 = vld [vmem:[%s2157_s1 + $0xa0] sm:$0xff] (!%p188_p2)   ;;  %v1734_v22 = vld [vmem:[%s2157_s1 + $0xa8] sm:$0xff] (!%p188_p2)  }
   0xc   : > { %1514 = vmatpush3.bf16.msra.mxu0 (!%p188_p2), %v1718_v6  ;;  %v1727_v15 = vld [vmem:[%s2157_s1 + $0x18] sm:$0xff] (!%p188_p2)   ;;  %v1731_v19 = vld [vmem:[%s2157_s1 + $0x20] sm:$0xff] (!%p188_p2)   ;;  %v1735_v23 = vld [vmem:[%s2157_s1 + $0x28] sm:$0xff] (!%p188_p2)   ;;  %v1811_v6 = vmov (!%p188_p2), 0  }
   0xd   : > { %1536 = vmatpush3.bf16.msra.mxu1 %v1719_v7  ;;  %1515 = vmatprep.subr.bf16.mxu0 %v1720_v8  ;;  %s2163_s19 = smov (!%p214_p3, %s1313_s19), 1  ;;  %v1736_v24 = vld [vmem:[%s2157_s1 + $0xf0] sm:$0xff]   ;;  %v1740_v28 = vld [vmem:[%s2157_s1 + $0xf8] sm:$0xff]   ;;  %v1748_v38 = vld [vmem:[%s2157_s1 + $0x140] sm:$0xff]   ;;  %771 = vst [vmem:[#allocation2] sm:$0xf] %v1811_v6 }
   0xe   : > { %1537 = vmatprep.subr.bf16.mxu1 %v1721_v9  ;;  %v1737_v25 = vld [vmem:[%s2157_s1 + $0x70] sm:$0xff]   ;;  %s1509_s28 = sshll.u32 %s2163_s19, 4  ;;  %v1741_v29 = vld [vmem:[%s2157_s1 + $0x78] sm:$0xff]   ;;  %v1749_v47 = vld [vmem:[%s2157_s1 + $0x100] sm:$0xff]   ;;  %772 = vst [vmem:[#allocation2 + $0x4] sm:$0x1] %v1811_v6 }
   0xf   : > { %v1738_v26 = vld [vmem:[%s2157_s1 + $0xb0] sm:$0xff]   ;;  %s1951_s12 = scalar_lea.vmem %s2156_s0, %s1509_s28  ;;  %v1742_v30 = vld [vmem:[%s2157_s1 + $0xb8] sm:$0xff]   ;;  %v1750_v48 = vld [vmem:[%s2157_s1 + $0x148] sm:$0xff]   ;;  %s1320_s23 = sshll.u32 %s2163_s19, 3 }
  0x10   : > { %1516 = vmatpush3.bf16.msra.mxu0 %v1722_v10  ;;  %v1739_v27 = vld [vmem:[%s2157_s1 + $0x30] sm:$0xff]   ;;  %v1743_v31 = vld [vmem:[%s2157_s1 + $0x38] sm:$0xff]   ;;  %v224_v32 = vld [vmem:[%s1951_s12] sm:$0xff]  ;;  %s222_s28 = scalar_lea.vmem %s2161_s5, %s1320_s23 }
  0x11   : > { %1538 = vmatpush3.bf16.msra.mxu1 %v1723_v11  ;;  %1517 = vmatprep.subr.bf16.mxu0 %v1724_v12  ;;  %v257_v33 = vld [vmem:[%s1951_s12 + $0x8] sm:$0x11]  ;;  %v1372_v35 = vcombine.high %v224_v32, %v224_v32  ;;  %v1371_v37 = vcombine.low %v224_v32, %v224_v32  ;;  %v1752_v50 = vld [vmem:[%s2157_s1 + $0x150] sm:$0xff]   ;;  %v1754_v52 = vld [vmem:[%s2157_s1 + $0x158] sm:$0xff]  }
  0x12   : > { %1539 = vmatprep.subr.bf16.mxu1 %v1725_v13  ;;  %v1354_v34 = vcombine.high %v224_v32, %v257_v33  ;;  %v1353_v36 = vcombine.low %v224_v32, %v257_v33  ;;  %v1751_v49 = vld [vmem:[%s2157_s1 + $0x108] sm:$0xff]   ;;  %v1753_v51 = vld [vmem:[%s2157_s1 + $0x110] sm:$0xff]   ;;  %v1755_v53 = vld [vmem:[%s2157_s1 + $0x118] sm:$0xff]  }
  0x13   : > { %583 = vmatprep.mubr.bf16.mxu1 %v1372_v35  ;;  %v591_v54 = vld [vmem:[%s1951_s12] sm:$0xee]  ;;  %v1758_v61 = vld [vmem:[%s2157_s1 + $0x168] sm:$0xff]   ;;  %v1760_v63 = vld [vmem:[%s2157_s1 + $0x170] sm:$0xff]  }
  0x14   : > { %1518 = vmatpush3.bf16.msra.mxu0 %v1726_v14  ;;  %v307_v39 = vshrl.u32 %v1354_v34, 16  ;;  %v309_v40 = vshll.u32 %v1354_v34, 16  ;;  %v300_v41 = vshrl.u32 %v1353_v36, 16  ;;  %v302_v42 = vshll.u32 %v1353_v36, 16  ;;  %v1756_v55 = vld [vmem:[%s2157_s1 + $0x160] sm:$0xff]   ;;  %v1759_v62 = vld [vmem:[%s2157_s1 + $0x128] sm:$0xff]   ;;  %vm789_vm5 = vmand %vm787_vm1, %vm788_vm2 }
  0x15   : > { %1540 = vmatpush3.bf16.msra.mxu1 %v1727_v15  ;;  %1519 = vmatprep.subr.bf16.mxu0 %v1728_v16  ;;  %v1421_v56 = vcombine.low %v591_v54, %v257_v33  ;;  %v1422_v57 = vcombine.high %v591_v54, %v257_v33  ;;  %v1757_v60 = vld [vmem:[%s2157_s1 + $0x120] sm:$0xff]   ;;  %v1761_v0 = vld [vmem:[%s2157_s1 + $0x130] sm:$0xff]   ;;  %v1762_v1 = vld [vmem:[%s2157_s1 + $0x178] sm:$0xff]  }
  0x16   : > { %1541 = vmatprep.subr.bf16.mxu1 %v1729_v17  ;;  %v311_v43 = vrot.slane %v309_v40, 1  ;;  %v304_v44 = vrot.slane %v302_v42, 1  ;;  %v1763_v2 = vld [vmem:[%s2157_s1 + $0x138] sm:$0xff]   ;;  %v1766_v3 = vld [vmem:[%s2158_s2 + $0x40] sm:$0xff]   ;;  %v1767_v5 = vld [vmem:[%s2158_s2 + $0x48] sm:$0xff]  }
  0x17   : > { %v630_v58 = vrot.slane %v1421_v56, 1  ;;  %v631_v59 = vrot.slane %v1422_v57, 1  ;;  %v1768_v7 = vld [vmem:[%s2158_s2 + $0x50] sm:$0xff]   ;;  %v1769_v8 = vld [vmem:[%s2158_s2 + $0x58] sm:$0xff]   ;;  %v1770_v9 = vld [vmem:[%s2158_s2 + $0x60] sm:$0xff]  }
  0x18   : > { %1520 = vmatpush3.bf16.msra.mxu0 %v1730_v18  ;;  %v312_v45 = vor.u32 %v311_v43, %v307_v39  ;;  %v305_v46 = vor.u32 %v304_v44, %v300_v41  ;;  %v1771_v10 = vld [vmem:[%s2158_s2 + $0x68] sm:$0xff]   ;;  %v1772_v11 = vld [vmem:[%s2158_s2 + $0x70] sm:$0xff]   ;;  %v1773_v12 = vld [vmem:[%s2158_s2 + $0x78] sm:$0xff]  }
  0x19   : > { %1542 = vmatpush3.bf16.msra.mxu1 %v1731_v19  ;;  %1521 = vmatprep.subr.bf16.mxu0 %v1732_v20  ;;  %v790_v34 = vld [vmem:[#allocation2] sm:$0xf]  ;;  %vm795_vm6 = vmand %vm793_vm3, %vm794_vm4  ;;  %v796_v35 = vld [vmem:[#allocation2 + $0x4] sm:$0x1] }
  0x1a   : > { %1543 = vmatprep.subr.bf16.mxu1 %v1733_v21  ;;  %443 = vmatprep.mubr.bf16.mxu0 %v312_v45  ;;  %v1782_v54 = vld [vmem:[%s2158_s2 + $0x38] sm:$0xff]   ;;  %v1784_v56 = vld [vmem:[%s2158_s2 + $0x88] sm:$0xff]   ;;  %v1785_v57 = vld [vmem:[%s2158_s2 + $0x90] sm:$0xff]  }
  0x1c   : > { %1522 = vmatpush3.bf16.msra.mxu0 %v1734_v22 }
  0x1d   : > { %1544 = vmatpush3.bf16.msra.mxu1 %v1735_v23  ;;  %1523 = vmatprep.subr.bf16.mxu0 %v1736_v24 }
  0x1e   : > { %1545 = vmatprep.subr.bf16.mxu1 %v1737_v25 }
  0x20   : > { %1524 = vmatpush3.bf16.msra.mxu0 %v1738_v26 }
  0x21   : > { %1546 = vmatpush3.bf16.msra.mxu1 %v1739_v27  ;;  %1525 = vmatprep.subr.bf16.mxu0 %v1740_v28 }
  0x22   : > { %1547 = vmatprep.subr.bf16.mxu1 %v1741_v29 }
  0x24   : > { %1526 = vmatpush3.bf16.msra.mxu0 %v1742_v30 }
  0x25   : > { %1548 = vmatpush3.bf16.msra.mxu1 %v1743_v31  ;;  %1555 = vmatprep.subr.bf16.mxu0 %v1748_v38 }
  0x26   : > { %1613 = vmatprep.subr.bf16.mxu1 %v1810_v4 }
  0x27   : > { %444 = vmatmul.mubr.bf16.vlgmr.msra.gmra.mrb[0].mxu0 %v305_v46  ;;  %v1775_v46 = vld [vmem:[%s2158_s2] sm:$0xff]  }
  0x28   : > { %584 = vmatmul.mubr.bf16.vlgmr.msra.gmra.mrb[0].mxu1 %v1371_v37  ;;  %1556 = vmatpush3.bf16.msra.mxu0 %v1749_v47 }
  0x29   : > { %1557 = vmatprep.subr.bf16.mxu0 %v1750_v48  ;;  %762 = vmatprep.mubr.bf16.mxu0 %v631_v59  ;;  %v1776_v48 = vld [vmem:[%s2158_s2 + $0x8] sm:$0xff]   ;;  %v1787_v59 = vld [vmem:[%s2158_s2 + $0xa0] sm:$0xff]  }
  0x2a   : > { %1614 = vmatpush3.bf16.msra.mxu1 %v1766_v3  ;;  %1629 = vmatprep.mubr.msk.bf16.mxu1 %vm1812_vm0, %v1810_v4 }
  0x2b   : > { %1615 = vmatprep.subr.bf16.mxu1 %v1810_v4 }
  0x2c   : > { %1558 = vmatpush3.bf16.msra.mxu0 %v1751_v49  ;;  %v1777_v49 = vld [vmem:[%s2158_s2 + $0x10] sm:$0xff]  }
  0x2d   : > { %1559 = vmatprep.subr.bf16.mxu0 %v1752_v50  ;;  %v1778_v50 = vld [vmem:[%s2158_s2 + $0x18] sm:$0xff]  }
  0x2e   : > { %1616 = vmatpush3.bf16.msra.mxu1 %v1767_v5 }
  0x2f   : > { %1617 = vmatprep.subr.bf16.mxu1 %v1810_v4 }
  0x30   : > { %1560 = vmatpush3.bf16.msra.mxu0 %v1753_v51  ;;  %v1779_v51 = vld [vmem:[%s2158_s2 + $0x20] sm:$0xff]  }
  0x31   : > { %1561 = vmatprep.subr.bf16.mxu0 %v1754_v52  ;;  %v1780_v52 = vld [vmem:[%s2158_s2 + $0x28] sm:$0xff]  }
  0x32   : > { %1618 = vmatpush3.bf16.msra.mxu1 %v1768_v7  ;;  %v1792_v7 = vld [vmem:[%s2159_s3] sm:$0xff]  }
  0x33   : > { %1619 = vmatprep.subr.bf16.mxu1 %v1810_v4 }
  0x34   : > { %1562 = vmatpush3.bf16.msra.mxu0 %v1755_v53  ;;  %v1781_v53 = vld [vmem:[%s2158_s2 + $0x30] sm:$0xff]  }
  0x35   : > { %1563 = vmatprep.subr.bf16.mxu0 %v1756_v55  ;;  %v1783_v55 = vld [vmem:[%s2158_s2 + $0x80] sm:$0xff]  }
  0x36   : > { %1620 = vmatpush3.bf16.msra.mxu1 %v1769_v8  ;;  %v1793_v8 = vld [vmem:[%s2159_s3 + $0x8] sm:$0xff]  }
  0x37   : > { %1621 = vmatprep.subr.bf16.mxu1 %v1810_v4 }
  0x38   : > { %1564 = vmatpush3.bf16.msra.mxu0 %v1757_v60  ;;  %v1788_v60 = vld [vmem:[%s2158_s2 + $0xa8] sm:$0xff]  }
  0x39   : > { %1565 = vmatprep.subr.bf16.mxu0 %v1758_v61  ;;  %v1789_v61 = vld [vmem:[%s2158_s2 + $0xb0] sm:$0xff]  }
  0x3a   : > { %1622 = vmatpush3.bf16.msra.mxu1 %v1770_v9  ;;  %v1794_v9 = vld [vmem:[%s2159_s3 + $0x10] sm:$0xff]  }
  0x3b   : > { %1623 = vmatprep.subr.bf16.mxu1 %v1810_v4 }
  0x3c   : > { %1566 = vmatpush3.bf16.msra.mxu0 %v1759_v62 }
  0x3d   : > { %1567 = vmatprep.subr.bf16.mxu0 %v1760_v63  ;;  %v1790_v63 = vld [vmem:[%s2158_s2 + $0xb8] sm:$0xff]  }
  0x3e   : > { %1624 = vmatpush3.bf16.msra.mxu1 %v1771_v10 }
  0x3f   : > { %1625 = vmatprep.subr.bf16.mxu1 %v1810_v4 }
  0x40   : > { %1568 = vmatpush3.bf16.msra.mxu0 %v1761_v0 }
  0x41   : > { %1569 = vmatprep.subr.bf16.mxu0 %v1762_v1 }
  0x42   : > { %1626 = vmatpush3.bf16.msra.mxu1 %v1772_v11 }
  0x43   : > { %1627 = vmatprep.subr.bf16.mxu1 %v1810_v4 }
  0x44   : > { %1570 = vmatpush3.bf16.msra.mxu0 %v1763_v2 }
  0x45   : > { %1673 = vmatprep.subr.bf16.mxu0 %v1810_v4 }
  0x46   : > { %1628 = vmatpush3.bf16.msra.mxu1 %v1773_v12 }
  0x47   : > { %763 = vmatmul.mubr.bf16.vlgmr.msra.gmra.mrb[4].mxu0 %v630_v58  ;;  %1633 = vmatprep.subr.bf16.mxu1 %v1810_v4  ;;  %v1786_v58 = vld [vmem:[%s2158_s2 + $0x98] sm:$0xff]  }
  0x48   : > { %1689 = vmatprep.mubr.msk.bf16.mxu0 %vm1812_vm0, %v1810_v4  ;;  %1674 = vmatpush3.bf16.msra.mxu0 %v1792_v7 }
  0x49   : > { %1675 = vmatprep.subr.bf16.mxu0 %v1810_v4 }
  0x4c   : > { %1676 = vmatpush3.bf16.msra.mxu0 %v1793_v8 }
  0x4d   : > { %1677 = vmatprep.subr.bf16.mxu0 %v1810_v4 }
  0x50   : > { %1678 = vmatpush3.bf16.msra.mxu0 %v1794_v9 }
  0x51   : > { %1679 = vmatprep.subr.bf16.mxu0 %v1810_v4 }
  0xfa   : > { %v1527_v18 = vpop.f32.mrb[0].mxu0 }
  0xfb   : > { %v1549_v13 = vpop.f32.mrb[0].mxu1  ;;  %v1528_v19 = vpop.f32.mrb[1].mxu0 }
  0xfc   : > { %v1550_v14 = vpop.f32.mrb[1].mxu1  ;;  %v1529_v20 = vadd.f32 %v1528_v19, %v1527_v18  ;;  %v1530_v21 = vpop.f32.mrb[2].mxu0  ;;  %v1799_v18 = vld [vmem:[%s2159_s3 + $0x38] sm:$0xff]  }
  0xfd   : > { %v1551_v15 = vadd.f32 %v1550_v14, %v1549_v13  ;;  %v1552_v16 = vpop.f32.mrb[2].mxu1  ;;  %v1531_v22 = vpop.f32.mrb[3].mxu0  ;;  %v1795_v14 = vld [vmem:[%s2159_s3 + $0x18] sm:$0xff]  }
  0xfe   : > { %v1553_v17 = vpop.f32.mrb[3].mxu1  ;;  %1680 = vmatpush3.bf16.msra.mxu0 %v1795_v14  ;;  %v1797_v16 = vld [vmem:[%s2159_s3 + $0x28] sm:$0xff]  }
  0xff   : > { %v586_v23 = vadd.f32 %v1551_v15, %v1529_v20  ;;  %1681 = vmatprep.subr.bf16.mxu0 %v1810_v4  ;;  %v1796_v15 = vld [vmem:[%s2159_s3 + $0x20] sm:$0xff]   ;;  %v1798_v17 = vld [vmem:[%s2159_s3 + $0x30] sm:$0xff]  }
 0x102   : > { %1682 = vmatpush3.bf16.msra.mxu0 %v1796_v15 }
 0x103   : > { %1683 = vmatprep.subr.bf16.mxu0 %v1810_v4 }
 0x106   : > { %1684 = vmatpush3.bf16.msra.mxu0 %v1797_v16 }
 0x107   : > { %1685 = vmatprep.subr.bf16.mxu0 %v1810_v4 }
 0x10a   : > { %1686 = vmatpush3.bf16.msra.mxu0 %v1798_v17 }
 0x10b   : > { %1687 = vmatprep.subr.bf16.mxu0 %v1810_v4 }
 0x10e   : > { %1688 = vmatpush3.bf16.msra.mxu0 %v1799_v18 }
 0x11a   : > { %v1571_v24 = vpop.f32.mrb[4].mxu0 }
 0x11b   : > { %v1572_v25 = vpop.f32.mrb[5].mxu0 }
 0x11c   : > { %v1573_v26 = vadd.f32 %v1572_v25, %v1571_v24  ;;  %v1574_v27 = vpop.f32.mrb[6].mxu0  ;;  %v1498_v25 = vld [vmem:[%s2160_s4] ss:$0 sm:$0xff] }
 0x11d   : > { %v1575_v28 = vpop.f32.mrb[7].mxu0 }
 0x11e   : > { %v770_v29 = vadd.f32 %v1573_v26, %v586_v23 }
 0x120   : > { %v1510_v30 = vpack.c.bf16 %v770_v29, %v770_v29 }
 0x122   : > { %v778_v31 = vshrl.u32 %v1510_v30, 16  ;;  %v781_v33 = vshll.u32 %v1510_v30, 16 }
 0x124   : > { %v780_v32 = vrot.slane %v778_v31, 7 }
 0x126   : > { %v783_v36 = vor.u32 %v781_v33, %v780_v32  ;;  %v784_v37 = vrot.slane %v780_v32, 4 }
 0x128   : > { %v791_v38 = vsel %vm789_vm5, %v783_v36, %v790_v34  ;;  %v797_v39 = vsel %vm795_vm6, %v784_v37, %v796_v35 }
 0x129   : > { %792 = vst [vmem:[#allocation2] sm:$0xf] %v791_v38  ;;  %798 = vst [vmem:[#allocation2 + $0x4] sm:$0x1] %v797_v39 }
 0x130   : > { %v799_v40 = vld [vmem:[#allocation2] sm:$0xf]  ;;  %v816_v41 = vld [vmem:[#allocation2 + $0x4] sm:$0x1] }
 0x131   : > { %v1456_v42 = vcombine.low %v799_v40, %v816_v41  ;;  %v1023_v62 = vld [vmem:[#allocation2] sm:$0xe] }
 0x132   : > { %v1489_v0 = vcombine.low %v1023_v62, %v816_v41 }
 0x133   : > { %v842_v43 = vshll.u32 %v1456_v42, 16  ;;  %v840_v44 = vshrl.u32 %v1456_v42, 16 }
 0x134   : > { %v1044_v1 = vrot.slane %v1489_v0, 1 }
 0x135   : > { %v844_v45 = vrot.slane %v842_v43, 1 }
 0x137   : > { %v845_v47 = vor.u32 %v844_v45, %v840_v44 }
 0x139   : > { %1630 = vmatmul.mubr.bf16.vlgmr.msra.gmra.mrb[4].mxu1 %v845_v47 }
 0x13a   : > { %1634 = vmatpush3.bf16.msra.mxu1 %v1775_v46  ;;  %1649 = vmatprep.mubr.msk.bf16.mxu1 %vm1812_vm0, %v1810_v4 }
 0x13b   : > { %1635 = vmatprep.subr.bf16.mxu1 %v1810_v4 }
 0x13e   : > { %1636 = vmatpush3.bf16.msra.mxu1 %v1776_v48 }
 0x13f   : > { %1637 = vmatprep.subr.bf16.mxu1 %v1810_v4 }
 0x142   : > { %1638 = vmatpush3.bf16.msra.mxu1 %v1777_v49 }
 0x143   : > { %1639 = vmatprep.subr.bf16.mxu1 %v1810_v4 }
 0x146   : > { %1640 = vmatpush3.bf16.msra.mxu1 %v1778_v50 }
 0x147   : > { %1641 = vmatprep.subr.bf16.mxu1 %v1810_v4 }
 0x14a   : > { %1642 = vmatpush3.bf16.msra.mxu1 %v1779_v51 }
 0x14b   : > { %1643 = vmatprep.subr.bf16.mxu1 %v1810_v4 }
 0x14e   : > { %1644 = vmatpush3.bf16.msra.mxu1 %v1780_v52 }
 0x14f   : > { %1645 = vmatprep.subr.bf16.mxu1 %v1810_v4 }
 0x152   : > { %1646 = vmatpush3.bf16.msra.mxu1 %v1781_v53 }
 0x153   : > { %1647 = vmatprep.subr.bf16.mxu1 %v1810_v4 }
 0x156   : > { %1648 = vmatpush3.bf16.msra.mxu1 %v1782_v54 }
 0x157   : > { %1653 = vmatprep.subr.bf16.mxu1 %v1810_v4 }
 0x159   : > { %1650 = vmatmul.mubr.bf16.vlgmr.msra.gmra.mrb[4].mxu1 %v799_v40 }
 0x15a   : > { %1654 = vmatpush3.bf16.msra.mxu1 %v1783_v55  ;;  %1669 = vmatprep.mubr.msk.bf16.mxu1 %vm1812_vm0, %v1810_v4 }
 0x15b   : > { %1655 = vmatprep.subr.bf16.mxu1 %v1810_v4 }
 0x15e   : > { %1656 = vmatpush3.bf16.msra.mxu1 %v1784_v56 }
 0x15f   : > { %1657 = vmatprep.subr.bf16.mxu1 %v1810_v4 }
 0x162   : > { %1658 = vmatpush3.bf16.msra.mxu1 %v1785_v57 }
 0x163   : > { %1659 = vmatprep.subr.bf16.mxu1 %v1810_v4 }
 0x166   : > { %1660 = vmatpush3.bf16.msra.mxu1 %v1786_v58 }
 0x167   : > { %1661 = vmatprep.subr.bf16.mxu1 %v1810_v4 }
 0x16a   : > { %1662 = vmatpush3.bf16.msra.mxu1 %v1787_v59 }
 0x16b   : > { %1663 = vmatprep.subr.bf16.mxu1 %v1810_v4 }
 0x16e   : > { %1664 = vmatpush3.bf16.msra.mxu1 %v1788_v60 }
 0x16f   : > { %1665 = vmatprep.subr.bf16.mxu1 %v1810_v4 }
 0x172   : > { %1666 = vmatpush3.bf16.msra.mxu1 %v1789_v61 }
 0x173   : > { %1667 = vmatprep.subr.bf16.mxu1 %v1810_v4 }
 0x176   : > { %1668 = vmatpush3.bf16.msra.mxu1 %v1790_v63 }
 0x179   : > { %1670 = vmatmul.mubr.bf16.vlgmr.msra.gmra.mrb[4].mxu1 %v1044_v1 }
 0x24c   : > { %v1128_v2 = vpop.f32.mrb[4].mxu1 }
 0x24d   : > { %1135 = vadd.xlane.f32.xlu0 %v1128_v2  ;;  %v1671_v3 = vpop.f32.mrb[5].mxu1 }
 0x24e   : > { %v1131_v5 = vpop.f32.mrb[6].mxu1 }
 0x24f   : > { %v1672_v6 = vpop.f32.mrb[7].mxu1 }
 0x2da   : > { %v1136_v10 = vpop.xlane.xlu0 %1135 }
 0x2db   : > { %v1138_v11 = vmul.f32 0.0078125, %v1136_v10 }
 0x2dd   : > { %v1139_v12 = vsub.f32 %v1128_v2, %v1138_v11 }
 0x2df   : > { %v1140_v13 = vmul.f32 %v1139_v12, %v1139_v12 }
 0x2e1   : > { %1141 = vadd.xlane.f32.xlu0 %v1140_v13 }
 0x36e   : > { %v1142_v19 = vpop.xlane.xlu0 %1141 }
 0x36f   : > { %v1143_v20 = vmul.f32 0.0078125, %v1142_v19 }
 0x371   : > { %v1144_v21 = vadd.f32 1e-05, %v1143_v20 }
 0x373   : > { %1800 = vrsqrt.f32 %v1144_v21 }
 0x37d   : > { %v1801_v22 = vpop.eup %1800 }
 0x37e   : > { %v1146_v23 = vmul.f32 %v1801_v22, %v1139_v12 }
 0x380   : > { %v1147_v24 = vpack.c.bf16 %v1146_v23, %v1146_v23 }
 0x382   : > { %1690 = vmatmul.mubr.bf16.vlgmr.msra.gmra.mrb[8].mxu0 %v1147_v24 }
 0x455   : > { %v1253_v26 = vpop.f32.mrb[8].mxu0 }
 0x456   : > { %v1254_v4 = vadd.f32 %v1498_v25, %v1253_v26  ;;  %v1691_v27 = vpop.f32.mrb[9].mxu0 }
 0x457   : > { %v1256_v28 = vpop.f32.mrb[10].mxu0 }
 0x458   : > { %1259 = vst [vmem:[%s222_s28] sm:$0xff] %v1254_v4  ;;  %v1692_v29 = vpop.f32.mrb[11].mxu0 }
 0x459 PF: > { %s15_s18 = sadd.s32 1, %s1808_s18  }
 0x45a   : > { %p12_p4 = scmp.ge.s32.totalorder %s15_s18, 4  }
 0x45c   :  { %14 = sbr.rel (!%p12_p4) target bundleno = 1 (0x1), region = 74 }

// kernel: crnn_forward.16
= control target key start
LH: loop header
LB: loop body
LE: loop exit
PB: predicated region body
PF: predicated region fallthrough
CT: control target
= control target key end

     0   :  { %s2208_s15 = smov 0   ;;  %s2709_s0 = inlined_call_operand.vmem [shape: bf16[2,3,10,128], index: 0, kind: input, shape index: {}]   ;;  %s2710_s1 = inlined_call_operand.vmem [shape: bf16[9,128,256], index: 1, kind: input, shape index: {}]   ;;  %s2711_s2 = inlined_call_operand.vmem [shape: f32[1,256], index: 2, kind: input, shape index: {}]   ;;  %s2712_s3 = inlined_call_operand.vmem [shape: f32[1,256], index: 3, kind: input, shape index: {}]   ;;  %s2713_s4 = inlined_call_operand.vmem [shape: bf16[2,1,8,256], index: 4, kind: output, shape index: {}]  }
   0x1 LB: > { %s1613_s16 = sadd.s32 4294967295, %s2180_s15   ;;  %p1617_p0 = scmp.ge.s32.totalorder %s2180_s15, 1  ;;  %s2180_s15 = sphi %s2208_s15, %s14_s15  }
   0x2   : > { %p162_p1 = scmp.lt.s32.totalorder %s2180_s15, 3 }
   0x4   : > { %p163_p2 = pnand %p1617_p0, %p162_p1 }
   0x5   : > { %v1952_v0 = vld [vmem:[%s2710_s1 + $0x84] ss:$8 sps:$4 sm:$0xff] (!%p163_p2)   ;;  %v2182_v2 = vmov (!%p163_p2), 0   ;;  %v1956_v3 = vld [vmem:[%s2710_s1 + $0x80] ss:$8 sps:$4 sm:$0xff] (!%p163_p2)   ;;  %p188_p3 = scmp.lt.s32.totalorder (!%p163_p2), %s1613_s16, 1 }
   0x6   : > { %166 = sbr.rel (%p163_p2) target bundleno = 389 (0x185), region = 36  ;;  %v1954_v1 = vld [vmem:[%s2710_s1 + $0x204] ss:$8 sps:$4 sm:$0xff] (!%p163_p2)   ;;  %361 = vmatprep.mubr.bf16.mxu1 (!%p163_p2), %v2182_v2  ;;  %923 = vmatprep.mubr.bf16.mxu0 (!%p163_p2), %v2182_v2  ;;  %v1957_v4 = vld [vmem:[%s2710_s1 + $0x200] ss:$8 sps:$4 sm:$0xff] (!%p163_p2)  }
   0x7   : > { %329 = vmatprep.subr.bf16.mxu1 (!%p163_p2), %v1952_v0  ;;  %891 = vmatprep.subr.bf16.mxu0 (!%p163_p2), %v1954_v1  ;;  %v1958_v5 = vld [vmem:[%s2710_s1 + $0x94] ss:$8 sps:$4 sm:$0xff] (!%p163_p2)   ;;  %v1962_v7 = vld [vmem:[%s2710_s1 + $0x90] ss:$8 sps:$4 sm:$0xff] (!%p163_p2)   ;;  %v1964_v9 = vld [vmem:[%s2710_s1 + $0xa4] ss:$8 sps:$4 sm:$0xff] (!%p163_p2)  }
   0x8   : > { %330 = vmatpush1.bf16.msra.mxu1 (!%p163_p2), %v1956_v3  ;;  %892 = vmatpush1.bf16.msra.mxu0 (!%p163_p2), %v1957_v4  ;;  %v1960_v6 = vld [vmem:[%s2710_s1 + $0x214] ss:$8 sps:$4 sm:$0xff] (!%p163_p2)   ;;  %v1963_v8 = vld [vmem:[%s2710_s1 + $0x210] ss:$8 sps:$4 sm:$0xff] (!%p163_p2)   ;;  %v1966_v10 = vld [vmem:[%s2710_s1 + $0x224] ss:$8 sps:$4 sm:$0xff] (!%p163_p2)  }
   0x9   : > { %331 = vmatprep.subr.bf16.mxu1 (!%p163_p2), %v1958_v5  ;;  %893 = vmatprep.subr.bf16.mxu0 (!%p163_p2), %v1960_v6  ;;  %v1968_v11 = vld [vmem:[%s2710_s1 + $0xa0] ss:$8 sps:$4 sm:$0xff] (!%p163_p2)   ;;  %v1970_v13 = vld [vmem:[%s2710_s1 + $0xb4] ss:$8 sps:$4 sm:$0xff] (!%p163_p2)   ;;  %v1974_v15 = vld [vmem:[%s2710_s1 + $0xb0] ss:$8 sps:$4 sm:$0xff] (!%p163_p2)  }
   0xa   : > { %v1969_v12 = vld [vmem:[%s2710_s1 + $0x220] ss:$8 sps:$4 sm:$0xff] (!%p163_p2)   ;;  %v1972_v14 = vld [vmem:[%s2710_s1 + $0x234] ss:$8 sps:$4 sm:$0xff] (!%p163_p2)   ;;  %v1975_v16 = vld [vmem:[%s2710_s1 + $0x230] ss:$8 sps:$4 sm:$0xff] (!%p163_p2)  }
   0xb   : > { %v1976_v17 = vld [vmem:[%s2710_s1 + $0xc4] ss:$8 sps:$4 sm:$0xff] (!%p163_p2)   ;;  %v1980_v19 = vld [vmem:[%s2710_s1 + $0xc0] ss:$8 sps:$4 sm:$0xff] (!%p163_p2)   ;;  %v1982_v21 = vld [vmem:[%s2710_s1 + $0xd4] ss:$8 sps:$4 sm:$0xff] (!%p163_p2)  }
   0xc   : > { %332 = vmatpush1.bf16.msra.mxu1 (!%p163_p2), %v1962_v7  ;;  %894 = vmatpush1.bf16.msra.mxu0 (!%p163_p2), %v1963_v8  ;;  %v1978_v18 = vld [vmem:[%s2710_s1 + $0x244] ss:$8 sps:$4 sm:$0xff] (!%p163_p2)   ;;  %v1981_v20 = vld [vmem:[%s2710_s1 + $0x240] ss:$8 sps:$4 sm:$0xff] (!%p163_p2)   ;;  %v1984_v22 = vld [vmem:[%s2710_s1 + $0x254] ss:$8 sps:$4 sm:$0xff] (!%p163_p2)  }
   0xd   : > { %333 = vmatprep.subr.bf16.mxu1 %v1964_v9  ;;  %895 = vmatprep.subr.bf16.mxu0 %v1966_v10  ;;  %s2715_s16 = smov (!%p188_p3, %s1613_s16), 1  ;;  %v1986_v23 = vld [vmem:[%s2710_s1 + $0xd0] ss:$8 sps:$4 sm:$0xff]   ;;  %v1988_v25 = vld [vmem:[%s2710_s1 + $0xe4] ss:$8 sps:$4 sm:$0xff]  }
   0xe   : > { %s1942_s11 = smul.u32 24, %s2715_s16  ;;  %v1987_v24 = vld [vmem:[%s2710_s1 + $0x250] ss:$8 sps:$4 sm:$0xff]   ;;  %v1990_v26 = vld [vmem:[%s2710_s1 + $0x264] ss:$8 sps:$4 sm:$0xff]   ;;  %s1910_s8 = sshll.u32 %s2715_s16, 3 }
   0xf   : > { %v1992_v27 = vld [vmem:[%s2710_s1 + $0xe0] ss:$8 sps:$4 sm:$0xff]   ;;  %v1994_v29 = vld [vmem:[%s2710_s1 + $0xf4] ss:$8 sps:$4 sm:$0xff]   ;;  %v1998_v37 = vld [vmem:[%s2710_s1 + $0xf0] ss:$8 sps:$4 sm:$0xff]  }
  0x10   : > { %334 = vmatpush1.bf16.msra.mxu1 %v1968_v11  ;;  %896 = vmatpush1.bf16.msra.mxu0 %v1969_v12  ;;  %s2306_s24 = scalar_lea.vmem %s2709_s0, %s1942_s11  ;;  %v1993_v28 = vld [vmem:[%s2710_s1 + $0x260] ss:$8 sps:$4 sm:$0xff]   ;;  %v1996_v30 = vld [vmem:[%s2710_s1 + $0x274] ss:$8 sps:$4 sm:$0xff]   ;;  %v1999_v40 = vld [vmem:[%s2710_s1 + $0x270] ss:$8 sps:$4 sm:$0xff]   ;;  %s197_s11 = scalar_lea.vmem %s2713_s4, %s1910_s8 }
  0x11   : > { %335 = vmatprep.subr.bf16.mxu1 %v1970_v13  ;;  %897 = vmatprep.subr.bf16.mxu0 %v1972_v14  ;;  %v2321_v31 = vld [vmem:[%s2306_s24] sm:$0xf]  ;;  %v2324_v32 = vld [vmem:[%s2306_s24 + $0x4] sm:$0x1]  ;;  %v1736_v33 = vld [vmem:[%s2306_s24 + $0x8] sm:$0xf] }
  0x12   : > { %v1637_v34 = vcombine.low %v2321_v31, %v2324_v32  ;;  %v2330_v35 = vld [vmem:[%s2306_s24 + $0xc] sm:$0x1]  ;;  %v2000_v47 = vld [vmem:[%s2710_s1] ss:$8 sps:$4 sm:$0xff]   ;;  %v2010_v51 = vld [vmem:[%s2710_s1 + $0x14] ss:$8 sps:$4 sm:$0xff]  }
  0x13   : > { %v1754_v36 = vcombine.low %v1736_v33, %v2330_v35  ;;  %v2002_v43 = vld [vmem:[%s2710_s1 + $0x4] ss:$8 sps:$4 sm:$0xff]   ;;  %v2003_v48 = vld [vmem:[%s2710_s1 + $0x280] ss:$8 sps:$4 sm:$0xff]   ;;  %v2013_v52 = vld [vmem:[%s2710_s1 + $0x294] ss:$8 sps:$4 sm:$0xff]  }
  0x14   : > { %336 = vmatpush1.bf16.msra.mxu1 %v1974_v15  ;;  %898 = vmatpush1.bf16.msra.mxu0 %v1975_v16  ;;  %v242_v38 = vshrl.u32 %v1637_v34, 16  ;;  %v244_v39 = vshll.u32 %v1637_v34, 16  ;;  %v2005_v44 = vld [vmem:[%s2710_s1 + $0x284] ss:$8 sps:$4 sm:$0xff]   ;;  %v2008_v53 = vld [vmem:[%s2710_s1 + $0x10] ss:$8 sps:$4 sm:$0xff]  }
  0x15   : > { %337 = vmatprep.subr.bf16.mxu1 %v1976_v17  ;;  %899 = vmatprep.subr.bf16.mxu0 %v1978_v18  ;;  %v804_v41 = vshrl.u32 %v1754_v36, 16  ;;  %v806_v42 = vshll.u32 %v1754_v36, 16  ;;  %v2011_v54 = vld [vmem:[%s2710_s1 + $0x290] ss:$8 sps:$4 sm:$0xff]   ;;  %v2016_v55 = vld [vmem:[%s2710_s1 + $0x24] ss:$8 sps:$4 sm:$0xff]  }
  0x16   : > { %v246_v45 = vrot.slane %v244_v39, 1  ;;  %v2019_v56 = vld [vmem:[%s2710_s1 + $0x2a4] ss:$8 sps:$4 sm:$0xff]   ;;  %v2014_v57 = vld [vmem:[%s2710_s1 + $0x20] ss:$8 sps:$4 sm:$0xff]  }
  0x17   : > { %v808_v46 = vrot.slane %v806_v42, 1  ;;  %v2017_v58 = vld [vmem:[%s2710_s1 + $0x2a0] ss:$8 sps:$4 sm:$0xff]   ;;  %v2022_v59 = vld [vmem:[%s2710_s1 + $0x34] ss:$8 sps:$4 sm:$0xff]  }
  0x18   : > { %338 = vmatpush1.bf16.msra.mxu1 %v1980_v19  ;;  %900 = vmatpush1.bf16.msra.mxu0 %v1981_v20  ;;  %v247_v49 = vor.u32 %v246_v45, %v242_v38  ;;  %v2025_v60 = vld [vmem:[%s2710_s1 + $0x2b4] ss:$8 sps:$4 sm:$0xff]   ;;  %v2020_v61 = vld [vmem:[%s2710_s1 + $0x30] ss:$8 sps:$4 sm:$0xff]   ;;  %v2028_v63 = vld [vmem:[%s2710_s1 + $0x44] ss:$8 sps:$4 sm:$0xff]  }
  0x19   : > { %339 = vmatprep.subr.bf16.mxu1 %v1982_v21  ;;  %901 = vmatprep.subr.bf16.mxu0 %v1984_v22  ;;  %v809_v50 = vor.u32 %v808_v46, %v804_v41  ;;  %v2023_v62 = vld [vmem:[%s2710_s1 + $0x2b0] ss:$8 sps:$4 sm:$0xff]   ;;  %v2031_v0 = vld [vmem:[%s2710_s1 + $0x2c4] ss:$8 sps:$4 sm:$0xff]   ;;  %v2026_v1 = vld [vmem:[%s2710_s1 + $0x40] ss:$8 sps:$4 sm:$0xff]  }
  0x1a   : > { %v2029_v3 = vld [vmem:[%s2710_s1 + $0x2c0] ss:$8 sps:$4 sm:$0xff]   ;;  %v2034_v4 = vld [vmem:[%s2710_s1 + $0x54] ss:$8 sps:$4 sm:$0xff]   ;;  %v2032_v6 = vld [vmem:[%s2710_s1 + $0x50] ss:$8 sps:$4 sm:$0xff]  }
  0x1b   : > { %v2037_v5 = vld [vmem:[%s2710_s1 + $0x2d4] ss:$8 sps:$4 sm:$0xff]   ;;  %v2035_v7 = vld [vmem:[%s2710_s1 + $0x2d0] ss:$8 sps:$4 sm:$0xff]   ;;  %v2040_v8 = vld [vmem:[%s2710_s1 + $0x64] ss:$8 sps:$4 sm:$0xff]  }
  0x1c   : > { %340 = vmatpush1.bf16.msra.mxu1 %v1986_v23  ;;  %902 = vmatpush1.bf16.msra.mxu0 %v1987_v24  ;;  %v2043_v9 = vld [vmem:[%s2710_s1 + $0x2e4] ss:$8 sps:$4 sm:$0xff]   ;;  %v2038_v10 = vld [vmem:[%s2710_s1 + $0x60] ss:$8 sps:$4 sm:$0xff]   ;;  %v2046_v13 = vld [vmem:[%s2710_s1 + $0x74] ss:$8 sps:$4 sm:$0xff]  }
  0x1d   : > { %341 = vmatprep.subr.bf16.mxu1 %v1988_v25  ;;  %903 = vmatprep.subr.bf16.mxu0 %v1990_v26  ;;  %v2041_v11 = vld [vmem:[%s2710_s1 + $0x2e0] ss:$8 sps:$4 sm:$0xff]   ;;  %v2049_v14 = vld [vmem:[%s2710_s1 + $0x2f4] ss:$8 sps:$4 sm:$0xff]   ;;  %v2044_v15 = vld [vmem:[%s2710_s1 + $0x70] ss:$8 sps:$4 sm:$0xff]  }
  0x1e   : > { %v1771_v12 = vld [vmem:[%s2306_s24 + $0x8] sm:$0xe]  ;;  %v2047_v17 = vld [vmem:[%s2710_s1 + $0x2f0] ss:$8 sps:$4 sm:$0xff]   ;;  %v2052_v18 = vld [vmem:[%s2710_s1 + $0x104] ss:$8 sps:$4 sm:$0xff]  }
  0x1f   : > { %v1788_v16 = vcombine.low %v1771_v12, %v2330_v35  ;;  %v2055_v19 = vld [vmem:[%s2710_s1 + $0x304] ss:$8 sps:$4 sm:$0xff]   ;;  %v2050_v20 = vld [vmem:[%s2710_s1 + $0x100] ss:$8 sps:$4 sm:$0xff]   ;;  %v2059_v23 = vld [vmem:[%s2710_s1 + $0x114] ss:$8 sps:$4 sm:$0xff]  }
  0x20   : > { %342 = vmatpush1.bf16.msra.mxu1 %v1992_v27  ;;  %904 = vmatpush1.bf16.msra.mxu0 %v1993_v28  ;;  %v2053_v22 = vld [vmem:[%s2710_s1 + $0x300] ss:$8 sps:$4 sm:$0xff]   ;;  %v2062_v24 = vld [vmem:[%s2710_s1 + $0x314] ss:$8 sps:$4 sm:$0xff]   ;;  %v2057_v25 = vld [vmem:[%s2710_s1 + $0x110] ss:$8 sps:$4 sm:$0xff]  }
  0x21   : > { %343 = vmatprep.subr.bf16.mxu1 %v1994_v29  ;;  %905 = vmatprep.subr.bf16.mxu0 %v1996_v30  ;;  %v955_v21 = vrot.slane %v1788_v16, 1  ;;  %v2060_v26 = vld [vmem:[%s2710_s1 + $0x310] ss:$8 sps:$4 sm:$0xff]   ;;  %v2065_v27 = vld [vmem:[%s2710_s1 + $0x124] ss:$8 sps:$4 sm:$0xff]  }
  0x22   : > { %v2068_v28 = vld [vmem:[%s2710_s1 + $0x324] ss:$8 sps:$4 sm:$0xff]   ;;  %v2063_v29 = vld [vmem:[%s2710_s1 + $0x120] ss:$8 sps:$4 sm:$0xff]   ;;  %v2074_v33 = vld [vmem:[%s2710_s1 + $0x334] ss:$8 sps:$4 sm:$0xff]  }
  0x23   : > { %v2066_v30 = vld [vmem:[%s2710_s1 + $0x320] ss:$8 sps:$4 sm:$0xff]   ;;  %v2069_v34 = vld [vmem:[%s2710_s1 + $0x130] ss:$8 sps:$4 sm:$0xff]   ;;  %v2077_v36 = vld [vmem:[%s2710_s1 + $0x144] ss:$8 sps:$4 sm:$0xff]  }
  0x24   : > { %344 = vmatpush1.bf16.msra.mxu1 %v1998_v37  ;;  %906 = vmatpush1.bf16.msra.mxu0 %v1999_v40  ;;  %v2072_v35 = vld [vmem:[%s2710_s1 + $0x330] ss:$8 sps:$4 sm:$0xff]   ;;  %v2080_v37 = vld [vmem:[%s2710_s1 + $0x344] ss:$8 sps:$4 sm:$0xff]   ;;  %v2075_v38 = vld [vmem:[%s2710_s1 + $0x140] ss:$8 sps:$4 sm:$0xff]  }
  0x25   : > { %450 = vmatprep.subr.bf16.mxu1 %v2002_v43  ;;  %1037 = vmatprep.subr.bf16.mxu0 %v2005_v44  ;;  %v2078_v39 = vld [vmem:[%s2710_s1 + $0x340] ss:$8 sps:$4 sm:$0xff]   ;;  %v2083_v40 = vld [vmem:[%s2710_s1 + $0x154] ss:$8 sps:$4 sm:$0xff]   ;;  %v2081_v42 = vld [vmem:[%s2710_s1 + $0x150] ss:$8 sps:$4 sm:$0xff]  }
  0x26   : > { %v2086_v41 = vld [vmem:[%s2710_s1 + $0x354] ss:$8 sps:$4 sm:$0xff]   ;;  %v2084_v43 = vld [vmem:[%s2710_s1 + $0x350] ss:$8 sps:$4 sm:$0xff]   ;;  %v2089_v44 = vld [vmem:[%s2710_s1 + $0x164] ss:$8 sps:$4 sm:$0xff]  }
  0x27   : > { %362 = vmatmul.mubr.bf16.vlgmr.msra.gmra.mrb[0].mxu1 %v247_v49  ;;  %924 = vmatmul.mubr.bf16.vlgmr.msra.gmra.mrb[0].mxu0 %v809_v50  ;;  %v2092_v45 = vld [vmem:[%s2710_s1 + $0x364] ss:$8 sps:$4 sm:$0xff]   ;;  %v2087_v46 = vld [vmem:[%s2710_s1 + $0x160] ss:$8 sps:$4 sm:$0xff]   ;;  %v2095_v49 = vld [vmem:[%s2710_s1 + $0x174] ss:$8 sps:$4 sm:$0xff]  }
  0x28   : > { %451 = vmatpush1.bf16.msra.mxu1 %v2000_v47  ;;  %1038 = vmatpush1.bf16.msra.mxu0 %v2003_v48  ;;  %v2090_v47 = vld [vmem:[%s2710_s1 + $0x360] ss:$8 sps:$4 sm:$0xff]   ;;  %v2098_v50 = vld [vmem:[%s2710_s1 + $0x374] ss:$8 sps:$4 sm:$0xff]   ;;  %v1838_v12 = vld [vmem:[%s2306_s24 + $0x10] sm:$0xf] }
  0x29   : > { %452 = vmatprep.subr.bf16.mxu1 %v2010_v51  ;;  %1039 = vmatprep.subr.bf16.mxu0 %v2013_v52  ;;  %v491_v48 = vld [vmem:[%s2306_s24] sm:$0xe]  ;;  %v2093_v52 = vld [vmem:[%s2710_s1 + $0x170] ss:$8 sps:$4 sm:$0xff]  }
  0x2a   : > { %482 = vmatprep.mubr.bf16.mxu1 %v2182_v2  ;;  %1069 = vmatprep.mubr.bf16.mxu0 %v2182_v2  ;;  %v1686_v51 = vcombine.low %v491_v48, %v2324_v32  ;;  %v2104_v32 = vld [vmem:[%s2710_s1 + $0x384] ss:$8 sps:$4 sm:$0xff]  }
  0x2c   : > { %453 = vmatpush1.bf16.msra.mxu1 %v2008_v53  ;;  %1040 = vmatpush1.bf16.msra.mxu0 %v2011_v54  ;;  %v2096_v53 = vld [vmem:[%s2710_s1 + $0x370] ss:$8 sps:$4 sm:$0xff]   ;;  %v2101_v54 = vld [vmem:[%s2710_s1 + $0x184] ss:$8 sps:$4 sm:$0xff]  }
  0x2d   : > { %454 = vmatprep.subr.bf16.mxu1 %v2016_v55  ;;  %1041 = vmatprep.subr.bf16.mxu0 %v2019_v56  ;;  %v2099_v55 = vld [vmem:[%s2710_s1 + $0x180] ss:$8 sps:$4 sm:$0xff]  }
  0x2e   : > { %v2102_v56 = vld [vmem:[%s2710_s1 + $0x380] ss:$8 sps:$4 sm:$0xff]  }
  0x30   : > { %455 = vmatpush1.bf16.msra.mxu1 %v2014_v57  ;;  %1042 = vmatpush1.bf16.msra.mxu0 %v2017_v58  ;;  %v512_v57 = vrot.slane %v1686_v51, 1  ;;  %v1805_v58 = vld [vmem:[%s2306_s24 + $0x10] sm:$0xf] }
  0x31   : > { %456 = vmatprep.subr.bf16.mxu1 %v2022_v59  ;;  %1043 = vmatprep.subr.bf16.mxu0 %v2025_v60  ;;  %v2108_v59 = vld [vmem:[%s2710_s1 + $0x194] ss:$8 sps:$4 sm:$0xff]  }
  0x32   : > { %v2111_v60 = vld [vmem:[%s2710_s1 + $0x394] ss:$8 sps:$4 sm:$0xff]  }
  0x34   : > { %457 = vmatpush1.bf16.msra.mxu1 %v2020_v61  ;;  %1044 = vmatpush1.bf16.msra.mxu0 %v2023_v62  ;;  %v2106_v61 = vld [vmem:[%s2710_s1 + $0x190] ss:$8 sps:$4 sm:$0xff]  }
  0x35   : > { %458 = vmatprep.subr.bf16.mxu1 %v2028_v63  ;;  %1045 = vmatprep.subr.bf16.mxu0 %v2031_v0  ;;  %v2109_v62 = vld [vmem:[%s2710_s1 + $0x390] ss:$8 sps:$4 sm:$0xff]   ;;  %v2114_v63 = vld [vmem:[%s2710_s1 + $0x1a4] ss:$8 sps:$4 sm:$0xff]  }
  0x36   : > { %v2117_v0 = vld [vmem:[%s2710_s1 + $0x3a4] ss:$8 sps:$4 sm:$0xff]  }
  0x38   : > { %459 = vmatpush1.bf16.msra.mxu1 %v2026_v1  ;;  %1046 = vmatpush1.bf16.msra.mxu0 %v2029_v3  ;;  %v2112_v1 = vld [vmem:[%s2710_s1 + $0x1a0] ss:$8 sps:$4 sm:$0xff]  }
  0x39   : > { %460 = vmatprep.subr.bf16.mxu1 %v2034_v4  ;;  %1047 = vmatprep.subr.bf16.mxu0 %v2037_v5  ;;  %v2115_v3 = vld [vmem:[%s2710_s1 + $0x3a0] ss:$8 sps:$4 sm:$0xff]   ;;  %v2120_v4 = vld [vmem:[%s2710_s1 + $0x1b4] ss:$8 sps:$4 sm:$0xff]  }
  0x3a   : > { %v2123_v5 = vld [vmem:[%s2710_s1 + $0x3b4] ss:$8 sps:$4 sm:$0xff]  }
  0x3c   : > { %461 = vmatpush1.bf16.msra.mxu1 %v2032_v6  ;;  %1048 = vmatpush1.bf16.msra.mxu0 %v2035_v7  ;;  %v2118_v6 = vld [vmem:[%s2710_s1 + $0x1b0] ss:$8 sps:$4 sm:$0xff]  }
  0x3d   : > { %462 = vmatprep.subr.bf16.mxu1 %v2040_v8  ;;  %1049 = vmatprep.subr.bf16.mxu0 %v2043_v9  ;;  %v2121_v7 = vld [vmem:[%s2710_s1 + $0x3b0] ss:$8 sps:$4 sm:$0xff]   ;;  %v2126_v8 = vld [vmem:[%s2710_s1 + $0x1c4] ss:$8 sps:$4 sm:$0xff]  }
  0x3e   : > { %v2129_v9 = vld [vmem:[%s2710_s1 + $0x3c4] ss:$8 sps:$4 sm:$0xff]  }
  0x40   : > { %463 = vmatpush1.bf16.msra.mxu1 %v2038_v10  ;;  %1050 = vmatpush1.bf16.msra.mxu0 %v2041_v11  ;;  %v2124_v10 = vld [vmem:[%s2710_s1 + $0x1c0] ss:$8 sps:$4 sm:$0xff]  }
  0x41   : > { %464 = vmatprep.subr.bf16.mxu1 %v2046_v13  ;;  %1051 = vmatprep.subr.bf16.mxu0 %v2049_v14  ;;  %v2127_v11 = vld [vmem:[%s2710_s1 + $0x3c0] ss:$8 sps:$4 sm:$0xff]   ;;  %v2605_v13 = vld [vmem:[%s2306_s24 + $0x14] sm:$0x1] }
  0x42   : > { %v2132_v14 = vld [vmem:[%s2710_s1 + $0x1d4] ss:$8 sps:$4 sm:$0xff]   ;;  %v1856_v16 = vcombine.low %v1838_v12, %v2605_v13 }
  0x44   : > { %465 = vmatpush1.bf16.msra.mxu1 %v2044_v15  ;;  %1052 = vmatpush1.bf16.msra.mxu0 %v2047_v17  ;;  %v2135_v15 = vld [vmem:[%s2710_s1 + $0x3d4] ss:$8 sps:$4 sm:$0xff]   ;;  %v2130_v17 = vld [vmem:[%s2710_s1 + $0x1d0] ss:$8 sps:$4 sm:$0xff]  }
  0x45   : > { %594 = vmatprep.subr.bf16.mxu1 %v2052_v18  ;;  %1179 = vmatprep.subr.bf16.mxu0 %v2055_v19  ;;  %v2133_v18 = vld [vmem:[%s2710_s1 + $0x3d0] ss:$8 sps:$4 sm:$0xff]   ;;  %v2138_v19 = vld [vmem:[%s2710_s1 + $0x1e4] ss:$8 sps:$4 sm:$0xff]  }
  0x47   : > { %483 = vmatmul.mubr.bf16.vlgmr.msra.gmra.mrb[0].mxu1 %v2321_v31  ;;  %1070 = vmatmul.mubr.bf16.vlgmr.msra.gmra.mrb[0].mxu0 %v955_v21  ;;  %v2071_v31 = vld [vmem:[%s2710_s1 + $0x134] ss:$8 sps:$4 sm:$0xff]   ;;  %v1249_v21 = vshll.u32 %v1856_v16, 16 }
  0x48   : > { %595 = vmatpush1.bf16.msra.mxu1 %v2050_v20  ;;  %1180 = vmatpush1.bf16.msra.mxu0 %v2053_v22  ;;  %v2141_v20 = vld [vmem:[%s2710_s1 + $0x3e4] ss:$8 sps:$4 sm:$0xff]   ;;  %v2136_v22 = vld [vmem:[%s2710_s1 + $0x1e0] ss:$8 sps:$4 sm:$0xff]  }
  0x49   : > { %596 = vmatprep.subr.bf16.mxu1 %v2059_v23  ;;  %1181 = vmatprep.subr.bf16.mxu0 %v2062_v24  ;;  %v2139_v23 = vld [vmem:[%s2710_s1 + $0x3e0] ss:$8 sps:$4 sm:$0xff]   ;;  %v2144_v24 = vld [vmem:[%s2710_s1 + $0x1f4] ss:$8 sps:$4 sm:$0xff]  }
  0x4a   : > { %626 = vmatprep.mubr.bf16.mxu1 %v2182_v2  ;;  %1211 = vmatprep.mubr.bf16.mxu0 %v2182_v2 }
  0x4c   : > { %597 = vmatpush1.bf16.msra.mxu1 %v2057_v25  ;;  %1182 = vmatpush1.bf16.msra.mxu0 %v2060_v26  ;;  %v2147_v25 = vld [vmem:[%s2710_s1 + $0x3f4] ss:$8 sps:$4 sm:$0xff]   ;;  %v1247_v26 = vshrl.u32 %v1856_v16, 16 }
  0x4d   : > { %598 = vmatprep.subr.bf16.mxu1 %v2065_v27  ;;  %1183 = vmatprep.subr.bf16.mxu0 %v2068_v28  ;;  %v1251_v27 = vrot.slane %v1249_v21, 1  ;;  %v2142_v28 = vld [vmem:[%s2710_s1 + $0x1f0] ss:$8 sps:$4 sm:$0xff]  }
  0x50   : > { %599 = vmatpush1.bf16.msra.mxu1 %v2063_v29  ;;  %1184 = vmatpush1.bf16.msra.mxu0 %v2066_v30  ;;  %v2145_v29 = vld [vmem:[%s2710_s1 + $0x3f0] ss:$8 sps:$4 sm:$0xff]   ;;  %v2150_v30 = vld [vmem:[%s2710_s1 + $0x404] ss:$8 sps:$4 sm:$0xff]  }
  0x51   : > { %600 = vmatprep.subr.bf16.mxu1 %v2071_v31  ;;  %1185 = vmatprep.subr.bf16.mxu0 %v2074_v33  ;;  %v1252_v31 = vor.u32 %v1251_v27, %v1247_v26  ;;  %v1703_v33 = vld [vmem:[%s2306_s24 + $0x8] sm:$0xf] }
  0x54   : > { %601 = vmatpush1.bf16.msra.mxu1 %v2069_v34  ;;  %1186 = vmatpush1.bf16.msra.mxu0 %v2072_v35  ;;  %v2148_v34 = vld [vmem:[%s2710_s1 + $0x400] ss:$8 sps:$4 sm:$0xff]   ;;  %v2154_v35 = vld [vmem:[%s2710_s1 + $0x414] ss:$8 sps:$4 sm:$0xff]  }
  0x55   : > { %602 = vmatprep.subr.bf16.mxu1 %v2077_v36  ;;  %1187 = vmatprep.subr.bf16.mxu0 %v2080_v37  ;;  %v2152_v36 = vld [vmem:[%s2710_s1 + $0x410] ss:$8 sps:$4 sm:$0xff]   ;;  %v2157_v37 = vld [vmem:[%s2710_s1 + $0x424] ss:$8 sps:$4 sm:$0xff]  }
  0x58   : > { %603 = vmatpush1.bf16.msra.mxu1 %v2075_v38  ;;  %1188 = vmatpush1.bf16.msra.mxu0 %v2078_v39  ;;  %v2155_v38 = vld [vmem:[%s2710_s1 + $0x420] ss:$8 sps:$4 sm:$0xff]   ;;  %v2160_v39 = vld [vmem:[%s2710_s1 + $0x434] ss:$8 sps:$4 sm:$0xff]  }
  0x59   : > { %604 = vmatprep.subr.bf16.mxu1 %v2083_v40  ;;  %1189 = vmatprep.subr.bf16.mxu0 %v2086_v41  ;;  %v2163_v40 = vld [vmem:[%s2710_s1 + $0x444] ss:$8 sps:$4 sm:$0xff]   ;;  %v2161_v41 = vld [vmem:[%s2710_s1 + $0x440] ss:$8 sps:$4 sm:$0xff]  }
  0x5c   : > { %605 = vmatpush1.bf16.msra.mxu1 %v2081_v42  ;;  %1190 = vmatpush1.bf16.msra.mxu0 %v2084_v43  ;;  %v2166_v42 = vld [vmem:[%s2710_s1 + $0x454] ss:$8 sps:$4 sm:$0xff]   ;;  %v2164_v43 = vld [vmem:[%s2710_s1 + $0x450] ss:$8 sps:$4 sm:$0xff]  }
  0x5d   : > { %606 = vmatprep.subr.bf16.mxu1 %v2089_v44  ;;  %1191 = vmatprep.subr.bf16.mxu0 %v2092_v45  ;;  %v2169_v44 = vld [vmem:[%s2710_s1 + $0x464] ss:$8 sps:$4 sm:$0xff]   ;;  %v2167_v45 = vld [vmem:[%s2710_s1 + $0x460] ss:$8 sps:$4 sm:$0xff]  }
  0x60   : > { %607 = vmatpush1.bf16.msra.mxu1 %v2087_v46  ;;  %1192 = vmatpush1.bf16.msra.mxu0 %v2090_v47  ;;  %v1873_v46 = vld [vmem:[%s2306_s24 + $0x10] sm:$0xe]  ;;  %v2172_v47 = vld [vmem:[%s2710_s1 + $0x474] ss:$8 sps:$4 sm:$0xff]  }
  0x61   : > { %608 = vmatprep.subr.bf16.mxu1 %v2095_v49  ;;  %1193 = vmatprep.subr.bf16.mxu0 %v2098_v50  ;;  %v1890_v48 = vcombine.low %v1873_v46, %v2605_v13  ;;  %v2170_v49 = vld [vmem:[%s2710_s1 + $0x470] ss:$8 sps:$4 sm:$0xff]  }
  0x63   : > { %v1398_v50 = vrot.slane %v1890_v48, 1 }
  0x64   : > { %609 = vmatpush1.bf16.msra.mxu1 %v2093_v52  ;;  %1194 = vmatpush1.bf16.msra.mxu0 %v2096_v53 }
  0x65   : > { %736 = vmatprep.subr.bf16.mxu1 %v2101_v54  ;;  %1334 = vmatprep.subr.bf16.mxu0 %v2104_v32  ;;  %v1524_v32 = vlaneseq }
  0x67   : > { %627 = vmatmul.mubr.bf16.vlgmr.msra.gmra.mrb[0].mxu1 %v512_v57  ;;  %1212 = vmatmul.mubr.bf16.vlgmr.msra.gmra.mrb[0].mxu0 %v1805_v58  ;;  %v199_v57 = vld [vmem:[%s2711_s2] sm:$0x3] }
  0x68   : > { %737 = vmatpush1.bf16.msra.mxu1 %v2099_v55  ;;  %1335 = vmatpush1.bf16.msra.mxu0 %v2102_v56  ;;  %v1525_v55 = vshrl.u32 %v1524_v32, 7 }
  0x69   : > { %738 = vmatprep.subr.bf16.mxu1 %v2108_v59  ;;  %1336 = vmatprep.subr.bf16.mxu0 %v2111_v60  ;;  %v200_v59 = vld [vmem:[%s2712_s3] sm:$0x3] }
  0x6a   : > { %768 = vmatprep.mubr.bf16.mxu1 %v2182_v2  ;;  %1366 = vmatprep.mubr.bf16.mxu0 %v2182_v2  ;;  %v1526_v56 = vsub.s32 0, %v1525_v55  ;;  %v1530_v58 = vsub.s32 1, %v1525_v55 }
  0x6c   : > { %739 = vmatpush1.bf16.msra.mxu1 %v2106_v61  ;;  %1337 = vmatpush1.bf16.msra.mxu0 %v2109_v62  ;;  %v1527_v60 = vrot.slane %v199_v57, %v1526_v56  ;;  %v1531_v62 = vrot.slane %v199_v57, %v1530_v58 }
  0x6d   : > { %740 = vmatprep.subr.bf16.mxu1 %v2114_v63  ;;  %1338 = vmatprep.subr.bf16.mxu0 %v2117_v0  ;;  %v1540_v0 = vrot.slane %v200_v59, %v1526_v56 }
  0x70   : > { %741 = vmatpush1.bf16.msra.mxu1 %v2112_v1  ;;  %1339 = vmatpush1.bf16.msra.mxu0 %v2115_v3 }
  0x71   : > { %742 = vmatprep.subr.bf16.mxu1 %v2120_v4  ;;  %1340 = vmatprep.subr.bf16.mxu0 %v2123_v5  ;;  %v1544_v4 = vrot.slane %v200_v59, %v1530_v58 }
  0x74   : > { %743 = vmatpush1.bf16.msra.mxu1 %v2118_v6  ;;  %1341 = vmatpush1.bf16.msra.mxu0 %v2121_v7 }
  0x75   : > { %744 = vmatprep.subr.bf16.mxu1 %v2126_v8  ;;  %1342 = vmatprep.subr.bf16.mxu0 %v2129_v9 }
  0x78   : > { %745 = vmatpush1.bf16.msra.mxu1 %v2124_v10  ;;  %1343 = vmatpush1.bf16.msra.mxu0 %v2127_v11 }
  0x79   : > { %746 = vmatprep.subr.bf16.mxu1 %v2132_v14  ;;  %1344 = vmatprep.subr.bf16.mxu0 %v2135_v15 }
  0x7c   : > { %747 = vmatpush1.bf16.msra.mxu1 %v2130_v17  ;;  %1345 = vmatpush1.bf16.msra.mxu0 %v2133_v18 }
  0x7d   : > { %748 = vmatprep.subr.bf16.mxu1 %v2138_v19  ;;  %1346 = vmatprep.subr.bf16.mxu0 %v2141_v20 }
  0x80   : > { %749 = vmatpush1.bf16.msra.mxu1 %v2136_v22  ;;  %1347 = vmatpush1.bf16.msra.mxu0 %v2139_v23 }
  0x81   : > { %750 = vmatprep.subr.bf16.mxu1 %v2144_v24  ;;  %1348 = vmatprep.subr.bf16.mxu0 %v2147_v25 }
  0x84   : > { %751 = vmatpush1.bf16.msra.mxu1 %v2142_v28  ;;  %1349 = vmatpush1.bf16.msra.mxu0 %v2145_v29 }
  0x85   : > { %1480 = vmatprep.subr.bf16.mxu0 %v2150_v30 }
  0x87   : > { %769 = vmatmul.mubr.bf16.vlgmr.msra.gmra.mrb[0].mxu1 %v1703_v33  ;;  %1367 = vmatmul.mubr.bf16.vlgmr.msra.gmra.mrb[0].mxu0 %v1252_v31 }
  0x88   : > { %1481 = vmatpush1.bf16.msra.mxu0 %v2148_v34  ;;  %1512 = vmatprep.mubr.bf16.mxu0 %v2182_v2  ;;  %v2158_v2 = vld [vmem:[%s2710_s1 + $0x430] ss:$8 sps:$4 sm:$0xff]  }
  0x89   : > { %1482 = vmatprep.subr.bf16.mxu0 %v2154_v35 }
  0x8c   : > { %1483 = vmatpush1.bf16.msra.mxu0 %v2152_v36 }
  0x8d   : > { %1484 = vmatprep.subr.bf16.mxu0 %v2157_v37 }
  0x90   : > { %1485 = vmatpush1.bf16.msra.mxu0 %v2155_v38 }
  0x91   : > { %1486 = vmatprep.subr.bf16.mxu0 %v2160_v39 }
  0x94   : > { %1487 = vmatpush1.bf16.msra.mxu0 %v2158_v2 }
  0x95   : > { %1488 = vmatprep.subr.bf16.mxu0 %v2163_v40 }
  0x98   : > { %1489 = vmatpush1.bf16.msra.mxu0 %v2161_v41 }
  0x99   : > { %1490 = vmatprep.subr.bf16.mxu0 %v2166_v42 }
  0x9c   : > { %1491 = vmatpush1.bf16.msra.mxu0 %v2164_v43 }
  0x9d   : > { %1492 = vmatprep.subr.bf16.mxu0 %v2169_v44 }
  0xa0   : > { %1493 = vmatpush1.bf16.msra.mxu0 %v2167_v45 }
  0xa1   : > { %1494 = vmatprep.subr.bf16.mxu0 %v2172_v47 }
  0xa4   : > { %1495 = vmatpush1.bf16.msra.mxu0 %v2170_v49 }
  0xa7   : > { %1513 = vmatmul.mubr.bf16.vlgmr.msra.gmra.mrb[0].mxu0 %v1398_v50 }
 0x15a   : > { %v770_v51 = vpop.f32.mrb[0].mxu1 }
 0x15b   : > { %v772_v52 = vpop.f32.mrb[1].mxu1 }
 0x15c   : > { %v774_v53 = vpop.f32.mrb[2].mxu1 }
 0x15d   : > { %v775_v54 = vpop.f32.mrb[3].mxu1 }
 0x17a   : > { %v1514_v61 = vpop.f32.mrb[0].mxu0 }
 0x17b   : > { %v1912_v63 = vadd.f32 %v1514_v61, %v770_v51  ;;  %v1516_v1 = vpop.f32.mrb[1].mxu0 }
 0x17c   : > { %v1913_v3 = vadd.f32 %v1516_v1, %v772_v52  ;;  %v1518_v5 = vpop.f32.mrb[2].mxu0 }
 0x17d   : > { %v1534_v6 = vmul.f32 %v1912_v63, %v1527_v60  ;;  %v1519_v7 = vpop.f32.mrb[3].mxu0 }
 0x17e   : > { %v1535_v8 = vmul.f32 %v1913_v3, %v1531_v62 }
 0x17f   : > { %v1547_v9 = vadd.f32 %v1540_v0, %v1534_v6 }
 0x180   : > { %v1548_v10 = vadd.f32 %v1544_v4, %v1535_v8 }
 0x182   : > { %v1911_v11 = vpack.c.bf16 %v1548_v10, %v1547_v9 }
 0x184   : > { %1557 = vst [vmem:[%s197_s11] sm:$0xff] %v1911_v11 }
 0x185 PF: > { %s14_s15 = sadd.s32 1, %s2180_s15  }
 0x186   : > { %p11_p4 = scmp.ge.s32.totalorder %s14_s15, 4  }
 0x188   :  { %13 = sbr.rel (!%p11_p4) target bundleno = 1 (0x1), region = 76 }

</bundles_post_ra>
